<compile_context>
chip_gen: v7x
topology: tpu7x:2x2x1
jax: 0.10.0
libtpu: 0.0.40
codegen_flags: <defaults>
</compile_context>

<pallas_src>
import math

import jax
import jax.numpy as jnp
from jax.experimental import pallas as pl
from jax.experimental.pallas import tpu as pltpu


def memory_cell_kernel(
    x_ref,      # (Bb, T, 2)
    wihT_ref,   # (2, 4H)   = W_ih.T
    whhT_ref,   # (H, 4H)   = W_hh.T
    b_ref,      # (1, 4H)   = b_ih + b_hh
    wqT_ref,    # (H, H)
    wkT_ref,    # (H, H)
    wvT_ref,    # (H, H)
    bq_ref,     # (1, H)
    bk_ref,     # (1, H)
    bv_ref,     # (1, H)
    woT_ref,    # (H, H)    = out_proj.weight.T
    bo_ref,     # (1, H)
    wf_ref,     # (1, H)    = out.weight (row)
    bf_ref,     # (1, 1)
    out_ref,    # (Bb, T)   lane-dense output
    hs_ref,     # scratch (Bb, T, H)
):
    Bb, T, H = hs_ref.shape

    # ---- Hoisted input projection for all timesteps (K=2, so VPU beats MXU) ----
    x = x_ref[...]                                        # (Bb, T, 2)
    xp = (x[:, :, 0:1] * wihT_ref[0:1, :]
          + x[:, :, 1:2] * wihT_ref[1:2, :]
          + b_ref[...])                                   # (Bb, T, 4H)

    whhT = whhT_ref[...]                                  # (H, 4H)

    # ---- LSTM recurrence (PyTorch gate order i, f, g, o), fully unrolled ----
    # TODO(synk): for large static T this unroll should fall back to pl.loop.
    h = jnp.zeros((Bb, H), jnp.float32)
    c = jnp.zeros((Bb, H), jnp.float32)
    for t in range(T):
        gates = xp[:, t, :] + jnp.dot(h, whhT, preferred_element_type=jnp.float32)
        sig = jax.nn.sigmoid(gates)                       # one full-width EUP pass
        th = jnp.tanh(gates)                              # one full-width EUP pass
        i_g = sig[:, 0:H]
        f_g = sig[:, H:2 * H]
        o_g = sig[:, 3 * H:4 * H]
        g_g = th[:, 2 * H:3 * H]
        c = f_g * c + i_g * g_g
        h = o_g * jnp.tanh(c)
        hs_ref[:, pl.ds(t, 1), :] = h.reshape(Bb, 1, H)

    # ---- Single-head self-attention (q = k = v = lstm_out), batched over Bb ----
    hs2 = hs_ref[...].reshape(Bb * T, H)
    q = (jnp.dot(hs2, wqT_ref[...], preferred_element_type=jnp.float32)
         + bq_ref[...]).reshape(Bb, T, H)
    k = (jnp.dot(hs2, wkT_ref[...], preferred_element_type=jnp.float32)
         + bk_ref[...]).reshape(Bb, T, H)
    v = (jnp.dot(hs2, wvT_ref[...], preferred_element_type=jnp.float32)
         + bv_ref[...]).reshape(Bb, T, H)

    scale = 1.0 / math.sqrt(H)
    s = jnp.einsum("bqd,bkd->bqk", q, k, preferred_element_type=jnp.float32) * scale
    m = jnp.max(s, axis=-1, keepdims=True)
    p = jnp.exp(s - m)
    l = jnp.sum(p, axis=-1, keepdims=True)
    p = p * pl.reciprocal(l, approx=True)
    attn = jnp.einsum("bqk,bkd->bqd", p, v, preferred_element_type=jnp.float32)   # (Bb, T, H)

    o2 = (jnp.dot(attn.reshape(Bb * T, H), woT_ref[...],
                  preferred_element_type=jnp.float32)
          + bo_ref[...]).reshape(Bb, T, H)

    # ---- Final Linear(H, 1) as VPU multiply + lane reduce -> lane-dense store ----
    out_ref[...] = jnp.sum(o2 * wf_ref[...], axis=-1) + bf_ref[...]


def memory_cell_forward(x, params, *, b_blk=8):
    B, T, c_in = x.shape
    assert c_in == 2
    H = params["whhT"].shape[0]

    # Pad batch up to a multiple of the batch block (f32 sublane count = 8).
    B_pad = (B + b_blk - 1) // b_blk * b_blk
    if B_pad != B:
        x = jnp.pad(x, ((0, B_pad - B), (0, 0), (0, 0)))

    bias = params["bih"] + params["bhh"]                  # (1, 4H)
    wf_row = jnp.reshape(params["wfT"], (1, H))           # (1, H)

    weights = [
        params["wihT"], params["whhT"], bias,
        params["wqT"], params["wkT"], params["wvT"],
        params["bq"], params["bk"], params["bv"],
        params["woT"], params["bo"], wf_row, params["bf"],
    ]

    def full_spec(a):
        nd = a.ndim
        return pl.BlockSpec(a.shape, lambda b, _nd=nd: (0,) * _nd)

    in_specs = ([pl.BlockSpec((b_blk, T, 2), lambda b: (b, 0, 0))]
                + [full_spec(a) for a in weights])

    out = pl.pallas_call(
        memory_cell_kernel,
        out_shape=jax.ShapeDtypeStruct((B_pad, T), jnp.float32),
        grid_spec=pltpu.PrefetchScalarGridSpec(
            num_scalar_prefetch=0,
            grid=(B_pad // b_blk,),
            in_specs=in_specs,
            out_specs=pl.BlockSpec((b_blk, T), lambda b: (b, 0)),
            scratch_shapes=[pltpu.VMEM((b_blk, T, H), jnp.float32)],
        ),
        compiler_params=pltpu.CompilerParams(dimension_semantics=("parallel",)),
    )(x, *weights)
    return out[:B]


def init_params(key, hidden_dim):
    H = hidden_dim
    ks = jax.random.split(key, 12)
    u = lambda k, shape, s: jax.random.uniform(k, shape, jnp.float32, -s, s)
    std = 1.0 / math.sqrt(H)

    w_ih = u(ks[0], (4 * H, 2), std)         # LSTM
    w_hh = u(ks[1], (4 * H, H), std)
    b_ih = u(ks[2], (4 * H,), std)
    b_hh = u(ks[3], (4 * H,), std)

    in_proj_w = u(ks[4], (3 * H, H), std)    # MHA in-proj
    in_proj_b = u(ks[5], (3 * H,), std)
    out_proj_w = u(ks[6], (H, H), std)       # MHA out-proj
    out_proj_b = u(ks[7], (H,), std)

    out_w = u(ks[8], (1, H), std)            # final Linear(H, 1)
    out_b = u(ks[9], (1,), std)

    return {
        "wihT": w_ih.T,                              # (2, 4H)
        "whhT": w_hh.T,                              # (H, 4H)
        "bih": b_ih.reshape(1, -1),
        "bhh": b_hh.reshape(1, -1),
        "wqT": in_proj_w[0:H].T,                     # (H, H)
        "wkT": in_proj_w[H:2 * H].T,
        "wvT": in_proj_w[2 * H:3 * H].T,
        "bq": in_proj_b[0:H].reshape(1, -1),
        "bk": in_proj_b[H:2 * H].reshape(1, -1),
        "bv": in_proj_b[2 * H:3 * H].reshape(1, -1),
        "woT": out_proj_w.T,                         # (H, H)
        "bo": out_proj_b.reshape(1, -1),
        "wfT": out_w.T,                              # (H, 1)
        "bf": out_b.reshape(1, 1),
    }


def memory_cell_reference(x, p):
    """Pure-JAX reference replicating PyTorch semantics."""
    B, T, _ = x.shape
    H = p["whhT"].shape[0]

    def step(carry, x_t):
        h, c = carry
        gates = x_t @ p["wihT"] + h @ p["whhT"] + p["bih"] + p["bhh"]
        i = jax.nn.sigmoid(gates[:, 0:H])
        f = jax.nn.sigmoid(gates[:, H:2 * H])
        g = jnp.tanh(gates[:, 2 * H:3 * H])
        o = jax.nn.sigmoid(gates[:, 3 * H:4 * H])
        c = f * c + i * g
        h = o * jnp.tanh(c)
        return (h, c), h

    h0 = jnp.zeros((B, H), jnp.float32)
    _, hs = jax.lax.scan(step, (h0, h0), jnp.swapaxes(x, 0, 1))
    hs = jnp.swapaxes(hs, 0, 1)                              # (B, T, H)

    q = hs @ p["wqT"] + p["bq"]
    k = hs @ p["wkT"] + p["bk"]
    v = hs @ p["wvT"] + p["bv"]
    s = jnp.einsum("btd,bsd->bts", q, k) / math.sqrt(H)
    w = jax.nn.softmax(s, axis=-1)
    attn = jnp.einsum("bts,bsd->btd", w, v) @ p["woT"] + p["bo"]
    score = attn @ p["wfT"] + p["bf"]
    return score[..., 0]


if __name__ == "__main__":
    B, T, H = 2, 8, 32
    key = jax.random.PRNGKey(0)
    kx, kp = jax.random.split(key)
    x = jax.random.normal(kx, (B, T, 2), jnp.float32)
    params = init_params(kp, H)

    out = jax.block_until_ready(memory_cell_forward(x, params))
    ref = memory_cell_reference(x, params)

    assert out.shape == (B, T)
    assert bool(jnp.all(jnp.isfinite(out)))
    assert bool(jnp.allclose(out, ref, rtol=2e-2, atol=2e-2))
    print("KERNEL_OK")
</pallas_src>

<mosaic_0001>
module attributes {stable_mosaic.version = 11 : i64} {
  func.func @memory_cell_kernel(%arg0: i32, %arg1: memref<8x8x2xf32, #tpu.memory_space<vmem>>, %arg2: memref<2x128xf32, #tpu.memory_space<vmem>>, %arg3: memref<32x128xf32, #tpu.memory_space<vmem>>, %arg4: memref<1x128xf32, #tpu.memory_space<vmem>>, %arg5: memref<32x32xf32, #tpu.memory_space<vmem>>, %arg6: memref<32x32xf32, #tpu.memory_space<vmem>>, %arg7: memref<32x32xf32, #tpu.memory_space<vmem>>, %arg8: memref<1x32xf32, #tpu.memory_space<vmem>>, %arg9: memref<1x32xf32, #tpu.memory_space<vmem>>, %arg10: memref<1x32xf32, #tpu.memory_space<vmem>>, %arg11: memref<32x32xf32, #tpu.memory_space<vmem>>, %arg12: memref<1x32xf32, #tpu.memory_space<vmem>>, %arg13: memref<1x32xf32, #tpu.memory_space<vmem>>, %arg14: memref<1x1xf32, #tpu.memory_space<vmem>>, %arg15: memref<8x8xf32, #tpu.memory_space<vmem>>, %arg16: memref<8x8x32xf32, #tpu.memory_space<vmem>>) attributes {dimension_semantics = [#tpu.dimension_semantics<parallel>], iteration_bounds = array<i64: 1>, scalar_prefetch = 0 : i64, scratch_operands = 1 : i64, tpu.core_type = #tpu.core_type<tc>, window_params = [{transform_indices = @transform_0, window_bounds = array<i64: 8, 8, 2>}, {pipeline_mode = #tpu.pipeline_mode<synchronous>, transform_indices = @transform_1, window_bounds = array<i64: 2, 128>}, {pipeline_mode = #tpu.pipeline_mode<synchronous>, transform_indices = @transform_2, window_bounds = array<i64: 32, 128>}, {pipeline_mode = #tpu.pipeline_mode<synchronous>, transform_indices = @transform_3, window_bounds = array<i64: 1, 128>}, {pipeline_mode = #tpu.pipeline_mode<synchronous>, transform_indices = @transform_4, window_bounds = array<i64: 32, 32>}, {pipeline_mode = #tpu.pipeline_mode<synchronous>, transform_indices = @transform_5, window_bounds = array<i64: 32, 32>}, {pipeline_mode = #tpu.pipeline_mode<synchronous>, transform_indices = @transform_6, window_bounds = array<i64: 32, 32>}, {pipeline_mode = #tpu.pipeline_mode<synchronous>, transform_indices = @transform_7, window_bounds = array<i64: 1, 32>}, {pipeline_mode = #tpu.pipeline_mode<synchronous>, transform_indices = @transform_8, window_bounds = array<i64: 1, 32>}, {pipeline_mode = #tpu.pipeline_mode<synchronous>, transform_indices = @transform_9, window_bounds = array<i64: 1, 32>}, {pipeline_mode = #tpu.pipeline_mode<synchronous>, transform_indices = @transform_10, window_bounds = array<i64: 32, 32>}, {pipeline_mode = #tpu.pipeline_mode<synchronous>, transform_indices = @transform_11, window_bounds = array<i64: 1, 32>}, {pipeline_mode = #tpu.pipeline_mode<synchronous>, transform_indices = @transform_12, window_bounds = array<i64: 1, 32>}, {pipeline_mode = #tpu.pipeline_mode<synchronous>, transform_indices = @transform_13, window_bounds = array<i64: 1, 1>}, {transform_indices = @transform_14, window_bounds = array<i64: 8, 8>}]} {
    %c0 = arith.constant 0 : index
    %c0_0 = arith.constant 0 : index
    %c0_1 = arith.constant 0 : index
    %0 = vector.load %arg1[%c0, %c0_0, %c0_1] : memref<8x8x2xf32, #tpu.memory_space<vmem>>, vector<8x8x2xf32>
    %1 = vector.extract_strided_slice %0 {offsets = [0, 0, 0], sizes = [8, 8, 1], strides = [1, 1, 1]} : vector<8x8x2xf32> to vector<8x8x1xf32>
    %c0_2 = arith.constant 0 : index
    %c0_3 = arith.constant 0 : index
    %2 = vector.load %arg2[%c0_2, %c0_3] : memref<2x128xf32, #tpu.memory_space<vmem>>, vector<1x128xf32>
    %3 = vector.shape_cast %2 : vector<1x128xf32> to vector<1x1x128xf32>
    %4 = vector.broadcast %1 : vector<8x8x1xf32> to vector<8x8x128xf32>
    %5 = vector.broadcast %3 : vector<1x1x128xf32> to vector<8x8x128xf32>
    %6 = arith.mulf %4, %5 : vector<8x8x128xf32>
    %7 = vector.extract_strided_slice %0 {offsets = [0, 0, 1], sizes = [8, 8, 1], strides = [1, 1, 1]} : vector<8x8x2xf32> to vector<8x8x1xf32>
    %c1 = arith.constant 1 : index
    %c0_4 = arith.constant 0 : index
    %8 = vector.load %arg2[%c1, %c0_4] : memref<2x128xf32, #tpu.memory_space<vmem>>, vector<1x128xf32>
    %9 = vector.shape_cast %8 : vector<1x128xf32> to vector<1x1x128xf32>
    %10 = vector.broadcast %7 : vector<8x8x1xf32> to vector<8x8x128xf32>
    %11 = vector.broadcast %9 : vector<1x1x128xf32> to vector<8x8x128xf32>
    %12 = arith.mulf %10, %11 : vector<8x8x128xf32>
    %13 = arith.addf %6, %12 : vector<8x8x128xf32>
    %c0_5 = arith.constant 0 : index
    %c0_6 = arith.constant 0 : index
    %14 = vector.load %arg4[%c0_5, %c0_6] : memref<1x128xf32, #tpu.memory_space<vmem>>, vector<1x128xf32>
    %15 = vector.shape_cast %14 : vector<1x128xf32> to vector<1x1x128xf32>
    %16 = vector.broadcast %15 : vector<1x1x128xf32> to vector<8x8x128xf32>
    %17 = arith.addf %13, %16 : vector<8x8x128xf32>
    %c0_7 = arith.constant 0 : index
    %c0_8 = arith.constant 0 : index
    %18 = vector.load %arg3[%c0_7, %c0_8] : memref<32x128xf32, #tpu.memory_space<vmem>>, vector<32x128xf32>
    %cst = arith.constant 0.000000e+00 : f32
    %19 = vector.broadcast %cst : f32 to vector<8x32xf32>
    %cst_9 = arith.constant 0.000000e+00 : f32
    %20 = vector.broadcast %cst_9 : f32 to vector<8x32xf32>
    %21 = vector.extract_strided_slice %17 {offsets = [0, 0, 0], sizes = [8, 1, 128], strides = [1, 1, 1]} : vector<8x8x128xf32> to vector<8x1x128xf32>
    %22 = vector.shape_cast %21 : vector<8x1x128xf32> to vector<8x128xf32>
    %cst_10 = arith.constant dense<0.000000e+00> : vector<8x128xf32>
    %23 = tpu.matmul %19, %18, %cst_10 {dimension_numbers = #tpu.dot_dimension_numbers<[1], [0], [0], [1], [0, 0, 1, 1], [], []>} : vector<8x32xf32>, vector<32x128xf32>, vector<8x128xf32> -> vector<8x128xf32>
    %24 = arith.addf %22, %23 : vector<8x128xf32>
    %25 = arith.negf %24 : vector<8x128xf32>
    %26 = math.exp %25 : vector<8x128xf32>
    %cst_11 = arith.constant 1.000000e+00 : f32
    %27 = vector.broadcast %cst_11 : f32 to vector<8x128xf32>
    %28 = arith.addf %27, %26 : vector<8x128xf32>
    %29 = arith.divf %27, %28 : vector<8x128xf32>
    %30 = math.tanh %24 : vector<8x128xf32>
    %31 = vector.extract_strided_slice %29 {offsets = [0, 0], sizes = [8, 32], strides = [1, 1]} : vector<8x128xf32> to vector<8x32xf32>
    %32 = vector.extract_strided_slice %29 {offsets = [0, 32], sizes = [8, 32], strides = [1, 1]} : vector<8x128xf32> to vector<8x32xf32>
    %33 = vector.extract_strided_slice %29 {offsets = [0, 96], sizes = [8, 32], strides = [1, 1]} : vector<8x128xf32> to vector<8x32xf32>
    %34 = vector.extract_strided_slice %30 {offsets = [0, 64], sizes = [8, 32], strides = [1, 1]} : vector<8x128xf32> to vector<8x32xf32>
    %35 = arith.mulf %32, %20 : vector<8x32xf32>
    %36 = arith.mulf %31, %34 : vector<8x32xf32>
    %37 = arith.addf %35, %36 : vector<8x32xf32>
    %38 = math.tanh %37 : vector<8x32xf32>
    %39 = arith.mulf %33, %38 : vector<8x32xf32>
    %40 = vector.shape_cast %39 : vector<8x32xf32> to vector<8x1x32xf32>
    %c0_12 = arith.constant 0 : index
    %c0_13 = arith.constant 0 : index
    %c0_14 = arith.constant 0 : index
    %41 = vector.load %arg16[%c0_12, %c0_13, %c0_14] : memref<8x8x32xf32, #tpu.memory_space<vmem>>, vector<8x1x32xf32>
    tpu.vector_store %arg16[%c0_12, %c0_13, %c0_14], %40 {strides = array<i32>} : memref<8x8x32xf32, #tpu.memory_space<vmem>>, vector<8x1x32xf32>,
    %42 = vector.extract_strided_slice %17 {offsets = [0, 1, 0], sizes = [8, 1, 128], strides = [1, 1, 1]} : vector<8x8x128xf32> to vector<8x1x128xf32>
    %43 = vector.shape_cast %42 : vector<8x1x128xf32> to vector<8x128xf32>
    %cst_15 = arith.constant dense<0.000000e+00> : vector<8x128xf32>
    %44 = tpu.matmul %39, %18, %cst_15 {dimension_numbers = #tpu.dot_dimension_numbers<[1], [0], [0], [1], [0, 0, 1, 1], [], []>} : vector<8x32xf32>, vector<32x128xf32>, vector<8x128xf32> -> vector<8x128xf32>
    %45 = arith.addf %43, %44 : vector<8x128xf32>
    %46 = arith.negf %45 : vector<8x128xf32>
    %47 = math.exp %46 : vector<8x128xf32>
    %cst_16 = arith.constant 1.000000e+00 : f32
    %48 = vector.broadcast %cst_16 : f32 to vector<8x128xf32>
    %49 = arith.addf %48, %47 : vector<8x128xf32>
    %50 = arith.divf %48, %49 : vector<8x128xf32>
    %51 = math.tanh %45 : vector<8x128xf32>
    %52 = vector.extract_strided_slice %50 {offsets = [0, 0], sizes = [8, 32], strides = [1, 1]} : vector<8x128xf32> to vector<8x32xf32>
    %53 = vector.extract_strided_slice %50 {offsets = [0, 32], sizes = [8, 32], strides = [1, 1]} : vector<8x128xf32> to vector<8x32xf32>
    %54 = vector.extract_strided_slice %50 {offsets = [0, 96], sizes = [8, 32], strides = [1, 1]} : vector<8x128xf32> to vector<8x32xf32>
    %55 = vector.extract_strided_slice %51 {offsets = [0, 64], sizes = [8, 32], strides = [1, 1]} : vector<8x128xf32> to vector<8x32xf32>
    %56 = arith.mulf %53, %37 : vector<8x32xf32>
    %57 = arith.mulf %52, %55 : vector<8x32xf32>
    %58 = arith.addf %56, %57 : vector<8x32xf32>
    %59 = math.tanh %58 : vector<8x32xf32>
    %60 = arith.mulf %54, %59 : vector<8x32xf32>
    %61 = vector.shape_cast %60 : vector<8x32xf32> to vector<8x1x32xf32>
    %c0_17 = arith.constant 0 : index
    %c1_18 = arith.constant 1 : index
    %c0_19 = arith.constant 0 : index
    %62 = vector.load %arg16[%c0_17, %c1_18, %c0_19] : memref<8x8x32xf32, #tpu.memory_space<vmem>>, vector<8x1x32xf32>
    tpu.vector_store %arg16[%c0_17, %c1_18, %c0_19], %61 {strides = array<i32>} : memref<8x8x32xf32, #tpu.memory_space<vmem>>, vector<8x1x32xf32>,
    %63 = vector.extract_strided_slice %17 {offsets = [0, 2, 0], sizes = [8, 1, 128], strides = [1, 1, 1]} : vector<8x8x128xf32> to vector<8x1x128xf32>
    %64 = vector.shape_cast %63 : vector<8x1x128xf32> to vector<8x128xf32>
    %cst_20 = arith.constant dense<0.000000e+00> : vector<8x128xf32>
    %65 = tpu.matmul %60, %18, %cst_20 {dimension_numbers = #tpu.dot_dimension_numbers<[1], [0], [0], [1], [0, 0, 1, 1], [], []>} : vector<8x32xf32>, vector<32x128xf32>, vector<8x128xf32> -> vector<8x128xf32>
    %66 = arith.addf %64, %65 : vector<8x128xf32>
    %67 = arith.negf %66 : vector<8x128xf32>
    %68 = math.exp %67 : vector<8x128xf32>
    %cst_21 = arith.constant 1.000000e+00 : f32
    %69 = vector.broadcast %cst_21 : f32 to vector<8x128xf32>
    %70 = arith.addf %69, %68 : vector<8x128xf32>
    %71 = arith.divf %69, %70 : vector<8x128xf32>
    %72 = math.tanh %66 : vector<8x128xf32>
    %73 = vector.extract_strided_slice %71 {offsets = [0, 0], sizes = [8, 32], strides = [1, 1]} : vector<8x128xf32> to vector<8x32xf32>
    %74 = vector.extract_strided_slice %71 {offsets = [0, 32], sizes = [8, 32], strides = [1, 1]} : vector<8x128xf32> to vector<8x32xf32>
    %75 = vector.extract_strided_slice %71 {offsets = [0, 96], sizes = [8, 32], strides = [1, 1]} : vector<8x128xf32> to vector<8x32xf32>
    %76 = vector.extract_strided_slice %72 {offsets = [0, 64], sizes = [8, 32], strides = [1, 1]} : vector<8x128xf32> to vector<8x32xf32>
    %77 = arith.mulf %74, %58 : vector<8x32xf32>
    %78 = arith.mulf %73, %76 : vector<8x32xf32>
    %79 = arith.addf %77, %78 : vector<8x32xf32>
    %80 = math.tanh %79 : vector<8x32xf32>
    %81 = arith.mulf %75, %80 : vector<8x32xf32>
    %82 = vector.shape_cast %81 : vector<8x32xf32> to vector<8x1x32xf32>
    %c0_22 = arith.constant 0 : index
    %c2 = arith.constant 2 : index
    %c0_23 = arith.constant 0 : index
    %83 = vector.load %arg16[%c0_22, %c2, %c0_23] : memref<8x8x32xf32, #tpu.memory_space<vmem>>, vector<8x1x32xf32>
    tpu.vector_store %arg16[%c0_22, %c2, %c0_23], %82 {strides = array<i32>} : memref<8x8x32xf32, #tpu.memory_space<vmem>>, vector<8x1x32xf32>,
    %84 = vector.extract_strided_slice %17 {offsets = [0, 3, 0], sizes = [8, 1, 128], strides = [1, 1, 1]} : vector<8x8x128xf32> to vector<8x1x128xf32>
    %85 = vector.shape_cast %84 : vector<8x1x128xf32> to vector<8x128xf32>
    %cst_24 = arith.constant dense<0.000000e+00> : vector<8x128xf32>
    %86 = tpu.matmul %81, %18, %cst_24 {dimension_numbers = #tpu.dot_dimension_numbers<[1], [0], [0], [1], [0, 0, 1, 1], [], []>} : vector<8x32xf32>, vector<32x128xf32>, vector<8x128xf32> -> vector<8x128xf32>
    %87 = arith.addf %85, %86 : vector<8x128xf32>
    %88 = arith.negf %87 : vector<8x128xf32>
    %89 = math.exp %88 : vector<8x128xf32>
    %cst_25 = arith.constant 1.000000e+00 : f32
    %90 = vector.broadcast %cst_25 : f32 to vector<8x128xf32>
    %91 = arith.addf %90, %89 : vector<8x128xf32>
    %92 = arith.divf %90, %91 : vector<8x128xf32>
    %93 = math.tanh %87 : vector<8x128xf32>
    %94 = vector.extract_strided_slice %92 {offsets = [0, 0], sizes = [8, 32], strides = [1, 1]} : vector<8x128xf32> to vector<8x32xf32>
    %95 = vector.extract_strided_slice %92 {offsets = [0, 32], sizes = [8, 32], strides = [1, 1]} : vector<8x128xf32> to vector<8x32xf32>
    %96 = vector.extract_strided_slice %92 {offsets = [0, 96], sizes = [8, 32], strides = [1, 1]} : vector<8x128xf32> to vector<8x32xf32>
    %97 = vector.extract_strided_slice %93 {offsets = [0, 64], sizes = [8, 32], strides = [1, 1]} : vector<8x128xf32> to vector<8x32xf32>
    %98 = arith.mulf %95, %79 : vector<8x32xf32>
    %99 = arith.mulf %94, %97 : vector<8x32xf32>
    %100 = arith.addf %98, %99 : vector<8x32xf32>
    %101 = math.tanh %100 : vector<8x32xf32>
    %102 = arith.mulf %96, %101 : vector<8x32xf32>
    %103 = vector.shape_cast %102 : vector<8x32xf32> to vector<8x1x32xf32>
    %c0_26 = arith.constant 0 : index
    %c3 = arith.constant 3 : index
    %c0_27 = arith.constant 0 : index
    %104 = vector.load %arg16[%c0_26, %c3, %c0_27] : memref<8x8x32xf32, #tpu.memory_space<vmem>>, vector<8x1x32xf32>
    tpu.vector_store %arg16[%c0_26, %c3, %c0_27], %103 {strides = array<i32>} : memref<8x8x32xf32, #tpu.memory_space<vmem>>, vector<8x1x32xf32>,
    %105 = vector.extract_strided_slice %17 {offsets = [0, 4, 0], sizes = [8, 1, 128], strides = [1, 1, 1]} : vector<8x8x128xf32> to vector<8x1x128xf32>
    %106 = vector.shape_cast %105 : vector<8x1x128xf32> to vector<8x128xf32>
    %cst_28 = arith.constant dense<0.000000e+00> : vector<8x128xf32>
    %107 = tpu.matmul %102, %18, %cst_28 {dimension_numbers = #tpu.dot_dimension_numbers<[1], [0], [0], [1], [0, 0, 1, 1], [], []>} : vector<8x32xf32>, vector<32x128xf32>, vector<8x128xf32> -> vector<8x128xf32>
    %108 = arith.addf %106, %107 : vector<8x128xf32>
    %109 = arith.negf %108 : vector<8x128xf32>
    %110 = math.exp %109 : vector<8x128xf32>
    %cst_29 = arith.constant 1.000000e+00 : f32
    %111 = vector.broadcast %cst_29 : f32 to vector<8x128xf32>
    %112 = arith.addf %111, %110 : vector<8x128xf32>
    %113 = arith.divf %111, %112 : vector<8x128xf32>
    %114 = math.tanh %108 : vector<8x128xf32>
    %115 = vector.extract_strided_slice %113 {offsets = [0, 0], sizes = [8, 32], strides = [1, 1]} : vector<8x128xf32> to vector<8x32xf32>
    %116 = vector.extract_strided_slice %113 {offsets = [0, 32], sizes = [8, 32], strides = [1, 1]} : vector<8x128xf32> to vector<8x32xf32>
    %117 = vector.extract_strided_slice %113 {offsets = [0, 96], sizes = [8, 32], strides = [1, 1]} : vector<8x128xf32> to vector<8x32xf32>
    %118 = vector.extract_strided_slice %114 {offsets = [0, 64], sizes = [8, 32], strides = [1, 1]} : vector<8x128xf32> to vector<8x32xf32>
    %119 = arith.mulf %116, %100 : vector<8x32xf32>
    %120 = arith.mulf %115, %118 : vector<8x32xf32>
    %121 = arith.addf %119, %120 : vector<8x32xf32>
    %122 = math.tanh %121 : vector<8x32xf32>
    %123 = arith.mulf %117, %122 : vector<8x32xf32>
    %124 = vector.shape_cast %123 : vector<8x32xf32> to vector<8x1x32xf32>
    %c0_30 = arith.constant 0 : index
    %c4 = arith.constant 4 : index
    %c0_31 = arith.constant 0 : index
    %125 = vector.load %arg16[%c0_30, %c4, %c0_31] : memref<8x8x32xf32, #tpu.memory_space<vmem>>, vector<8x1x32xf32>
    tpu.vector_store %arg16[%c0_30, %c4, %c0_31], %124 {strides = array<i32>} : memref<8x8x32xf32, #tpu.memory_space<vmem>>, vector<8x1x32xf32>,
    %126 = vector.extract_strided_slice %17 {offsets = [0, 5, 0], sizes = [8, 1, 128], strides = [1, 1, 1]} : vector<8x8x128xf32> to vector<8x1x128xf32>
    %127 = vector.shape_cast %126 : vector<8x1x128xf32> to vector<8x128xf32>
    %cst_32 = arith.constant dense<0.000000e+00> : vector<8x128xf32>
    %128 = tpu.matmul %123, %18, %cst_32 {dimension_numbers = #tpu.dot_dimension_numbers<[1], [0], [0], [1], [0, 0, 1, 1], [], []>} : vector<8x32xf32>, vector<32x128xf32>, vector<8x128xf32> -> vector<8x128xf32>
    %129 = arith.addf %127, %128 : vector<8x128xf32>
    %130 = arith.negf %129 : vector<8x128xf32>
    %131 = math.exp %130 : vector<8x128xf32>
    %cst_33 = arith.constant 1.000000e+00 : f32
    %132 = vector.broadcast %cst_33 : f32 to vector<8x128xf32>
    %133 = arith.addf %132, %131 : vector<8x128xf32>
    %134 = arith.divf %132, %133 : vector<8x128xf32>
    %135 = math.tanh %129 : vector<8x128xf32>
    %136 = vector.extract_strided_slice %134 {offsets = [0, 0], sizes = [8, 32], strides = [1, 1]} : vector<8x128xf32> to vector<8x32xf32>
    %137 = vector.extract_strided_slice %134 {offsets = [0, 32], sizes = [8, 32], strides = [1, 1]} : vector<8x128xf32> to vector<8x32xf32>
    %138 = vector.extract_strided_slice %134 {offsets = [0, 96], sizes = [8, 32], strides = [1, 1]} : vector<8x128xf32> to vector<8x32xf32>
    %139 = vector.extract_strided_slice %135 {offsets = [0, 64], sizes = [8, 32], strides = [1, 1]} : vector<8x128xf32> to vector<8x32xf32>
    %140 = arith.mulf %137, %121 : vector<8x32xf32>
    %141 = arith.mulf %136, %139 : vector<8x32xf32>
    %142 = arith.addf %140, %141 : vector<8x32xf32>
    %143 = math.tanh %142 : vector<8x32xf32>
    %144 = arith.mulf %138, %143 : vector<8x32xf32>
    %145 = vector.shape_cast %144 : vector<8x32xf32> to vector<8x1x32xf32>
    %c0_34 = arith.constant 0 : index
    %c5 = arith.constant 5 : index
    %c0_35 = arith.constant 0 : index
    %146 = vector.load %arg16[%c0_34, %c5, %c0_35] : memref<8x8x32xf32, #tpu.memory_space<vmem>>, vector<8x1x32xf32>
    tpu.vector_store %arg16[%c0_34, %c5, %c0_35], %145 {strides = array<i32>} : memref<8x8x32xf32, #tpu.memory_space<vmem>>, vector<8x1x32xf32>,
    %147 = vector.extract_strided_slice %17 {offsets = [0, 6, 0], sizes = [8, 1, 128], strides = [1, 1, 1]} : vector<8x8x128xf32> to vector<8x1x128xf32>
    %148 = vector.shape_cast %147 : vector<8x1x128xf32> to vector<8x128xf32>
    %cst_36 = arith.constant dense<0.000000e+00> : vector<8x128xf32>
    %149 = tpu.matmul %144, %18, %cst_36 {dimension_numbers = #tpu.dot_dimension_numbers<[1], [0], [0], [1], [0, 0, 1, 1], [], []>} : vector<8x32xf32>, vector<32x128xf32>, vector<8x128xf32> -> vector<8x128xf32>
    %150 = arith.addf %148, %149 : vector<8x128xf32>
    %151 = arith.negf %150 : vector<8x128xf32>
    %152 = math.exp %151 : vector<8x128xf32>
    %cst_37 = arith.constant 1.000000e+00 : f32
    %153 = vector.broadcast %cst_37 : f32 to vector<8x128xf32>
    %154 = arith.addf %153, %152 : vector<8x128xf32>
    %155 = arith.divf %153, %154 : vector<8x128xf32>
    %156 = math.tanh %150 : vector<8x128xf32>
    %157 = vector.extract_strided_slice %155 {offsets = [0, 0], sizes = [8, 32], strides = [1, 1]} : vector<8x128xf32> to vector<8x32xf32>
    %158 = vector.extract_strided_slice %155 {offsets = [0, 32], sizes = [8, 32], strides = [1, 1]} : vector<8x128xf32> to vector<8x32xf32>
    %159 = vector.extract_strided_slice %155 {offsets = [0, 96], sizes = [8, 32], strides = [1, 1]} : vector<8x128xf32> to vector<8x32xf32>
    %160 = vector.extract_strided_slice %156 {offsets = [0, 64], sizes = [8, 32], strides = [1, 1]} : vector<8x128xf32> to vector<8x32xf32>
    %161 = arith.mulf %158, %142 : vector<8x32xf32>
    %162 = arith.mulf %157, %160 : vector<8x32xf32>
    %163 = arith.addf %161, %162 : vector<8x32xf32>
    %164 = math.tanh %163 : vector<8x32xf32>
    %165 = arith.mulf %159, %164 : vector<8x32xf32>
    %166 = vector.shape_cast %165 : vector<8x32xf32> to vector<8x1x32xf32>
    %c0_38 = arith.constant 0 : index
    %c6 = arith.constant 6 : index
    %c0_39 = arith.constant 0 : index
    %167 = vector.load %arg16[%c0_38, %c6, %c0_39] : memref<8x8x32xf32, #tpu.memory_space<vmem>>, vector<8x1x32xf32>
    tpu.vector_store %arg16[%c0_38, %c6, %c0_39], %166 {strides = array<i32>} : memref<8x8x32xf32, #tpu.memory_space<vmem>>, vector<8x1x32xf32>,
    %168 = vector.extract_strided_slice %17 {offsets = [0, 7, 0], sizes = [8, 1, 128], strides = [1, 1, 1]} : vector<8x8x128xf32> to vector<8x1x128xf32>
    %169 = vector.shape_cast %168 : vector<8x1x128xf32> to vector<8x128xf32>
    %cst_40 = arith.constant dense<0.000000e+00> : vector<8x128xf32>
    %170 = tpu.matmul %165, %18, %cst_40 {dimension_numbers = #tpu.dot_dimension_numbers<[1], [0], [0], [1], [0, 0, 1, 1], [], []>} : vector<8x32xf32>, vector<32x128xf32>, vector<8x128xf32> -> vector<8x128xf32>
    %171 = arith.addf %169, %170 : vector<8x128xf32>
    %172 = arith.negf %171 : vector<8x128xf32>
    %173 = math.exp %172 : vector<8x128xf32>
    %cst_41 = arith.constant 1.000000e+00 : f32
    %174 = vector.broadcast %cst_41 : f32 to vector<8x128xf32>
    %175 = arith.addf %174, %173 : vector<8x128xf32>
    %176 = arith.divf %174, %175 : vector<8x128xf32>
    %177 = math.tanh %171 : vector<8x128xf32>
    %178 = vector.extract_strided_slice %176 {offsets = [0, 0], sizes = [8, 32], strides = [1, 1]} : vector<8x128xf32> to vector<8x32xf32>
    %179 = vector.extract_strided_slice %176 {offsets = [0, 32], sizes = [8, 32], strides = [1, 1]} : vector<8x128xf32> to vector<8x32xf32>
    %180 = vector.extract_strided_slice %176 {offsets = [0, 96], sizes = [8, 32], strides = [1, 1]} : vector<8x128xf32> to vector<8x32xf32>
    %181 = vector.extract_strided_slice %177 {offsets = [0, 64], sizes = [8, 32], strides = [1, 1]} : vector<8x128xf32> to vector<8x32xf32>
    %182 = arith.mulf %179, %163 : vector<8x32xf32>
    %183 = arith.mulf %178, %181 : vector<8x32xf32>
    %184 = arith.addf %182, %183 : vector<8x32xf32>
    %185 = math.tanh %184 : vector<8x32xf32>
    %186 = arith.mulf %180, %185 : vector<8x32xf32>
    %187 = vector.shape_cast %186 : vector<8x32xf32> to vector<8x1x32xf32>
    %c0_42 = arith.constant 0 : index
    %c7 = arith.constant 7 : index
    %c0_43 = arith.constant 0 : index
    %188 = vector.load %arg16[%c0_42, %c7, %c0_43] : memref<8x8x32xf32, #tpu.memory_space<vmem>>, vector<8x1x32xf32>
    tpu.vector_store %arg16[%c0_42, %c7, %c0_43], %187 {strides = array<i32>} : memref<8x8x32xf32, #tpu.memory_space<vmem>>, vector<8x1x32xf32>,
    %c0_44 = arith.constant 0 : index
    %c0_45 = arith.constant 0 : index
    %c0_46 = arith.constant 0 : index
    %189 = vector.load %arg16[%c0_44, %c0_45, %c0_46] : memref<8x8x32xf32, #tpu.memory_space<vmem>>, vector<8x8x32xf32>
    %190 = vector.shape_cast %189 : vector<8x8x32xf32> to vector<64x32xf32>
    %c0_47 = arith.constant 0 : index
    %c0_48 = arith.constant 0 : index
    %191 = vector.load %arg5[%c0_47, %c0_48] : memref<32x32xf32, #tpu.memory_space<vmem>>, vector<32x32xf32>
    %cst_49 = arith.constant dense<0.000000e+00> : vector<64x32xf32>
    %192 = tpu.matmul %190, %191, %cst_49 {dimension_numbers = #tpu.dot_dimension_numbers<[1], [0], [0], [1], [0, 0, 1, 1], [], []>} : vector<64x32xf32>, vector<32x32xf32>, vector<64x32xf32> -> vector<64x32xf32>
    %c0_50 = arith.constant 0 : index
    %c0_51 = arith.constant 0 : index
    %193 = vector.load %arg8[%c0_50, %c0_51] : memref<1x32xf32, #tpu.memory_space<vmem>>, vector<1x32xf32>
    %194 = vector.broadcast %193 : vector<1x32xf32> to vector<64x32xf32>
    %195 = arith.addf %192, %194 : vector<64x32xf32>
    %196 = vector.shape_cast %195 : vector<64x32xf32> to vector<8x8x32xf32>
    %c0_52 = arith.constant 0 : index
    %c0_53 = arith.constant 0 : index
    %197 = vector.load %arg6[%c0_52, %c0_53] : memref<32x32xf32, #tpu.memory_space<vmem>>, vector<32x32xf32>
    %cst_54 = arith.constant dense<0.000000e+00> : vector<64x32xf32>
    %198 = tpu.matmul %190, %197, %cst_54 {dimension_numbers = #tpu.dot_dimension_numbers<[1], [0], [0], [1], [0, 0, 1, 1], [], []>} : vector<64x32xf32>, vector<32x32xf32>, vector<64x32xf32> -> vector<64x32xf32>
    %c0_55 = arith.constant 0 : index
    %c0_56 = arith.constant 0 : index
    %199 = vector.load %arg9[%c0_55, %c0_56] : memref<1x32xf32, #tpu.memory_space<vmem>>, vector<1x32xf32>
    %200 = vector.broadcast %199 : vector<1x32xf32> to vector<64x32xf32>
    %201 = arith.addf %198, %200 : vector<64x32xf32>
    %202 = vector.shape_cast %201 : vector<64x32xf32> to vector<8x8x32xf32>
    %c0_57 = arith.constant 0 : index
    %c0_58 = arith.constant 0 : index
    %203 = vector.load %arg7[%c0_57, %c0_58] : memref<32x32xf32, #tpu.memory_space<vmem>>, vector<32x32xf32>
    %cst_59 = arith.constant dense<0.000000e+00> : vector<64x32xf32>
    %204 = tpu.matmul %190, %203, %cst_59 {dimension_numbers = #tpu.dot_dimension_numbers<[1], [0], [0], [1], [0, 0, 1, 1], [], []>} : vector<64x32xf32>, vector<32x32xf32>, vector<64x32xf32> -> vector<64x32xf32>
    %c0_60 = arith.constant 0 : index
    %c0_61 = arith.constant 0 : index
    %205 = vector.load %arg10[%c0_60, %c0_61] : memref<1x32xf32, #tpu.memory_space<vmem>>, vector<1x32xf32>
    %206 = vector.broadcast %205 : vector<1x32xf32> to vector<64x32xf32>
    %207 = arith.addf %204, %206 : vector<64x32xf32>
    %208 = vector.shape_cast %207 : vector<64x32xf32> to vector<8x8x32xf32>
    "tpu.trace_start"() <{level = 10 : i32, message = "bqd,bkd->bqk"}> : () -> ()
    %cst_62 = arith.constant dense<0.000000e+00> : vector<8x8x8xf32>
    %209 = tpu.matmul %196, %202, %cst_62 {dimension_numbers = #tpu.dot_dimension_numbers<[2], [2], [1], [1], [0, 0, 0, 1, 1, 1], [0], [0]>} : vector<8x8x32xf32>, vector<8x8x32xf32>, vector<8x8x8xf32> -> vector<8x8x8xf32>
    "tpu.trace_stop"() : () -> ()
    %cst_63 = arith.constant 0.176776692 : f32
    %210 = vector.broadcast %cst_63 : f32 to vector<8x8x8xf32>
    %211 = arith.mulf %209, %210 : vector<8x8x8xf32>
    %cst_64 = arith.constant dense<0xFF800000> : vector<8x8xf32>
    %212 = vector.multi_reduction <maximumf>, %211, %cst_64 [2] : vector<8x8x8xf32> to vector<8x8xf32>
    %213 = vector.shape_cast %212 : vector<8x8xf32> to vector<8x8x1xf32>
    %214 = vector.broadcast %213 : vector<8x8x1xf32> to vector<8x8x8xf32>
    %215 = arith.subf %211, %214 : vector<8x8x8xf32>
    %216 = math.exp %215 : vector<8x8x8xf32>
    %cst_65 = arith.constant dense<0.000000e+00> : vector<8x8xf32>
    %217 = vector.multi_reduction <add>, %216, %cst_65 [2] : vector<8x8x8xf32> to vector<8x8xf32>
    %218 = vector.shape_cast %217 : vector<8x8xf32> to vector<8x8x1xf32>
    %219 = tpu.reciprocal %218 {approx = true} : vector<8x8x1xf32> -> vector<8x8x1xf32>
    %220 = vector.broadcast %219 : vector<8x8x1xf32> to vector<8x8x8xf32>
    %221 = arith.mulf %216, %220 : vector<8x8x8xf32>
    "tpu.trace_start"() <{level = 10 : i32, message = "bqk,bkd->bqd"}> : () -> ()
    %cst_66 = arith.constant dense<0.000000e+00> : vector<8x8x32xf32>
    %222 = tpu.matmul %221, %208, %cst_66 {dimension_numbers = #tpu.dot_dimension_numbers<[2], [1], [1], [2], [0, 0, 0, 1, 1, 2], [0], [0]>} : vector<8x8x8xf32>, vector<8x8x32xf32>, vector<8x8x32xf32> -> vector<8x8x32xf32>
    "tpu.trace_stop"() : () -> ()
    %223 = vector.shape_cast %222 : vector<8x8x32xf32> to vector<64x32xf32>
    %c0_67 = arith.constant 0 : index
    %c0_68 = arith.constant 0 : index
    %224 = vector.load %arg11[%c0_67, %c0_68] : memref<32x32xf32, #tpu.memory_space<vmem>>, vector<32x32xf32>
    %cst_69 = arith.constant dense<0.000000e+00> : vector<64x32xf32>
    %225 = tpu.matmul %223, %224, %cst_69 {dimension_numbers = #tpu.dot_dimension_numbers<[1], [0], [0], [1], [0, 0, 1, 1], [], []>} : vector<64x32xf32>, vector<32x32xf32>, vector<64x32xf32> -> vector<64x32xf32>
    %c0_70 = arith.constant 0 : index
    %c0_71 = arith.constant 0 : index
    %226 = vector.load %arg12[%c0_70, %c0_71] : memref<1x32xf32, #tpu.memory_space<vmem>>, vector<1x32xf32>
    %227 = vector.broadcast %226 : vector<1x32xf32> to vector<64x32xf32>
    %228 = arith.addf %225, %227 : vector<64x32xf32>
    %229 = vector.shape_cast %228 : vector<64x32xf32> to vector<8x8x32xf32>
    %c0_72 = arith.constant 0 : index
    %c0_73 = arith.constant 0 : index
    %230 = vector.load %arg13[%c0_72, %c0_73] : memref<1x32xf32, #tpu.memory_space<vmem>>, vector<1x32xf32>
    %231 = vector.shape_cast %230 : vector<1x32xf32> to vector<1x1x32xf32>
    %232 = vector.broadcast %231 : vector<1x1x32xf32> to vector<8x8x32xf32>
    %233 = arith.mulf %229, %232 : vector<8x8x32xf32>
    %cst_74 = arith.constant dense<0.000000e+00> : vector<8x8xf32>
    %234 = vector.multi_reduction <add>, %233, %cst_74 [2] : vector<8x8x32xf32> to vector<8x8xf32>
    %c0_75 = arith.constant 0 : index
    %c0_76 = arith.constant 0 : index
    %235 = vector.load %arg14[%c0_75, %c0_76] : memref<1x1xf32, #tpu.memory_space<vmem>>, vector<1x1xf32>
    %236 = vector.broadcast %235 : vector<1x1xf32> to vector<8x8xf32>
    %237 = arith.addf %234, %236 : vector<8x8xf32>
    %c0_77 = arith.constant 0 : index
    %c0_78 = arith.constant 0 : index
    %238 = vector.load %arg15[%c0_77, %c0_78] : memref<8x8xf32, #tpu.memory_space<vmem>>, vector<8x8xf32>
    tpu.vector_store %arg15[%c0_77, %c0_78], %237 {strides = array<i32>} : memref<8x8xf32, #tpu.memory_space<vmem>>, vector<8x8xf32>,
    return
  }
  func.func @transform_0(%arg0: i32) -> (i32, i32, i32) {
    %c0_i32 = arith.constant 0 : i32
    %c0_i32_0 = arith.constant 0 : i32
    %c0_i32_1 = arith.constant 0 : i32
    return %arg0, %c0_i32, %c0_i32_0 : i32, i32, i32
  }
  func.func @transform_1(%arg0: i32) -> (i32, i32) {
    %c0_i32 = arith.constant 0 : i32
    %c0_i32_0 = arith.constant 0 : i32
    %c0_i32_1 = arith.constant 0 : i32
    return %c0_i32, %c0_i32_0 : i32, i32
  }
  func.func @transform_2(%arg0: i32) -> (i32, i32) {
    %c0_i32 = arith.constant 0 : i32
    %c0_i32_0 = arith.constant 0 : i32
    %c0_i32_1 = arith.constant 0 : i32
    return %c0_i32, %c0_i32_0 : i32, i32
  }
  func.func @transform_3(%arg0: i32) -> (i32, i32) {
    %c0_i32 = arith.constant 0 : i32
    %c0_i32_0 = arith.constant 0 : i32
    %c0_i32_1 = arith.constant 0 : i32
    return %c0_i32, %c0_i32_0 : i32, i32
  }
  func.func @transform_4(%arg0: i32) -> (i32, i32) {
    %c0_i32 = arith.constant 0 : i32
    %c0_i32_0 = arith.constant 0 : i32
    %c0_i32_1 = arith.constant 0 : i32
    return %c0_i32, %c0_i32_0 : i32, i32
  }
  func.func @transform_5(%arg0: i32) -> (i32, i32) {
    %c0_i32 = arith.constant 0 : i32
    %c0_i32_0 = arith.constant 0 : i32
    %c0_i32_1 = arith.constant 0 : i32
    return %c0_i32, %c0_i32_0 : i32, i32
  }
  func.func @transform_6(%arg0: i32) -> (i32, i32) {
    %c0_i32 = arith.constant 0 : i32
    %c0_i32_0 = arith.constant 0 : i32
    %c0_i32_1 = arith.constant 0 : i32
    return %c0_i32, %c0_i32_0 : i32, i32
  }
  func.func @transform_7(%arg0: i32) -> (i32, i32) {
    %c0_i32 = arith.constant 0 : i32
    %c0_i32_0 = arith.constant 0 : i32
    %c0_i32_1 = arith.constant 0 : i32
    return %c0_i32, %c0_i32_0 : i32, i32
  }
  func.func @transform_8(%arg0: i32) -> (i32, i32) {
    %c0_i32 = arith.constant 0 : i32
    %c0_i32_0 = arith.constant 0 : i32
    %c0_i32_1 = arith.constant 0 : i32
    return %c0_i32, %c0_i32_0 : i32, i32
  }
  func.func @transform_9(%arg0: i32) -> (i32, i32) {
    %c0_i32 = arith.constant 0 : i32
    %c0_i32_0 = arith.constant 0 : i32
    %c0_i32_1 = arith.constant 0 : i32
    return %c0_i32, %c0_i32_0 : i32, i32
  }
  func.func @transform_10(%arg0: i32) -> (i32, i32) {
    %c0_i32 = arith.constant 0 : i32
    %c0_i32_0 = arith.constant 0 : i32
    %c0_i32_1 = arith.constant 0 : i32
    return %c0_i32, %c0_i32_0 : i32, i32
  }
  func.func @transform_11(%arg0: i32) -> (i32, i32) {
    %c0_i32 = arith.constant 0 : i32
    %c0_i32_0 = arith.constant 0 : i32
    %c0_i32_1 = arith.constant 0 : i32
    return %c0_i32, %c0_i32_0 : i32, i32
  }
  func.func @transform_12(%arg0: i32) -> (i32, i32) {
    %c0_i32 = arith.constant 0 : i32
    %c0_i32_0 = arith.constant 0 : i32
    %c0_i32_1 = arith.constant 0 : i32
    return %c0_i32, %c0_i32_0 : i32, i32
  }
  func.func @transform_13(%arg0: i32) -> (i32, i32) {
    %c0_i32 = arith.constant 0 : i32
    %c0_i32_0 = arith.constant 0 : i32
    %c0_i32_1 = arith.constant 0 : i32
    return %c0_i32, %c0_i32_0 : i32, i32
  }
  func.func @transform_14(%arg0: i32) -> (i32, i32) {
    %c0_i32 = arith.constant 0 : i32
    %c0_i32_0 = arith.constant 0 : i32
    return %arg0, %c0_i32 : i32, i32
  }
}

</mosaic_0001>

<bundles_post_ra>
// kernel: tpu_custom_call.1
= control target key start
LH: loop header
LB: loop body
LE: loop exit
PB: predicated region body
PF: predicated region fallthrough
CT: control target
= control target key end

     0   :  { %s7990_s0 = inlined_call_operand.vmem [shape: f32[8,8,2], index: 0, kind: input, shape index: {}]   ;;  %s7991_s1 = inlined_call_operand.vmem [shape: f32[2,128], index: 1, kind: input, shape index: {}]   ;;  %s7992_s2 = inlined_call_operand.vmem [shape: f32[32,128], index: 2, kind: input, shape index: {}]   ;;  %s7993_s3 = inlined_call_operand.hbm [shape: f32[1,128], index: 3, kind: input, shape index: {}]   ;;  %s7994_s4 = inlined_call_operand.vmem [shape: f32[32,32], index: 4, kind: input, shape index: {}]   ;;  %s7995_s5 = inlined_call_operand.vmem [shape: f32[32,32], index: 5, kind: input, shape index: {}]   ;;  %s7996_s6 = inlined_call_operand.hbm [shape: f32[32,32], index: 6, kind: input, shape index: {}]   ;;  %s7997_s7 = inlined_call_operand.vmem [shape: f32[1,32], index: 7, kind: input, shape index: {}]   ;;  %s7998_s8 = inlined_call_operand.vmem [shape: f32[1,32], index: 8, kind: input, shape index: {}]   ;;  %s7999_s9 = inlined_call_operand.vmem [shape: f32[1,32], index: 9, kind: input, shape index: {}]   ;;  %s8000_s10 = inlined_call_operand.hbm [shape: f32[32,32], index: 10, kind: input, shape index: {}]   ;;  %s8001_s11 = inlined_call_operand.vmem [shape: f32[1,32], index: 11, kind: input, shape index: {}]   ;;  %s8002_s12 = inlined_call_operand.vmem [shape: f32[1,32], index: 12, kind: input, shape index: {}]   ;;  %s8003_s13 = inlined_call_operand.<no memory space> [shape: f32[1,1], index: 13, kind: input, shape index: {}]   ;;  %s8004_s14 = inlined_call_operand.hbm [shape: f32[8,8], index: 14, kind: output, shape index: {}]  }
   0x1   :  { %v19_v0 = vstv %s8003_s13 }
   0x2   :  { %20 = vst [vmem:[#allocation3] sm:$0x1] %v19_v0 }
   0x3   :  { %21 = vsyncpa [#allocation5], 0 }
   0x4   :  { %22 = vsyncpa [#allocation8], 0 }
   0x5   :  { %23 = vsyncpa [#allocation6], 0  ;;  %s6318_s15 = smov [#allocation7]   ;;  %s6224_s19 = scalar_lea.hbm %s7996_s6, 512 }
   0x6   :  { %s49_s16 = sshll.u32 %s6318_s15, 4  ;;  %p6225_p0 = scmp.ne.s32.totalorder %s7996_s6, %s6224_s19  ;;  %s50_s16 = int_to_ptr.vmem [resolvable:$true] %s49_s16 }
   0x7   :  { %p6228_p1 = scmp.lt.u32.totalorder %s6224_s19, %s7996_s6 }
   0x9   :  { %p6230_p2 = pnand %p6228_p1, %p6225_p0 }
   0xb   :  { %6233 = shalt.err (!%p6230_p2)
}
   0xc   :  { %s6234_s13 = scalar_lea.vmem %s50_s16, 512  ;;  %p6239_p4 = scmp.lt.s32.totalorder %s50_s16, %s50_s16 }
   0xd   :  { %p6235_p3 = scmp.ne.s32.totalorder %s50_s16, %s6234_s13  ;;  %p6240_p5 = scmp.lt.s32.totalorder %s6234_s13, %s6234_s13 }
   0xf   :  { %p6241_p6 = por %p6240_p5, %p6239_p4 }
  0x11   :  { %p6242_p7 = pnand %p6241_p6, %p6235_p3 }
  0x13   :  { %6245 = shalt.err (!%p6242_p7)
}
  0x14   :  { %s6319_s24 = smov 128   ;;  %s6320_s25 = smov 8  }
  0x15   :  { %55 = dma.hbm_to_vmem [thread:$0]  %s7996_s6, 512, %s50_s16, [#allocation8], %s6319_s24, %s6319_s24, %s6320_s25  }
  0x16   :  { %s6321_s28 = smov [#allocation4]   ;;  %s6322_s30 = smov [#allocation9]  }
  0x17   :  { %s36_s29 = sshll.u32 %s6321_s28, 4  ;;  %s67_s15 = sshll.u32 %s6322_s30, 4  ;;  %s37_s29 = int_to_ptr.vmem [resolvable:$true] %s36_s29  ;;  %s68_s15 = int_to_ptr.vmem [resolvable:$true] %s67_s15 }
  0x18   :  { %s6246_s19 = scalar_lea.hbm %s7993_s3, 16 }
  0x19   :  { %p6247_p8 = scmp.ne.s32.totalorder %s7993_s3, %s6246_s19  ;;  %p6250_p9 = scmp.lt.u32.totalorder %s6246_s19, %s7993_s3 }
  0x1b   :  { %p6252_p10 = pnand %p6250_p9, %p6247_p8 }
  0x1d   :  { %6255 = shalt.err (!%p6252_p10)
}
  0x1e   :  { %s6256_s6 = scalar_lea.vmem %s37_s29, 16  ;;  %s6260_s16 = scalar_lea.vmem %s37_s29, 32 }
  0x1f   :  { %p6257_p11 = scmp.ne.s32.totalorder %s37_s29, %s6256_s6  ;;  %p6261_p12 = scmp.lt.s32.totalorder %s37_s29, %s37_s29 }
  0x20   :  { %p6262_p13 = scmp.lt.s32.totalorder %s6260_s16, %s6256_s6 }
  0x22   :  { %p6263_p0 = por %p6262_p13, %p6261_p12 }
  0x24   :  { %p6264_p1 = pnand %p6263_p0, %p6257_p11 }
  0x26   :  { %6267 = shalt.err (!%p6264_p1)
}
  0x27   :  { %39 = dma.hbm_to_vmem [thread:$0]  %s7993_s3, 16, %s37_s29, [#allocation5]  }
  0x28   :  { %s6268_s30 = scalar_lea.hbm %s8000_s10, 512 }
  0x29   :  { %p6269_p2 = scmp.ne.s32.totalorder %s8000_s10, %s6268_s30  ;;  %p6272_p3 = scmp.lt.u32.totalorder %s6268_s30, %s8000_s10 }
  0x2b   :  { %p6274_p4 = pnand %p6272_p3, %p6269_p2 }
  0x2d   :  { %6277 = shalt.err (!%p6274_p4)
}
  0x2e   :  { %s6278_s21 = scalar_lea.vmem %s68_s15, 512  ;;  %p6283_p6 = scmp.lt.s32.totalorder %s68_s15, %s68_s15 }
  0x2f   :  { %p6279_p5 = scmp.ne.s32.totalorder %s68_s15, %s6278_s21  ;;  %p6284_p7 = scmp.lt.s32.totalorder %s6278_s21, %s6278_s21 }
  0x31   :  { %p6285_p8 = por %p6284_p7, %p6283_p6 }
  0x33   :  { %p6286_p9 = pnand %p6285_p8, %p6279_p5 }
  0x35   :  { %6289 = shalt.err (!%p6286_p9)
}
  0x36   :  { %73 = dma.hbm_to_vmem [thread:$0]  %s8000_s10, 512, %s68_s15, [#allocation8], %s6319_s24, %s6319_s24, %s6320_s25  }
  0x37   :  { %6312 = dma.done.wait [#allocation5], 16  }
  0x38   :  { %6313 = vsyncadd [#allocation5], 4294967280 }
  0x39   :  { %6314 = dma.done.wait [#allocation8], 1024  }
  0x3a   :  { %6315 = vsyncadd [#allocation8], 4294966272  ;;  %v8005_v1 = vmov 0.0|0.0   ;;  %vm6324_vm0 = vmmov 0   ;;  %v8007_v2 = vmov 0.0   ;;  %v6326_v3 = vmov 0  }
  0x3b   :  { %5580 = vmatprep.subr.bf16.mxu1 %v8005_v1  ;;  %5340 = vmatprep.mubr.msk.f32.mxu1 %vm6324_vm0, %v8007_v2  ;;  %v218_v4 = vld [vmem:[%s7992_s2] sm:$0xff]  ;;  %v219_v5 = vld [vmem:[%s7992_s2 + $0x8] sm:$0xff]  ;;  %v220_v6 = vld [vmem:[%s7992_s2 + $0x10] sm:$0xff]  ;;  %v6327_v12 = vmov 1   ;;  %vm554_vm1 = vcmask 1041409   ;;  %vm557_vm2 = vcmask 1042434  }
  0x3c   :  { %5675 = vset.pattern.permute.xlu1 %v6326_v3  ;;  %5673 = vset.pattern.permute.xlu0 %v6326_v3  ;;  %v6466_v7 = vpack.c.bf16 %v219_v5, %v218_v4  ;;  %v221_v8 = vld [vmem:[%s7992_s2 + $0x18] sm:$0xff]  ;;  %v91_v9 = vld [vmem:[%s7990_s0 + $0x10] sm:$0xff]  ;;  %v90_v10 = vld [vmem:[%s7990_s0 + $0x8] sm:$0xff]  ;;  %vm560_vm3 = vcmask 1043459   ;;  %vm563_vm4 = vcmask 1044484   ;;  %vm566_vm5 = vcmask 1045509  }
  0x3d   :  { %5592 = vmatprep.subr.bf16.mxu0 %v8005_v1  ;;  %5362 = vmatprep.mubr.msk.f32.mxu0 %vm6324_vm0, %v8007_v2  ;;  %v6478_v11 = vpack.c.bf16 %v221_v8, %v220_v6  ;;  %v89_v13 = vld [vmem:[%s7990_s0] sm:$0xff]  ;;  %v92_v14 = vld [vmem:[%s7990_s0 + $0x18] sm:$0xff]  ;;  %v94_v16 = vld [vmem:[%s7990_s0 + $0x28] sm:$0xff]  ;;  %vm569_vm6 = vcmask 1046534   ;;  %vm572_vm7 = vcmask 1047559   ;;  %vm222_vm8 = vcmask 261120  }
  0x3e   :  { %110 = vperm.xlu1 %5675, %v91_v9   ;;  %105 = vperm.xlu0 %5673, %v90_v10   ;;  %v93_v15 = vld [vmem:[%s7990_s0 + $0x20] sm:$0xff]  ;;  %v95_v17 = vld [vmem:[%s7990_s0 + $0x30] sm:$0xff]  ;;  %v96_v18 = vld [vmem:[%s7990_s0 + $0x38] sm:$0xff]  ;;  %s6328_s0 = smov 64   ;;  %vm544_vm9 = vcmask 253952   ;;  %vm1289_vm10 = vcmask 256002  }
  0x3f   :  { %5582 = vmatpush3.bf16.msra.mxu1 %v6466_v7  ;;  %5594 = vmatpush3.bf16.msra.mxu0 %v6466_v7  ;;  %v5076_v27 = vld [vmem:[%s7991_s1] ss:$0 sm:$0xff]  ;;  %v5077_v28 = vld [vmem:[%s7991_s1 + $0x1] ss:$0 sm:$0xff]  ;;  %s6329_s1 = smov 32   ;;  %vm2027_vm11 = vcmask 258052  }
  0x40   :  { %5583 = vmatprep.subr.bf16.mxu1 %v8005_v1  ;;  %5595 = vmatprep.subr.bf16.mxu0 %v8005_v1  ;;  %v5078_v36 = vld [vmem:[#allocation4] ss:$0 sm:$0xff]  ;;  %vm2765_vm12 = vcmask 260102   ;;  %vm920_vm13 = vcmask 254977   ;;  %vm1658_vm14 = vcmask 257027   ;;  %vm2396_vm15 = vcmask 259077  }
  0x42   :  { %5676 = vset.pattern.permute.xlu1 %v6327_v12  ;;  %5674 = vset.pattern.permute.xlu0 %v6327_v12 }
  0x43   :  { %5585 = vmatpush3.bf16.msra.mxu1 %v6478_v11  ;;  %160 = vperm.xlu1 %5676, %v91_v9  }
  0x44   :  { %156 = vperm.xlu0 %5674, %v90_v10   ;;  %5586 = vmatprep.subr.bf16.mxu1 %v8005_v1 }
  0x45   :  { %5597 = vmatpush3.bf16.msra.mxu0 %v6478_v11 }
  0x46   :  { %5341 = vmatmul.mubr.f32.vlgmr.msra.gmra.mrb[0].mxu1 %v8007_v2  ;;  %5604 = vmatprep.subr.bf16.mxu0 %v8005_v1 }
  0x47   :  { %5677 = vset.pattern.permute.xlu1 %v6326_v3  ;;  %5588 = vmatpush3.bf16.msra.mxu1 %v6466_v7 }
  0x48   :  { %100 = vperm.xlu1 %5677, %v89_v13   ;;  %5678 = vset.pattern.permute.xlu0 %v6326_v3 }
  0x49   :  { %115 = vperm.xlu0 %5678, %v92_v14   ;;  %5589 = vmatprep.subr.bf16.mxu1 %v8005_v1 }
  0x4a   :  { %5351 = vmatprep.mubr.msk.f32.mxu1 %vm6324_vm0, %v8007_v2 }
  0x4b   :  { %5591 = vmatpush3.bf16.msra.mxu1 %v6478_v11 }
  0x4c   :  { %5679 = vset.pattern.permute.xlu1 %v6327_v12  ;;  %5598 = vmatprep.subr.bf16.mxu1 %v8005_v1 }
  0x4d   :  { %152 = vperm.xlu1 %5679, %v89_v13   ;;  %120 = vperm.xlu0 %5678, %v93_v15  }
  0x51   :  { %164 = vperm.xlu1 %5679, %v92_v14   ;;  %125 = vperm.xlu0 %5678, %v94_v16  }
  0x55   :  { %168 = vperm.xlu1 %5679, %v93_v15   ;;  %130 = vperm.xlu0 %5678, %v95_v17  }
  0x59   :  { %172 = vperm.xlu1 %5679, %v94_v16   ;;  %135 = vperm.xlu0 %5678, %v96_v18  }
  0x5d   :  { %176 = vperm.xlu1 %5679, %v95_v17  }
  0x61   :  { %180 = vperm.xlu1 %5679, %v96_v18  }
  0xbd   :  { %v111_v19 = vpop.permute.xlu1 %110  ;;  %v106_v21 = vpop.permute.xlu0 %105 }
  0xbe   :  { %v143_v37 = vmul.f32 %v5076_v27, %v106_v21  ;;  %v144_v41 = vmul.f32 %v5076_v27, %v111_v19 }
  0xc2   :  { %v161_v20 = vpop.permute.xlu1 %160 }
  0xc3   :  { %v157_v23 = vpop.permute.xlu0 %156  ;;  %v189_v42 = vmul.f32 %v5077_v28, %v161_v20 }
  0xc4   :  { %v188_v38 = vmul.f32 %v5077_v28, %v157_v23 }
  0xc5   :  { %v197_v50 = vadd.f32 %v189_v42, %v144_v41 }
  0xc6   :  { %v196_v45 = vadd.f32 %v188_v38, %v143_v37 }
  0xc7   :  { %v101_v22 = vpop.permute.xlu1 %100  ;;  %v6526_v59 = vadd.f32 %v5078_v36, %v197_v50 }
  0xc8   :  { %v116_v25 = vpop.permute.xlu0 %115  ;;  %v142_v29 = vmul.f32 %v5076_v27, %v101_v22  ;;  %v6524_v55 = vadd.f32 %v5078_v36, %v196_v45 }
  0xc9   :  { %v145_v51 = vmul.f32 %v5076_v27, %v116_v25 }
  0xcc   :  { %v153_v24 = vpop.permute.xlu1 %152  ;;  %v121_v31 = vpop.permute.xlu0 %120 }
  0xcd   :  { %v187_v30 = vmul.f32 %v5077_v28, %v153_v24  ;;  %v146_v46 = vmul.f32 %v5076_v27, %v121_v31 }
  0xcf   :  { %v195_v33 = vadd.f32 %v187_v30, %v142_v29 }
  0xd0   :  { %v165_v26 = vpop.permute.xlu1 %164  ;;  %v126_v34 = vpop.permute.xlu0 %125 }
  0xd1   :  { %v6518_v39 = vadd.f32 %v5078_v36, %v195_v33  ;;  %v190_v52 = vmul.f32 %v5077_v28, %v165_v26  ;;  %v147_v61 = vmul.f32 %v5076_v27, %v126_v34 }
  0xd3   :  { %v198_v60 = vadd.f32 %v190_v52, %v145_v51 }
  0xd4   :  { %v169_v32 = vpop.permute.xlu1 %168  ;;  %v131_v48 = vpop.permute.xlu0 %130 }
  0xd5   :  { %v191_v47 = vmul.f32 %v5077_v28, %v169_v32  ;;  %v148_v57 = vmul.f32 %v5076_v27, %v131_v48  ;;  %v6532_v10 = vadd.f32 %v5078_v36, %v198_v60 }
  0xd7   :  { %v199_v56 = vadd.f32 %v191_v47, %v146_v46 }
  0xd8   :  { %v173_v35 = vpop.permute.xlu1 %172  ;;  %v136_v63 = vpop.permute.xlu0 %135 }
  0xd9   :  { %v192_v62 = vmul.f32 %v5077_v28, %v173_v35  ;;  %v6530_v8 = vadd.f32 %v5078_v36, %v199_v56  ;;  %v149_v13 = vmul.f32 %v5076_v27, %v136_v63 }
  0xdb   :  { %v200_v12 = vadd.f32 %v192_v62, %v147_v61 }
  0xdc   :  { %v177_v49 = vpop.permute.xlu1 %176 }
  0xdd   :  { %v193_v58 = vmul.f32 %v5077_v28, %v177_v49  ;;  %v6539_v21 = vadd.f32 %v5078_v36, %v200_v12 }
  0xdf   :  { %v201_v9 = vadd.f32 %v193_v58, %v148_v57 }
  0xe0   :  { %v181_v0 = vpop.permute.xlu1 %180 }
  0xe1   :  { %v194_v14 = vmul.f32 %v5077_v28, %v181_v0  ;;  %v6536_v20 = vadd.f32 %v5078_v36, %v201_v9 }
  0xe3   :  { %v202_v22 = vadd.f32 %v194_v14, %v149_v13 }
  0xe5   :  { %v6543_v26 = vadd.f32 %v5078_v36, %v202_v22 }
 0x119   :  { %v292_v40 = vpop.f32.mrb[0].mxu1 }
 0x11a   :  { %v5342_v43 = vpop.f32.mrb[1].mxu1  ;;  %v6521_v44 = vadd.f32 %v292_v40, %v6518_v39  ;;  %v297_v53 = vrot.slane %v292_v40, 1  ;;  %v298_v54 = vrot.slane %v292_v40, 2  ;;  %v300_v3 = vrot.slane %v292_v40, 4 }
 0x11b   :  { %v299_v5 = vrot.slane %v292_v40, 3  ;;  %v302_v15 = vrot.slane %v292_v40, 6  ;;  %v301_v18 = vrot.slane %v292_v40, 5  ;;  %v303_v24 = vrot.slane %v292_v40, 7 }
 0x11c   :  { %5680 = vtanh.f32 %v6521_v44  ;;  %v313_v4 = vadd.f32 %v297_v53, %v6524_v55  ;;  %v314_v6 = vadd.f32 %v298_v54, %v6526_v59  ;;  %v316_v16 = vadd.f32 %v300_v3, %v6530_v8 }
 0x11d   :  { %v315_v19 = vadd.f32 %v299_v5, %v6532_v10  ;;  %v318_v23 = vadd.f32 %v302_v15, %v6536_v20  ;;  %v317_v25 = vadd.f32 %v301_v18, %v6539_v21  ;;  %v319_v27 = vadd.f32 %v303_v24, %v6543_v26 }
 0x11e   :  { %5682 = vtanh.f32 %v313_v4  ;;  %v5079_v35 = vmul.f32 -1.442695, %v6521_v44  ;;  %v5080_v36 = vmul.f32 -1.442695, %v313_v4  ;;  %v5081_v37 = vmul.f32 -1.442695, %v314_v6 }
 0x11f   :  { %5684 = vtanh.f32 %v314_v6  ;;  %v5083_v38 = vmul.f32 -1.442695, %v316_v16  ;;  %v5082_v41 = vmul.f32 -1.442695, %v315_v19  ;;  %v5085_v42 = vmul.f32 -1.442695, %v318_v23 }
 0x120   :  { %5686 = vtanh.f32 %v316_v16  ;;  %v5084_v45 = vmul.f32 -1.442695, %v317_v25  ;;  %v5086_v46 = vmul.f32 -1.442695, %v319_v27 }
 0x121   :  { %5688 = vtanh.f32 %v315_v19 }
 0x122   :  { %5690 = vtanh.f32 %v318_v23 }
 0x123   :  { %5692 = vtanh.f32 %v317_v25 }
 0x124   :  { %5694 = vtanh.f32 %v319_v27 }
 0x125   :  { %5696 = vpow2.f32 %v5079_v35 }
 0x126   :  { %v5681_v17 = vpop.eup %5680  ;;  %5698 = vpow2.f32 %v5080_v36 }
 0x127   :  { %392 = vrot.lane.b32.xlu0 %v5681_v17, %s6328_s0  ;;  %5700 = vpow2.f32 %v5081_v37 }
 0x128   :  { %v5683_v28 = vpop.eup %5682  ;;  %5702 = vpow2.f32 %v5083_v38 }
 0x129   :  { %v5685_v29 = vpop.eup %5684  ;;  %5704 = vpow2.f32 %v5082_v41 }
 0x12a   :  { %396 = vrot.lane.b32.xlu1 %v5685_v29, %s6328_s0  ;;  %v5687_v30 = vpop.eup %5686  ;;  %5706 = vpow2.f32 %v5085_v42 }
 0x12b   :  { %394 = vrot.lane.b32.xlu0 %v5683_v28, %s6328_s0  ;;  %v5689_v31 = vpop.eup %5688 }
 0x12c   :  { %v5691_v32 = vpop.eup %5690 }
 0x12d   :  { %v5693_v33 = vpop.eup %5692 }
 0x12e   :  { %398 = vrot.lane.b32.xlu1 %v5689_v31, %s6328_s0  ;;  %v5695_v34 = vpop.eup %5694 }
 0x12f   :  { %400 = vrot.lane.b32.xlu0 %v5687_v30, %s6328_s0  ;;  %v5697_v40 = vpop.eup %5696 }
 0x130   :  { %v344_v43 = vadd.f32 1.0, %v5697_v40  ;;  %v5699_v47 = vpop.eup %5698 }
 0x131   :  { %v5701_v48 = vpop.eup %5700  ;;  %v345_v44 = vadd.f32 1.0, %v5699_v47 }
 0x132   :  { %402 = vrot.lane.b32.xlu1 %v5693_v33, %s6328_s0  ;;  %5708 = vrcp.f32 %v344_v43  ;;  %v5703_v49 = vpop.eup %5702  ;;  %v346_v50 = vadd.f32 1.0, %v5701_v48 }
 0x133   :  { %404 = vrot.lane.b32.xlu0 %v5691_v32, %s6328_s0  ;;  %5710 = vpow2.f32 %v5084_v45  ;;  %v5705_v51 = vpop.eup %5704  ;;  %v348_v53 = vadd.f32 1.0, %v5703_v49 }
 0x134   :  { %5712 = vpow2.f32 %v5086_v46  ;;  %v5707_v52 = vpop.eup %5706  ;;  %v347_v57 = vadd.f32 1.0, %v5705_v51 }
 0x135   :  { %5714 = vrcp.f32 %v345_v44  ;;  %v350_v61 = vadd.f32 1.0, %v5707_v52 }
 0x136   :  { %406 = vrot.lane.b32.xlu1 %v5695_v34, %s6328_s0  ;;  %5716 = vrcp.f32 %v346_v50 }
 0x137   :  { %5718 = vrcp.f32 %v348_v53 }
 0x138   :  { %5720 = vrcp.f32 %v347_v57 }
 0x139   :  { %5722 = vrcp.f32 %v350_v61 }
 0x13c   :  { %v6554_v54 = vpop.eup %5708 }
 0x13d   :  { %v5711_v58 = vpop.eup %5710  ;;  %v376_v31 = vmul.f32 0.0, %v6554_v54 }
 0x13e   :  { %v349_v62 = vadd.f32 1.0, %v5711_v58  ;;  %v5713_v63 = vpop.eup %5712 }
 0x13f   :  { %v351_v0 = vadd.f32 1.0, %v5713_v63  ;;  %v6558_v3 = vpop.eup %5714 }
 0x140   :  { %5724 = vrcp.f32 %v349_v62  ;;  %v6560_v5 = vpop.eup %5716  ;;  %v377_v34 = vmul.f32 0.0, %v6558_v3 }
 0x141   :  { %5726 = vrcp.f32 %v351_v0  ;;  %v6565_v13 = vpop.eup %5718  ;;  %v378_v35 = vmul.f32 0.0, %v6560_v5 }
 0x142   :  { %v6568_v15 = vpop.eup %5720  ;;  %v380_v41 = vmul.f32 0.0, %v6565_v13 }
 0x143   :  { %v6573_v19 = vpop.eup %5722  ;;  %v379_v43 = vmul.f32 0.0, %v6568_v15 }
 0x144   :  { %v382_v44 = vmul.f32 0.0, %v6573_v19 }
 0x14a   :  { %v6576_v23 = vpop.eup %5724 }
 0x14b   :  { %v6582_v28 = vpop.eup %5726  ;;  %v381_v49 = vmul.f32 0.0, %v6576_v23 }
 0x199   :  { %v393_v56 = vpop.permute.xlu0 %392 }
 0x19a   :  { %v416_v60 = vmul.f32 %v6554_v54, %v393_v56  ;;  %v383_v56 = vmul.f32 0.0, %v6582_v28 }
 0x19c   :  { %432 = vrot.lane.b32.xlu0 %v416_v60, %s6329_s1  ;;  %v397_v6 = vpop.permute.xlu1 %396 }
 0x19d   :  { %v395_v4 = vpop.permute.xlu0 %394  ;;  %v418_v12 = vmul.f32 %v6560_v5, %v397_v6 }
 0x19e   :  { %v417_v9 = vmul.f32 %v6558_v3, %v395_v4 }
 0x19f   :  { %436 = vrot.lane.b32.xlu1 %v418_v12, %s6329_s1 }
 0x1a0   :  { %434 = vrot.lane.b32.xlu0 %v417_v9, %s6329_s1  ;;  %v399_v16 = vpop.permute.xlu1 %398 }
 0x1a1   :  { %v401_v14 = vpop.permute.xlu0 %400  ;;  %v419_v18 = vmul.f32 %v6568_v15, %v399_v16 }
 0x1a2   :  { %v420_v17 = vmul.f32 %v6565_v13, %v401_v14 }
 0x1a3   :  { %438 = vrot.lane.b32.xlu1 %v419_v18, %s6329_s1 }
 0x1a4   :  { %440 = vrot.lane.b32.xlu0 %v420_v17, %s6329_s1  ;;  %v403_v24 = vpop.permute.xlu1 %402 }
 0x1a5   :  { %v405_v22 = vpop.permute.xlu0 %404  ;;  %v421_v27 = vmul.f32 %v6576_v23, %v403_v24 }
 0x1a6   :  { %v422_v25 = vmul.f32 %v6573_v19, %v405_v22 }
 0x1a7   :  { %442 = vrot.lane.b32.xlu1 %v421_v27, %s6329_s1 }
 0x1a8   :  { %444 = vrot.lane.b32.xlu0 %v422_v25, %s6329_s1  ;;  %v407_v29 = vpop.permute.xlu1 %406 }
 0x1a9   :  { %v423_v30 = vmul.f32 %v6582_v28, %v407_v29 }
 0x1ab   :  { %446 = vrot.lane.b32.xlu1 %v423_v30, %s6329_s1 }
 0x20e   :  { %v433_v32 = vpop.permute.xlu0 %432 }
 0x20f   :  { %v6587_v33 = vadd.f32 %v433_v32, %v376_v31 }
 0x211   :  { %5728 = vtanh.f32 %v6587_v33  ;;  %v437_v37 = vpop.permute.xlu1 %436 }
 0x212   :  { %v435_v36 = vpop.permute.xlu0 %434  ;;  %v6594_v40 = vadd.f32 %v437_v37, %v378_v35 }
 0x213   :  { %v6592_v38 = vadd.f32 %v435_v36, %v377_v34 }
 0x215   :  { %5730 = vtanh.f32 %v6592_v38  ;;  %v439_v46 = vpop.permute.xlu1 %438 }
 0x216   :  { %5732 = vtanh.f32 %v6594_v40  ;;  %v441_v45 = vpop.permute.xlu0 %440  ;;  %v6603_v48 = vadd.f32 %v439_v46, %v379_v43 }
 0x217   :  { %v6600_v47 = vadd.f32 %v441_v45, %v380_v41 }
 0x219   :  { %5734 = vtanh.f32 %v6600_v47  ;;  %v443_v51 = vpop.permute.xlu1 %442 }
 0x21a   :  { %5736 = vtanh.f32 %v6603_v48  ;;  %v445_v50 = vpop.permute.xlu0 %444  ;;  %v6611_v53 = vadd.f32 %v443_v51, %v381_v49 }
 0x21b   :  { %v5729_v42 = vpop.eup %5728  ;;  %v6609_v52 = vadd.f32 %v445_v50, %v382_v44 }
 0x21c   :  { %480 = vrot.lane.b32.xlu0 %v5729_v42, %s6328_s0 }
 0x21d   :  { %5738 = vtanh.f32 %v6609_v52  ;;  %v447_v58 = vpop.permute.xlu1 %446 }
 0x21e   :  { %5740 = vtanh.f32 %v6611_v53  ;;  %v6616_v61 = vadd.f32 %v447_v58, %v383_v56 }
 0x21f   :  { %v5731_v57 = vpop.eup %5730 }
 0x220   :  { %v5733_v60 = vpop.eup %5732  ;;  %482 = vrot.lane.b32.xlu0 %v5731_v57, %s6328_s0  ;;  %5742 = vtanh.f32 %v6616_v61 }
 0x221   :  { %484 = vrot.lane.b32.xlu1 %v5733_v60, %s6328_s0 }
 0x223   :  { %v5735_v62 = vpop.eup %5734 }
 0x224   :  { %v5737_v63 = vpop.eup %5736  ;;  %488 = vrot.lane.b32.xlu0 %v5735_v62, %s6328_s0 }
 0x225   :  { %486 = vrot.lane.b32.xlu1 %v5737_v63, %s6328_s0 }
 0x227   :  { %v5739_v0 = vpop.eup %5738 }
 0x228   :  { %v5741_v4 = vpop.eup %5740  ;;  %492 = vrot.lane.b32.xlu0 %v5739_v0, %s6328_s0 }
 0x229   :  { %490 = vrot.lane.b32.xlu1 %v5741_v4, %s6328_s0 }
 0x22a   :  { %v5743_v6 = vpop.eup %5742 }
 0x22d   :  { %494 = vrot.lane.b32.xlu1 %v5743_v6, %s6328_s0 }
 0x28e   :  { %v481_v9 = vpop.permute.xlu0 %480 }
 0x28f   :  { %v6633_v18 = vmul.f32 %v6554_v54, %v481_v9 }
 0x292   :  { %v483_v12 = vpop.permute.xlu0 %482 }
 0x293   :  { %v485_v14 = vpop.permute.xlu1 %484  ;;  %v6627_v16 = vmul.f32 %v6558_v3, %v483_v12 }
 0x294   :  { %v6630_v17 = vmul.f32 %v6560_v5, %v485_v14 }
 0x295   :  { %v553_v22 = vrot.slane %v6627_v16, 7 }
 0x296   :  { %v489_v24 = vpop.permute.xlu0 %488  ;;  %v556_v25 = vrot.slane %v6630_v17, 6 }
 0x297   :  { %v555_v27 = vsel %vm554_vm1, %v553_v22, %v6633_v18  ;;  %v487_v29 = vpop.permute.xlu1 %486  ;;  %v6640_v3 = vmul.f32 %v6565_v13, %v489_v24 }
 0x298   :  { %v6643_v5 = vmul.f32 %v6568_v15, %v487_v29  ;;  %v558_v30 = vsel %vm557_vm2, %v556_v25, %v555_v27 }
 0x299   :  { %v562_v54 = vrot.slane %v6640_v3, 4 }
 0x29a   :  { %v559_v31 = vrot.slane %v6643_v5, 5  ;;  %v493_v32 = vpop.permute.xlu0 %492 }
 0x29b   :  { %v491_v34 = vpop.permute.xlu1 %490  ;;  %v6649_v35 = vmul.f32 %v6573_v19, %v493_v32 }
 0x29c   :  { %v561_v36 = vsel %vm560_vm3, %v559_v31, %v558_v30  ;;  %v6653_v13 = vmul.f32 %v6576_v23, %v491_v34 }
 0x29d   :  { %8033 = vst [vmem:[#allocation14_spill] sm:$0xff] %v6649_v35  ;;  %v564_v15 = vsel %vm563_vm4, %v562_v54, %v561_v36  ;;  %v568_v37 = vrot.slane %v6649_v35, 2 }
 0x29e   :  { %8034 = vst [vmem:[#allocation15_spill] sm:$0xff] %v6653_v13  ;;  %v565_v41 = vrot.slane %v6653_v13, 3 }
 0x29f   :  { %v495_v42 = vpop.permute.xlu1 %494 }
 0x2a0   :  { %v6659_v43 = vmul.f32 %v6582_v28, %v495_v42  ;;  %v567_v19 = vsel %vm566_vm5, %v565_v41, %v564_v15 }
 0x2a1   :  { %v570_v45 = vsel %vm569_vm6, %v568_v37, %v567_v19 }
 0x2a2   :  { %8035 = vst [vmem:[#allocation16_spill] sm:$0xff] %v6659_v43  ;;  %v571_v23 = vrot.slane %v6659_v43, 1 }
 0x2a4   :  { %v573_v46 = vsel %vm572_vm7, %v571_v23, %v570_v45 }
 0x2a5   :  { %574 = vrot.lane.b32.xlu0 %v573_v46, %s6329_s1 }
 0x317   :  { %v575_v44 = vpop.permute.xlu0 %574 }
 0x318   :  { %5352 = vmatmul.mubr.msk.f32.vlgmr.msra.gmra.mrb[2].mxu1 %vm222_vm8, %v575_v44 }
 0x319   :  { %5600 = vmatpush3.bf16.msra.mxu1 %v6466_v7  ;;  %5373 = vmatprep.mubr.msk.f32.mxu1 %vm6324_vm0, %v8007_v2 }
 0x31a   :  { %5601 = vmatprep.subr.bf16.mxu1 %v8005_v1 }
 0x31d   :  { %5603 = vmatpush3.bf16.msra.mxu1 %v6478_v11 }
 0x31e   :  { %5610 = vmatprep.subr.bf16.mxu1 %v8005_v1 }
 0x3eb   :  { %v644_v28 = vpop.f32.mrb[2].mxu1 }
 0x3ec   :  { %v5353_v49 = vpop.f32.mrb[3].mxu1  ;;  %v650_v50 = vrot.slane %v644_v28, 1  ;;  %v649_v51 = vrot.slane %v644_v28, 7  ;;  %v665_v56 = vadd.f32 %v644_v28, %v6524_v55  ;;  %v651_v57 = vrot.slane %v644_v28, 2 }
 0x3ed   :  { %v652_v60 = vrot.slane %v644_v28, 3  ;;  %v653_v63 = vrot.slane %v644_v28, 4  ;;  %v654_v4 = vrot.slane %v644_v28, 5  ;;  %v655_v9 = vrot.slane %v644_v28, 6 }
 0x3ee   :  { %v666_v58 = vadd.f32 %v650_v50, %v6526_v59  ;;  %v664_v62 = vadd.f32 %v649_v51, %v6518_v39  ;;  %5744 = vtanh.f32 %v665_v56  ;;  %v667_v0 = vadd.f32 %v651_v57, %v6532_v10 }
 0x3ef   :  { %v668_v6 = vadd.f32 %v652_v60, %v6530_v8  ;;  %v669_v12 = vadd.f32 %v653_v63, %v6539_v21  ;;  %v670_v14 = vadd.f32 %v654_v4, %v6536_v20  ;;  %v671_v22 = vadd.f32 %v655_v9, %v6543_v26 }
 0x3f0   :  { %5746 = vtanh.f32 %v666_v58  ;;  %v5089_v34 = vmul.f32 -1.442695, %v665_v56  ;;  %v5090_v36 = vmul.f32 -1.442695, %v666_v58  ;;  %v5088_v15 = vmul.f32 -1.442695, %v664_v62 }
 0x3f1   :  { %5748 = vtanh.f32 %v664_v62  ;;  %v5091_v37 = vmul.f32 -1.442695, %v667_v0  ;;  %v5092_v41 = vmul.f32 -1.442695, %v668_v6  ;;  %v5093_v42 = vmul.f32 -1.442695, %v669_v12 }
 0x3f2   :  { %5750 = vtanh.f32 %v667_v0  ;;  %v5094_v19 = vmul.f32 -1.442695, %v670_v14  ;;  %v5095_v45 = vmul.f32 -1.442695, %v671_v22 }
 0x3f3   :  { %5752 = vtanh.f32 %v668_v6 }
 0x3f4   :  { %5754 = vtanh.f32 %v669_v12 }
 0x3f5   :  { %5756 = vtanh.f32 %v670_v14 }
 0x3f6   :  { %5758 = vtanh.f32 %v671_v22 }
 0x3f7   :  { %5760 = vpow2.f32 %v5089_v34 }
 0x3f8   :  { %v5745_v24 = vpop.eup %5744  ;;  %5762 = vpow2.f32 %v5090_v36 }
 0x3f9   :  { %770 = vrot.lane.b32.xlu1 %v5745_v24, %s6328_s0  ;;  %5764 = vpow2.f32 %v5088_v15 }
 0x3fa   :  { %v5747_v25 = vpop.eup %5746  ;;  %5766 = vpow2.f32 %v5091_v37 }
 0x3fb   :  { %772 = vrot.lane.b32.xlu0 %v5747_v25, %s6328_s0  ;;  %v5749_v27 = vpop.eup %5748  ;;  %5768 = vpow2.f32 %v5092_v41 }
 0x3fc   :  { %v5751_v29 = vpop.eup %5750  ;;  %5770 = vpow2.f32 %v5093_v42 }
 0x3fd   :  { %768 = vrot.lane.b32.xlu1 %v5749_v27, %s6328_s0  ;;  %v5753_v30 = vpop.eup %5752  ;;  %5772 = vpow2.f32 %v5094_v19 }
 0x3fe   :  { %v5755_v54 = vpop.eup %5754  ;;  %5774 = vpow2.f32 %v5095_v45 }
 0x3ff   :  { %774 = vrot.lane.b32.xlu0 %v5751_v29, %s6328_s0  ;;  %v5757_v31 = vpop.eup %5756 }
 0x400   :  { %v5759_v32 = vpop.eup %5758 }
 0x401   :  { %776 = vrot.lane.b32.xlu1 %v5753_v30, %s6328_s0  ;;  %v5761_v23 = vpop.eup %5760 }
 0x402   :  { %v5763_v46 = vpop.eup %5762  ;;  %v697_v44 = vadd.f32 1.0, %v5761_v23 }
 0x403   :  { %778 = vrot.lane.b32.xlu0 %v5755_v54, %s6328_s0  ;;  %v5765_v28 = vpop.eup %5764  ;;  %v698_v49 = vadd.f32 1.0, %v5763_v46 }
 0x404   :  { %v5767_v50 = vpop.eup %5766  ;;  %5776 = vrcp.f32 %v697_v44  ;;  %v696_v51 = vadd.f32 1.0, %v5765_v28 }
 0x405   :  { %780 = vrot.lane.b32.xlu1 %v5757_v31, %s6328_s0  ;;  %v5769_v56 = vpop.eup %5768  ;;  %5778 = vrcp.f32 %v698_v49  ;;  %v699_v57 = vadd.f32 1.0, %v5767_v50  ;;  %v737_v49 = vrot.slane %v6592_v38, 7  ;;  %v738_v50 = vrot.slane %v6594_v40, 7 }
 0x406   :  { %v5771_v58 = vpop.eup %5770  ;;  %5780 = vrcp.f32 %v696_v51  ;;  %v700_v60 = vadd.f32 1.0, %v5769_v56 }
 0x407   :  { %782 = vrot.lane.b32.xlu0 %v5759_v32, %s6328_s0  ;;  %v5773_v62 = vpop.eup %5772  ;;  %5782 = vrcp.f32 %v699_v57  ;;  %v701_v63 = vadd.f32 1.0, %v5771_v58  ;;  %v736_v58 = vrot.slane %v6587_v33, 7 }
 0x408   :  { %v5775_v0 = vpop.eup %5774  ;;  %5784 = vrcp.f32 %v700_v60  ;;  %v702_v4 = vadd.f32 1.0, %v5773_v62 }
 0x409   :  { %5786 = vrcp.f32 %v701_v63  ;;  %v703_v6 = vadd.f32 1.0, %v5775_v0  ;;  %v739_v63 = vrot.slane %v6603_v48, 7 }
 0x40a   :  { %5788 = vrcp.f32 %v702_v4 }
 0x40b   :  { %5790 = vrcp.f32 %v703_v6  ;;  %v740_v6 = vrot.slane %v6600_v47, 7 }
 0x40e   :  { %v6689_v9 = vpop.eup %5776 }
 0x40f   :  { %v6691_v14 = vpop.eup %5778  ;;  %v753_v51 = vmul.f32 %v6689_v9, %v737_v49 }
 0x410   :  { %v6696_v27 = vpop.eup %5780  ;;  %v754_v57 = vmul.f32 %v6691_v14, %v738_v50 }
 0x411   :  { %v6699_v30 = vpop.eup %5782  ;;  %v752_v38 = vmul.f32 %v6696_v27, %v736_v58 }
 0x412   :  { %v6704_v34 = vpop.eup %5784  ;;  %v755_v4 = vmul.f32 %v6699_v30, %v739_v63 }
 0x413   :  { %v6707_v15 = vpop.eup %5786  ;;  %v756_v48 = vmul.f32 %v6704_v34, %v740_v6 }
 0x414   :  { %v6712_v19 = vpop.eup %5788 }
 0x415   :  { %v6715_v23 = vpop.eup %5790 }
 0x46b   :  { %v771_v12 = vpop.permute.xlu1 %770 }
 0x46c   :  { %v793_v22 = vmul.f32 %v6689_v9, %v771_v12 }
 0x46d   :  { %v773_v24 = vpop.permute.xlu0 %772 }
 0x46e   :  { %v794_v25 = vmul.f32 %v6691_v14, %v773_v24  ;;  %810 = vrot.lane.b32.xlu1 %v793_v22, %s6329_s1  ;;  %v741_v22 = vrot.slane %v6611_v53, 7 }
 0x46f   :  { %v769_v29 = vpop.permute.xlu1 %768 }
 0x470   :  { %812 = vrot.lane.b32.xlu0 %v794_v25, %s6329_s1  ;;  %v792_v54 = vmul.f32 %v6696_v27, %v769_v29  ;;  %v757_v29 = vmul.f32 %v6707_v15, %v741_v22 }
 0x471   :  { %v775_v31 = vpop.permute.xlu0 %774 }
 0x472   :  { %v795_v32 = vmul.f32 %v6699_v30, %v775_v31  ;;  %808 = vrot.lane.b32.xlu1 %v792_v54, %s6329_s1  ;;  %v742_v54 = vrot.slane %v6609_v52, 7 }
 0x473   :  { %v777_v36 = vpop.permute.xlu1 %776 }
 0x474   :  { %814 = vrot.lane.b32.xlu0 %v795_v32, %s6329_s1  ;;  %v796_v37 = vmul.f32 %v6704_v34, %v777_v36  ;;  %v743_v32 = vrot.slane %v6616_v61, 7  ;;  %v758_v53 = vmul.f32 %v6712_v19, %v742_v54 }
 0x475   :  { %v779_v41 = vpop.permute.xlu0 %778 }
 0x476   :  { %v797_v42 = vmul.f32 %v6707_v15, %v779_v41  ;;  %816 = vrot.lane.b32.xlu1 %v796_v37, %s6329_s1  ;;  %v759_v41 = vmul.f32 %v6715_v23, %v743_v32 }
 0x477   :  { %v781_v45 = vpop.permute.xlu1 %780 }
 0x478   :  { %818 = vrot.lane.b32.xlu0 %v797_v42, %s6329_s1  ;;  %v798_v46 = vmul.f32 %v6712_v19, %v781_v45 }
 0x479   :  { %v783_v44 = vpop.permute.xlu0 %782 }
 0x47a   :  { %v799_v28 = vmul.f32 %v6715_v23, %v783_v44  ;;  %820 = vrot.lane.b32.xlu1 %v798_v46, %s6329_s1 }
 0x47c   :  { %822 = vrot.lane.b32.xlu0 %v799_v28, %s6329_s1 }
 0x4e0   :  { %v811_v56 = vpop.permute.xlu1 %810 }
 0x4e1   :  { %v6726_v60 = vadd.f32 %v811_v56, %v753_v51 }
 0x4e2   :  { %v813_v62 = vpop.permute.xlu0 %812 }
 0x4e3   :  { %v6729_v0 = vadd.f32 %v813_v62, %v754_v57  ;;  %5792 = vtanh.f32 %v6726_v60 }
 0x4e4   :  { %v809_v40 = vpop.permute.xlu1 %808 }
 0x4e5   :  { %5794 = vtanh.f32 %v6729_v0  ;;  %v6736_v12 = vadd.f32 %v809_v40, %v752_v38 }
 0x4e6   :  { %v815_v33 = vpop.permute.xlu0 %814 }
 0x4e7   :  { %v6739_v24 = vadd.f32 %v815_v33, %v755_v4  ;;  %5796 = vtanh.f32 %v6736_v12 }
 0x4e8   :  { %v817_v25 = vpop.permute.xlu1 %816 }
 0x4e9   :  { %5798 = vtanh.f32 %v6739_v24  ;;  %v6746_v31 = vadd.f32 %v817_v25, %v756_v48 }
 0x4ea   :  { %v819_v47 = vpop.permute.xlu0 %818 }
 0x4eb   :  { %v6749_v36 = vadd.f32 %v819_v47, %v757_v29  ;;  %5800 = vtanh.f32 %v6746_v31 }
 0x4ec   :  { %v821_v37 = vpop.permute.xlu1 %820 }
 0x4ed   :  { %5802 = vtanh.f32 %v6749_v36  ;;  %v5793_v42 = vpop.eup %5792  ;;  %v6755_v45 = vadd.f32 %v821_v37, %v758_v53 }
 0x4ee   :  { %v823_v52 = vpop.permute.xlu0 %822  ;;  %858 = vrot.lane.b32.xlu1 %v5793_v42, %s6328_s0 }
 0x4ef   :  { %v5795_v46 = vpop.eup %5794  ;;  %v6757_v44 = vadd.f32 %v823_v52, %v759_v41  ;;  %5804 = vtanh.f32 %v6755_v45 }
 0x4f0   :  { %860 = vrot.lane.b32.xlu0 %v5795_v46, %s6328_s0 }
 0x4f1   :  { %5806 = vtanh.f32 %v6757_v44  ;;  %v5797_v61 = vpop.eup %5796 }
 0x4f2   :  { %856 = vrot.lane.b32.xlu1 %v5797_v61, %s6328_s0 }
 0x4f3   :  { %v5799_v28 = vpop.eup %5798 }
 0x4f4   :  { %862 = vrot.lane.b32.xlu0 %v5799_v28, %s6328_s0 }
 0x4f5   :  { %v5801_v49 = vpop.eup %5800 }
 0x4f6   :  { %864 = vrot.lane.b32.xlu1 %v5801_v49, %s6328_s0 }
 0x4f7   :  { %v5803_v50 = vpop.eup %5802 }
 0x4f8   :  { %866 = vrot.lane.b32.xlu0 %v5803_v50, %s6328_s0 }
 0x4f9   :  { %v5805_v51 = vpop.eup %5804 }
 0x4fa   :  { %868 = vrot.lane.b32.xlu1 %v5805_v51, %s6328_s0 }
 0x4fb   :  { %v5807_v56 = vpop.eup %5806 }
 0x4fc   :  { %870 = vrot.lane.b32.xlu0 %v5807_v56, %s6328_s0 }
 0x560   :  { %v859_v57 = vpop.permute.xlu1 %858 }
 0x561   :  { %v6779_v6 = vmul.f32 %v6689_v9, %v859_v57 }
 0x562   :  { %v861_v58 = vpop.permute.xlu0 %860 }
 0x563   :  { %v6770_v62 = vmul.f32 %v6691_v14, %v861_v58 }
 0x564   :  { %v857_v63 = vpop.permute.xlu1 %856 }
 0x565   :  { %v6773_v38 = vmul.f32 %v6696_v27, %v857_v63  ;;  %v931_v22 = vrot.slane %v6770_v62, 7 }
 0x566   :  { %v863_v40 = vpop.permute.xlu0 %862 }
 0x567   :  { %v6776_v4 = vmul.f32 %v6699_v30, %v863_v40  ;;  %v929_v33 = vrot.slane %v6773_v38, 1 }
 0x568   :  { %v865_v25 = vpop.permute.xlu1 %864 }
 0x569   :  { %v933_v48 = vrot.slane %v6776_v4, 6  ;;  %v930_v14 = vsel %vm554_vm1, %v6779_v6, %v929_v33  ;;  %v6787_v27 = vmul.f32 %v6704_v34, %v865_v25 }
 0x56a   :  { %v867_v29 = vpop.permute.xlu0 %866  ;;  %v932_v30 = vsel %vm557_vm2, %v931_v22, %v930_v14 }
 0x56b   :  { %8036 = vst [vmem:[#allocation17_spill] sm:$0xff] %v6787_v27  ;;  %v6791_v54 = vmul.f32 %v6707_v15, %v867_v29  ;;  %v934_v9 = vsel %vm560_vm3, %v933_v48, %v932_v30  ;;  %v935_v47 = vrot.slane %v6787_v27, 5 }
 0x56c   :  { %v869_v53 = vpop.permute.xlu1 %868 }
 0x56d   :  { %8037 = vst [vmem:[#allocation18_spill] sm:$0xff] %v6791_v54  ;;  %v937_v32 = vrot.slane %v6791_v54, 4  ;;  %v936_v37 = vsel %vm563_vm4, %v935_v47, %v934_v9  ;;  %v6798_v41 = vmul.f32 %v6712_v19, %v869_v53 }
 0x56e   :  { %v871_v34 = vpop.permute.xlu0 %870 }
 0x56f   :  { %8038 = vst [vmem:[#allocation19_spill] sm:$0xff] %v6798_v41  ;;  %v6801_v42 = vmul.f32 %v6715_v23, %v871_v34  ;;  %v938_v52 = vsel %vm566_vm5, %v937_v32, %v936_v37  ;;  %v939_v15 = vrot.slane %v6798_v41, 3 }
 0x571   :  { %8039 = vst [vmem:[#allocation20_spill] sm:$0xff] %v6801_v42  ;;  %v941_v46 = vrot.slane %v6801_v42, 2  ;;  %v940_v61 = vsel %vm569_vm6, %v939_v15, %v938_v52 }
 0x573   :  { %v942_v28 = vsel %vm572_vm7, %v941_v46, %v940_v61 }
 0x574   :  { %943 = vrot.lane.b32.xlu1 %v942_v28, %s6329_s1 }
 0x5e6   :  { %v944_v49 = vpop.permute.xlu1 %943 }
 0x5e7   :  { %5363 = vmatmul.mubr.msk.f32.vlgmr.msra.gmra.mrb[0].mxu0 %vm222_vm8, %v944_v49 }
 0x5e8   :  { %5606 = vmatpush3.bf16.msra.mxu0 %v6466_v7  ;;  %5384 = vmatprep.mubr.msk.f32.mxu0 %vm6324_vm0, %v8007_v2 }
 0x5e9   :  { %5607 = vmatprep.subr.bf16.mxu0 %v8005_v1 }
 0x5ec   :  { %5609 = vmatpush3.bf16.msra.mxu0 %v6478_v11 }
 0x5ed   :  { %5616 = vmatprep.subr.bf16.mxu0 %v8005_v1 }
 0x6ba   :  { %v1013_v19 = vpop.f32.mrb[0].mxu0 }
 0x6bb   :  { %v1018_v23 = vrot.slane %v1013_v19, 6  ;;  %v5364_v50 = vpop.f32.mrb[1].mxu0  ;;  %v1020_v56 = vrot.slane %v1013_v19, 1  ;;  %v1019_v57 = vrot.slane %v1013_v19, 7  ;;  %v1035_v58 = vadd.f32 %v1013_v19, %v6526_v59 }
 0x6bc   :  { %v1021_v63 = vrot.slane %v1013_v19, 2  ;;  %v1022_v22 = vrot.slane %v1013_v19, 3  ;;  %v1023_v25 = vrot.slane %v1013_v19, 4  ;;  %v1024_v29 = vrot.slane %v1013_v19, 5 }
 0x6bd   :  { %v1033_v51 = vadd.f32 %v1018_v23, %v6518_v39  ;;  %v1036_v40 = vadd.f32 %v1020_v56, %v6532_v10  ;;  %v1034_v48 = vadd.f32 %v1019_v57, %v6524_v55  ;;  %v5099_v28 = vmul.f32 -1.442695, %v1035_v58 }
 0x6be   :  { %v1037_v14 = vadd.f32 %v1021_v63, %v6530_v8  ;;  %v1038_v30 = vadd.f32 %v1022_v22, %v6539_v21  ;;  %v1039_v9 = vadd.f32 %v1023_v25, %v6536_v20  ;;  %v1040_v47 = vadd.f32 %v1024_v29, %v6543_v26 }
 0x6bf   :  { %5808 = vtanh.f32 %v1033_v51  ;;  %v5097_v61 = vmul.f32 -1.442695, %v1033_v51  ;;  %v5100_v49 = vmul.f32 -1.442695, %v1036_v40  ;;  %v5098_v23 = vmul.f32 -1.442695, %v1034_v48 }
 0x6c0   :  { %5810 = vtanh.f32 %v1035_v58  ;;  %v5101_v50 = vmul.f32 -1.442695, %v1037_v14  ;;  %v5102_v57 = vmul.f32 -1.442695, %v1038_v30  ;;  %v5103_v63 = vmul.f32 -1.442695, %v1039_v9 }
 0x6c1   :  { %5812 = vtanh.f32 %v1036_v40 }
 0x6c2   :  { %5814 = vtanh.f32 %v1034_v48 }
 0x6c3   :  { %5816 = vtanh.f32 %v1037_v14 }
 0x6c4   :  { %5818 = vtanh.f32 %v1038_v30 }
 0x6c5   :  { %5820 = vtanh.f32 %v1039_v9 }
 0x6c6   :  { %5822 = vtanh.f32 %v1040_v47 }
 0x6c7   :  { %5824 = vpow2.f32 %v5097_v61 }
 0x6c8   :  { %5826 = vpow2.f32 %v5099_v28 }
 0x6c9   :  { %v5809_v33 = vpop.eup %5808  ;;  %5828 = vpow2.f32 %v5100_v49 }
 0x6ca   :  { %1137 = vrot.lane.b32.xlu0 %v5809_v33, %s6328_s0  ;;  %v5811_v32 = vpop.eup %5810  ;;  %5830 = vpow2.f32 %v5098_v23  ;;  %v5104_v33 = vmul.f32 -1.442695, %v1040_v47 }
 0x6cb   :  { %v5813_v53 = vpop.eup %5812  ;;  %1141 = vrot.lane.b32.xlu1 %v5811_v32, %s6328_s0  ;;  %5832 = vpow2.f32 %v5101_v50 }
 0x6cc   :  { %v5815_v37 = vpop.eup %5814 }
 0x6cd   :  { %v5817_v34 = vpop.eup %5816 }
 0x6ce   :  { %1143 = vrot.lane.b32.xlu0 %v5813_v53, %s6328_s0  ;;  %v5819_v52 = vpop.eup %5818 }
 0x6cf   :  { %1139 = vrot.lane.b32.xlu1 %v5815_v37, %s6328_s0  ;;  %v5821_v15 = vpop.eup %5820 }
 0x6d0   :  { %v5823_v46 = vpop.eup %5822 }
 0x6d1   :  { %v5825_v19 = vpop.eup %5824 }
 0x6d2   :  { %1145 = vrot.lane.b32.xlu0 %v5817_v34, %s6328_s0  ;;  %v1065_v56 = vadd.f32 1.0, %v5825_v19  ;;  %v5827_v22 = vpop.eup %5826 }
 0x6d3   :  { %1147 = vrot.lane.b32.xlu1 %v5819_v52, %s6328_s0  ;;  %v5829_v25 = vpop.eup %5828  ;;  %v1067_v51 = vadd.f32 1.0, %v5827_v22 }
 0x6d4   :  { %5834 = vrcp.f32 %v1065_v56  ;;  %v5831_v58 = vpop.eup %5830  ;;  %v1068_v40 = vadd.f32 1.0, %v5829_v25 }
 0x6d5   :  { %5836 = vpow2.f32 %v5102_v57  ;;  %v5833_v29 = vpop.eup %5832  ;;  %v1066_v32 = vadd.f32 1.0, %v5831_v58 }
 0x6d6   :  { %1149 = vrot.lane.b32.xlu0 %v5821_v15, %s6328_s0  ;;  %5838 = vpow2.f32 %v5103_v63  ;;  %v1069_v9 = vadd.f32 1.0, %v5833_v29 }
 0x6d7   :  { %1151 = vrot.lane.b32.xlu1 %v5823_v46, %s6328_s0  ;;  %5840 = vpow2.f32 %v5104_v33 }
 0x6d8   :  { %5842 = vrcp.f32 %v1067_v51 }
 0x6d9   :  { %5844 = vrcp.f32 %v1068_v40 }
 0x6da   :  { %5846 = vrcp.f32 %v1066_v32 }
 0x6db   :  { %5848 = vrcp.f32 %v1069_v9  ;;  %v1105_v9 = vrot.slane %v6736_v12, 7 }
 0x6de   :  { %v6832_v48 = vpop.eup %5834 }
 0x6df   :  { %v5837_v53 = vpop.eup %5836 }
 0x6e0   :  { %v5839_v37 = vpop.eup %5838  ;;  %v1070_v47 = vadd.f32 1.0, %v5837_v53 }
 0x6e1   :  { %v5841_v34 = vpop.eup %5840  ;;  %v1071_v52 = vadd.f32 1.0, %v5839_v37  ;;  %v1121_v37 = vmul.f32 %v6832_v48, %v1105_v9 }
 0x6e2   :  { %5850 = vrcp.f32 %v1070_v47  ;;  %v1072_v15 = vadd.f32 1.0, %v5841_v34  ;;  %v6836_v46 = vpop.eup %5842 }
 0x6e3   :  { %5852 = vrcp.f32 %v1071_v52  ;;  %v6838_v28 = vpop.eup %5844  ;;  %v1107_v52 = vrot.slane %v6729_v0, 7 }
 0x6e4   :  { %5854 = vrcp.f32 %v1072_v15  ;;  %v6843_v50 = vpop.eup %5846  ;;  %v1108_v15 = vrot.slane %v6739_v24, 7 }
 0x6e5   :  { %v6846_v57 = vpop.eup %5848 }
 0x6ec   :  { %v6851_v25 = vpop.eup %5850 }
 0x6ed   :  { %v6854_v58 = vpop.eup %5852 }
 0x6ee   :  { %v6859_v32 = vpop.eup %5854 }
 0x73c   :  { %v1138_v14 = vpop.permute.xlu0 %1137 }
 0x73d   :  { %v1161_v30 = vmul.f32 %v6832_v48, %v1138_v14  ;;  %v1142_v61 = vpop.permute.xlu1 %1141 }
 0x73e   :  { %v1163_v49 = vmul.f32 %v6836_v46, %v1142_v61  ;;  %v1123_v61 = vmul.f32 %v6836_v46, %v1107_v52 }
 0x73f   :  { %1177 = vrot.lane.b32.xlu0 %v1161_v30, %s6329_s1 }
 0x740   :  { %v1144_v19 = vpop.permute.xlu0 %1143  ;;  %1181 = vrot.lane.b32.xlu1 %v1163_v49, %s6329_s1 }
 0x741   :  { %v1164_v23 = vmul.f32 %v6838_v28, %v1144_v19  ;;  %v1140_v56 = vpop.permute.xlu1 %1139  ;;  %v1124_v19 = vmul.f32 %v6838_v28, %v1108_v15 }
 0x742   :  { %v1162_v63 = vmul.f32 %v6843_v50, %v1140_v56 }
 0x743   :  { %1183 = vrot.lane.b32.xlu0 %v1164_v23, %s6329_s1  ;;  %v1106_v23 = vrot.slane %v6726_v60, 7  ;;  %v1110_v60 = vrot.slane %v6749_v36, 7 }
 0x744   :  { %v1146_v33 = vpop.permute.xlu0 %1145  ;;  %1179 = vrot.lane.b32.xlu1 %v1162_v63, %s6329_s1  ;;  %v1109_v63 = vrot.slane %v6746_v31, 7  ;;  %v1111_v31 = vrot.slane %v6755_v45, 7 }
 0x745   :  { %v1165_v22 = vmul.f32 %v6846_v57, %v1146_v33  ;;  %v1148_v51 = vpop.permute.xlu1 %1147  ;;  %v1122_v0 = vmul.f32 %v6843_v50, %v1106_v23 }
 0x746   :  { %v1166_v40 = vmul.f32 %v6851_v25, %v1148_v51  ;;  %v1125_v51 = vmul.f32 %v6846_v57, %v1109_v63  ;;  %v1127_v9 = vmul.f32 %v6854_v58, %v1111_v31 }
 0x747   :  { %1185 = vrot.lane.b32.xlu0 %v1165_v22, %s6329_s1 }
 0x748   :  { %v1150_v29 = vpop.permute.xlu0 %1149  ;;  %1187 = vrot.lane.b32.xlu1 %v1166_v40, %s6329_s1 }
 0x749   :  { %v1167_v14 = vmul.f32 %v6854_v58, %v1150_v29  ;;  %v1152_v53 = vpop.permute.xlu1 %1151 }
 0x74a   :  { %v1168_v30 = vmul.f32 %v6859_v32, %v1152_v53  ;;  %v1126_v53 = vmul.f32 %v6851_v25, %v1110_v60 }
 0x74b   :  { %1189 = vrot.lane.b32.xlu0 %v1167_v14, %s6329_s1 }
 0x74c   :  { %1191 = vrot.lane.b32.xlu1 %v1168_v30, %s6329_s1 }
 0x7b1   :  { %v1178_v47 = vpop.permute.xlu0 %1177 }
 0x7b2   :  { %v6866_v34 = vadd.f32 %v1178_v47, %v1121_v37  ;;  %v1182_v49 = vpop.permute.xlu1 %1181  ;;  %v1112_v37 = vrot.slane %v6757_v44, 7 }
 0x7b3   :  { %v6874_v56 = vadd.f32 %v1182_v49, %v1123_v61 }
 0x7b4   :  { %5856 = vtanh.f32 %v6866_v34  ;;  %v1128_v45 = vmul.f32 %v6859_v32, %v1112_v37 }
 0x7b5   :  { %v1184_v12 = vpop.permute.xlu0 %1183  ;;  %5858 = vtanh.f32 %v6874_v56 }
 0x7b6   :  { %v6877_v33 = vadd.f32 %v1184_v12, %v1124_v19  ;;  %v1180_v24 = vpop.permute.xlu1 %1179 }
 0x7b7   :  { %v6885_v40 = vadd.f32 %v1180_v24, %v1122_v0 }
 0x7b8   :  { %5860 = vtanh.f32 %v6877_v33 }
 0x7b9   :  { %v1186_v29 = vpop.permute.xlu0 %1185  ;;  %5862 = vtanh.f32 %v6885_v40 }
 0x7ba   :  { %v6888_v14 = vadd.f32 %v1186_v29, %v1125_v51  ;;  %v1188_v30 = vpop.permute.xlu1 %1187 }
 0x7bb   :  { %v6895_v47 = vadd.f32 %v1188_v30, %v1126_v53 }
 0x7bc   :  { %5864 = vtanh.f32 %v6888_v14 }
 0x7bd   :  { %v1190_v36 = vpop.permute.xlu0 %1189  ;;  %5866 = vtanh.f32 %v6895_v47 }
 0x7be   :  { %v5857_v22 = vpop.eup %5856  ;;  %v6897_v52 = vadd.f32 %v1190_v36, %v1127_v9  ;;  %v1192_v15 = vpop.permute.xlu1 %1191 }
 0x7bf   :  { %1225 = vrot.lane.b32.xlu0 %v5857_v22, %s6328_s0  ;;  %v5859_v61 = vpop.eup %5858  ;;  %v6902_v49 = vadd.f32 %v1192_v15, %v1128_v45 }
 0x7c0   :  { %5868 = vtanh.f32 %v6897_v52  ;;  %1229 = vrot.lane.b32.xlu1 %v5859_v61, %s6328_s0 }
 0x7c1   :  { %5870 = vtanh.f32 %v6902_v49 }
 0x7c2   :  { %v5861_v19 = vpop.eup %5860 }
 0x7c3   :  { %1231 = vrot.lane.b32.xlu0 %v5861_v19, %s6328_s0  ;;  %v5863_v44 = vpop.eup %5862 }
 0x7c4   :  { %1227 = vrot.lane.b32.xlu1 %v5863_v44, %s6328_s0 }
 0x7c6   :  { %v5865_v23 = vpop.eup %5864 }
 0x7c7   :  { %1233 = vrot.lane.b32.xlu0 %v5865_v23, %s6328_s0  ;;  %v5867_v12 = vpop.eup %5866 }
 0x7c8   :  { %1235 = vrot.lane.b32.xlu1 %v5867_v12, %s6328_s0 }
 0x7ca   :  { %v5869_v63 = vpop.eup %5868 }
 0x7cb   :  { %1237 = vrot.lane.b32.xlu0 %v5869_v63, %s6328_s0  ;;  %v5871_v22 = vpop.eup %5870 }
 0x7cc   :  { %1239 = vrot.lane.b32.xlu1 %v5871_v22, %s6328_s0 }
 0x831   :  { %v1226_v0 = vpop.permute.xlu0 %1225 }
 0x832   :  { %v1230_v24 = vpop.permute.xlu1 %1229  ;;  %v6913_v60 = vmul.f32 %v6832_v48, %v1226_v0 }
 0x833   :  { %v6928_v48 = vmul.f32 %v6836_v46, %v1230_v24 }
 0x834   :  { %v1298_v37 = vrot.slane %v6913_v60, 2 }
 0x835   :  { %v1232_v51 = vpop.permute.xlu0 %1231 }
 0x836   :  { %v6916_v29 = vmul.f32 %v6838_v28, %v1232_v51  ;;  %v1228_v31 = vpop.permute.xlu1 %1227 }
 0x837   :  { %v6919_v53 = vmul.f32 %v6843_v50, %v1228_v31 }
 0x838   :  { %v1302_v45 = vrot.slane %v6916_v29, 7 }
 0x839   :  { %v1234_v30 = vpop.permute.xlu0 %1233  ;;  %v1299_v36 = vrot.slane %v6919_v53, 1 }
 0x83a   :  { %v6922_v9 = vmul.f32 %v6846_v57, %v1234_v30  ;;  %v1236_v15 = vpop.permute.xlu1 %1235 }
 0x83b   :  { %v1300_v61 = vsel %vm554_vm1, %v1299_v36, %v1298_v37  ;;  %v6933_v50 = vmul.f32 %v6851_v25, %v1236_v15 }
 0x83c   :  { %v1304_v28 = vrot.slane %v6922_v9, 6  ;;  %v1301_v57 = vsel %vm557_vm2, %v6928_v48, %v1300_v61 }
 0x83d   :  { %8040 = vst [vmem:[#allocation21_spill] sm:$0xff] %v6933_v50  ;;  %v1238_v19 = vpop.permute.xlu0 %1237  ;;  %v1303_v23 = vsel %vm560_vm3, %v1302_v45, %v1301_v57  ;;  %v1306_v46 = vrot.slane %v6933_v50, 5 }
 0x83e   :  { %v6938_v44 = vmul.f32 %v6854_v58, %v1238_v19  ;;  %v1305_v12 = vsel %vm563_vm4, %v1304_v28, %v1303_v23  ;;  %v1240_v63 = vpop.permute.xlu1 %1239 }
 0x83f   :  { %v6945_v0 = vmul.f32 %v6859_v32, %v1240_v63  ;;  %v1307_v25 = vsel %vm566_vm5, %v1306_v46, %v1305_v12 }
 0x840   :  { %8041 = vst [vmem:[#allocation22_spill] sm:$0xff] %v6938_v44  ;;  %v1308_v22 = vrot.slane %v6938_v44, 4 }
 0x841   :  { %8042 = vst [vmem:[#allocation23_spill] sm:$0xff] %v6945_v0  ;;  %v1310_v51 = vrot.slane %v6945_v0, 3 }
 0x842   :  { %v1309_v24 = vsel %vm569_vm6, %v1308_v22, %v1307_v25 }
 0x843   :  { %v1311_v58 = vsel %vm572_vm7, %v1310_v51, %v1309_v24 }
 0x844   :  { %1312 = vrot.lane.b32.xlu0 %v1311_v58, %s6329_s1 }
 0x8b6   :  { %v1313_v31 = vpop.permute.xlu0 %1312 }
 0x8b7   :  { %5374 = vmatmul.mubr.msk.f32.vlgmr.msra.gmra.mrb[4].mxu1 %vm222_vm8, %v1313_v31 }
 0x8b8   :  { %5612 = vmatpush3.bf16.msra.mxu1 %v6466_v7  ;;  %5395 = vmatprep.mubr.msk.f32.mxu1 %vm6324_vm0, %v8007_v2 }
 0x8b9   :  { %5613 = vmatprep.subr.bf16.mxu1 %v8005_v1 }
 0x8bc   :  { %5615 = vmatpush3.bf16.msra.mxu1 %v6478_v11 }
 0x8bd   :  { %5622 = vmatprep.subr.bf16.mxu1 %v8005_v1 }
 0x98a   :  { %v1382_v32 = vpop.f32.mrb[4].mxu1 }
 0x98b   :  { %v5375_v30 = vpop.f32.mrb[5].mxu1  ;;  %v1388_v37 = vrot.slane %v1382_v32, 6  ;;  %v1390_v36 = vrot.slane %v1382_v32, 1  ;;  %v1387_v15 = vrot.slane %v1382_v32, 5  ;;  %v1405_v28 = vadd.f32 %v1382_v32, %v6532_v10 }
 0x98c   :  { %v1391_v61 = vrot.slane %v1382_v32, 2  ;;  %v1389_v57 = vrot.slane %v1382_v32, 7  ;;  %v1393_v46 = vrot.slane %v1382_v32, 4  ;;  %v1392_v63 = vrot.slane %v1382_v32, 3 }
 0x98d   :  { %v1403_v45 = vadd.f32 %v1388_v37, %v6524_v55  ;;  %v1406_v19 = vadd.f32 %v1390_v36, %v6530_v8  ;;  %v1402_v23 = vadd.f32 %v1387_v15, %v6518_v39 }
 0x98e   :  { %v1407_v12 = vadd.f32 %v1391_v61, %v6539_v21  ;;  %v1404_v22 = vadd.f32 %v1389_v57, %v6526_v59  ;;  %v1409_v25 = vadd.f32 %v1393_v46, %v6543_v26  ;;  %v1408_v51 = vadd.f32 %v1392_v63, %v6536_v20 }
 0x98f   :  { %5872 = vtanh.f32 %v1403_v45  ;;  %v5107_v61 = vmul.f32 -1.442695, %v1403_v45  ;;  %v5109_v57 = vmul.f32 -1.442695, %v1405_v28  ;;  %v5110_v46 = vmul.f32 -1.442695, %v1406_v19 }
 0x990   :  { %5874 = vtanh.f32 %v1405_v28  ;;  %v5106_v63 = vmul.f32 -1.442695, %v1402_v23 }
 0x991   :  { %5876 = vtanh.f32 %v1406_v19 }
 0x992   :  { %5878 = vtanh.f32 %v1402_v23 }
 0x993   :  { %5880 = vtanh.f32 %v1407_v12 }
 0x994   :  { %5882 = vtanh.f32 %v1404_v22 }
 0x995   :  { %5884 = vtanh.f32 %v1409_v25 }
 0x996   :  { %5886 = vtanh.f32 %v1408_v51 }
 0x997   :  { %5888 = vpow2.f32 %v5107_v61 }
 0x998   :  { %5890 = vpow2.f32 %v5109_v57 }
 0x999   :  { %v5873_v24 = vpop.eup %5872  ;;  %5892 = vpow2.f32 %v5110_v46 }
 0x99a   :  { %1508 = vrot.lane.b32.xlu0 %v5873_v24, %s6328_s0  ;;  %v5875_v58 = vpop.eup %5874  ;;  %v5111_v24 = vmul.f32 -1.442695, %v1407_v12  ;;  %5894 = vpow2.f32 %v5106_v63 }
 0x99b   :  { %1512 = vrot.lane.b32.xlu1 %v5875_v58, %s6328_s0  ;;  %v5877_v31 = vpop.eup %5876  ;;  %v5108_v58 = vmul.f32 -1.442695, %v1404_v22 }
 0x99c   :  { %v5879_v32 = vpop.eup %5878  ;;  %5896 = vpow2.f32 %v5111_v24 }
 0x99d   :  { %v5881_v30 = vpop.eup %5880  ;;  %5898 = vpow2.f32 %v5108_v58 }
 0x99e   :  { %1514 = vrot.lane.b32.xlu0 %v5877_v31, %s6328_s0  ;;  %v5883_v37 = vpop.eup %5882  ;;  %v5113_v31 = vmul.f32 -1.442695, %v1409_v25 }
 0x99f   :  { %1506 = vrot.lane.b32.xlu1 %v5879_v32, %s6328_s0  ;;  %v5885_v36 = vpop.eup %5884 }
 0x9a0   :  { %v5887_v15 = vpop.eup %5886  ;;  %5900 = vpow2.f32 %v5113_v31 }
 0x9a1   :  { %v5889_v32 = vpop.eup %5888 }
 0x9a2   :  { %1516 = vrot.lane.b32.xlu0 %v5881_v30, %s6328_s0  ;;  %v5112_v30 = vmul.f32 -1.442695, %v1408_v51 }
 0x9a3   :  { %1510 = vrot.lane.b32.xlu1 %v5883_v37, %s6328_s0  ;;  %v5891_v37 = vpop.eup %5890 }
 0x9a4   :  { %v5893_v1 = vpop.eup %5892  ;;  %5902 = vpow2.f32 %v5112_v30  ;;  %v1437_v45 = vadd.f32 1.0, %v5891_v37 }
 0x9a5   :  { %v5895_v28 = vpop.eup %5894  ;;  %v1438_v19 = vadd.f32 1.0, %v5893_v1 }
 0x9a6   :  { %1520 = vrot.lane.b32.xlu0 %v5885_v36, %s6328_s0  ;;  %v1435_v36 = vadd.f32 1.0, %v5889_v32  ;;  %v5897_v23 = vpop.eup %5896 }
 0x9a7   :  { %1518 = vrot.lane.b32.xlu1 %v5887_v15, %s6328_s0  ;;  %v1434_v15 = vadd.f32 1.0, %v5895_v28  ;;  %v5899_v12 = vpop.eup %5898  ;;  %v1439_v22 = vadd.f32 1.0, %v5897_v23 }
 0x9a8   :  { %5904 = vrcp.f32 %v1435_v36  ;;  %v1436_v25 = vadd.f32 1.0, %v5899_v12 }
 0x9a9   :  { %5906 = vrcp.f32 %v1437_v45 }
 0x9aa   :  { %5908 = vrcp.f32 %v1438_v19  ;;  %v5901_v61 = vpop.eup %5900 }
 0x9ab   :  { %5910 = vrcp.f32 %v1434_v15  ;;  %v1441_v51 = vadd.f32 1.0, %v5901_v61 }
 0x9ac   :  { %5912 = vrcp.f32 %v1439_v22 }
 0x9ad   :  { %5914 = vrcp.f32 %v1436_v25 }
 0x9ae   :  { %v5903_v57 = vpop.eup %5902  ;;  %5916 = vrcp.f32 %v1441_v51 }
 0x9af   :  { %v1440_v24 = vadd.f32 1.0, %v5903_v57 }
 0x9b1   :  { %5918 = vrcp.f32 %v1440_v24 }
 0x9b2   :  { %v6975_v46 = vpop.eup %5904 }
 0x9b3   :  { %v6978_v1 = vpop.eup %5906 }
 0x9b4   :  { %v6982_v30 = vpop.eup %5908 }
 0x9b5   :  { %v6986_v45 = vpop.eup %5910 }
 0x9b6   :  { %v6990_v23 = vpop.eup %5912 }
 0x9b7   :  { %v6994_v22 = vpop.eup %5914 }
 0x9b8   :  { %v6998_v57 = vpop.eup %5916 }
 0x9bb   :  { %v7002_v24 = vpop.eup %5918 }
 0xa0c   :  { %v1509_v63 = vpop.permute.xlu0 %1508 }
 0xa0d   :  { %v1531_v58 = vmul.f32 %v6975_v46, %v1509_v63  ;;  %v1513_v31 = vpop.permute.xlu1 %1512 }
 0xa0e   :  { %v1533_v32 = vmul.f32 %v6978_v1, %v1513_v31 }
 0xa0f   :  { %1548 = vrot.lane.b32.xlu0 %v1531_v58, %s6329_s1 }
 0xa10   :  { %v1515_v37 = vpop.permute.xlu0 %1514  ;;  %1552 = vrot.lane.b32.xlu1 %v1533_v32, %s6329_s1  ;;  %v1475_v32 = vrot.slane %v6885_v40, 7 }
 0xa11   :  { %v1534_v36 = vmul.f32 %v6982_v30, %v1515_v37  ;;  %v1507_v28 = vpop.permute.xlu1 %1506  ;;  %v1477_v37 = vrot.slane %v6877_v33, 7  ;;  %v1479_v33 = vrot.slane %v6895_v47, 7 }
 0xa12   :  { %v1530_v19 = vmul.f32 %v6986_v45, %v1507_v28 }
 0xa13   :  { %1554 = vrot.lane.b32.xlu0 %v1534_v36, %s6329_s1  ;;  %v1491_v36 = vmul.f32 %v6975_v46, %v1475_v32  ;;  %v1476_v32 = vrot.slane %v6874_v56, 7 }
 0xa14   :  { %v1517_v15 = vpop.permute.xlu0 %1516  ;;  %1546 = vrot.lane.b32.xlu1 %v1530_v19, %s6329_s1  ;;  %v1478_v19 = vrot.slane %v6888_v14, 7 }
 0xa15   :  { %v1535_v12 = vmul.f32 %v6990_v23, %v1517_v15  ;;  %v1511_v61 = vpop.permute.xlu1 %1510  ;;  %v1493_v15 = vmul.f32 %v6978_v1, %v1477_v37  ;;  %v1492_v47 = vmul.f32 %v6994_v22, %v1476_v32 }
 0xa16   :  { %v1532_v25 = vmul.f32 %v6994_v22, %v1511_v61  ;;  %v1494_v40 = vmul.f32 %v6982_v30, %v1478_v19 }
 0xa17   :  { %1556 = vrot.lane.b32.xlu0 %v1535_v12, %s6329_s1 }
 0xa18   :  { %v1521_v51 = vpop.permute.xlu0 %1520  ;;  %1550 = vrot.lane.b32.xlu1 %v1532_v25, %s6329_s1  ;;  %v1474_v25 = vrot.slane %v6866_v34, 7  ;;  %v1495_v34 = vmul.f32 %v6990_v23, %v1479_v33 }
 0xa19   :  { %v1537_v63 = vmul.f32 %v6998_v57, %v1521_v51  ;;  %v1519_v58 = vpop.permute.xlu1 %1518 }
 0xa1a   :  { %v1536_v31 = vmul.f32 %v7002_v24, %v1519_v58  ;;  %v1490_v14 = vmul.f32 %v6986_v45, %v1474_v25 }
 0xa1b   :  { %1560 = vrot.lane.b32.xlu0 %v1537_v63, %s6329_s1 }
 0xa1c   :  { %1558 = vrot.lane.b32.xlu1 %v1536_v31, %s6329_s1 }
 0xa81   :  { %v1549_v28 = vpop.permute.xlu0 %1548 }
 0xa82   :  { %v7012_v12 = vadd.f32 %v1549_v28, %v1491_v36  ;;  %v1553_v61 = vpop.permute.xlu1 %1552  ;;  %v1481_v28 = vrot.slane %v6902_v49, 7 }
 0xa83   :  { %v7015_v51 = vadd.f32 %v1553_v61, %v1493_v15  ;;  %v1480_v61 = vrot.slane %v6897_v52, 7 }
 0xa84   :  { %5920 = vtanh.f32 %v7012_v12  ;;  %v1497_v56 = vmul.f32 %v6998_v57, %v1481_v28 }
 0xa85   :  { %v1555_v63 = vpop.permute.xlu0 %1554  ;;  %5922 = vtanh.f32 %v7015_v51  ;;  %v1496_v49 = vmul.f32 %v7002_v24, %v1480_v61 }
 0xa86   :  { %v7022_v58 = vadd.f32 %v1555_v63, %v1494_v40  ;;  %v1547_v31 = vpop.permute.xlu1 %1546 }
 0xa87   :  { %v7025_v37 = vadd.f32 %v1547_v31, %v1490_v14 }
 0xa88   :  { %5924 = vtanh.f32 %v7022_v58 }
 0xa89   :  { %v1557_v36 = vpop.permute.xlu0 %1556  ;;  %5926 = vtanh.f32 %v7025_v37 }
 0xa8a   :  { %v7032_v19 = vadd.f32 %v1557_v36, %v1495_v34  ;;  %v1551_v15 = vpop.permute.xlu1 %1550 }
 0xa8b   :  { %v7035_v25 = vadd.f32 %v1551_v15, %v1492_v47 }
 0xa8c   :  { %5928 = vtanh.f32 %v7032_v19 }
 0xa8d   :  { %v1561_v40 = vpop.permute.xlu0 %1560  ;;  %5930 = vtanh.f32 %v7035_v25 }
 0xa8e   :  { %v5921_v63 = vpop.eup %5920  ;;  %v7041_v33 = vadd.f32 %v1561_v40, %v1497_v56  ;;  %v1559_v14 = vpop.permute.xlu1 %1558 }
 0xa8f   :  { %1596 = vrot.lane.b32.xlu0 %v5921_v63, %s6328_s0  ;;  %v5923_v31 = vpop.eup %5922  ;;  %v7044_v32 = vadd.f32 %v1559_v14, %v1496_v49 }
 0xa90   :  { %5932 = vtanh.f32 %v7041_v33  ;;  %1600 = vrot.lane.b32.xlu1 %v5923_v31, %s6328_s0 }
 0xa91   :  { %5934 = vtanh.f32 %v7044_v32 }
 0xa92   :  { %v5925_v52 = vpop.eup %5924 }
 0xa93   :  { %1602 = vrot.lane.b32.xlu0 %v5925_v52, %s6328_s0  ;;  %v5927_v34 = vpop.eup %5926 }
 0xa94   :  { %1594 = vrot.lane.b32.xlu1 %v5927_v34, %s6328_s0 }
 0xa96   :  { %v5929_v36 = vpop.eup %5928 }
 0xa97   :  { %1604 = vrot.lane.b32.xlu0 %v5929_v36, %s6328_s0  ;;  %v5931_v28 = vpop.eup %5930 }
 0xa98   :  { %1598 = vrot.lane.b32.xlu1 %v5931_v28, %s6328_s0 }
 0xa9a   :  { %v5933_v47 = vpop.eup %5932 }
 0xa9b   :  { %1608 = vrot.lane.b32.xlu0 %v5933_v47, %s6328_s0  ;;  %v5935_v15 = vpop.eup %5934 }
 0xa9c   :  { %1606 = vrot.lane.b32.xlu1 %v5935_v15, %s6328_s0 }
 0xb01   :  { %v1597_v61 = vpop.permute.xlu0 %1596 }
 0xb02   :  { %v1601_v56 = vpop.permute.xlu1 %1600  ;;  %v7059_v14 = vmul.f32 %v6975_v46, %v1597_v61 }
 0xb03   :  { %v7077_v61 = vmul.f32 %v6978_v1, %v1601_v56 }
 0xb04   :  { %v1668_v15 = vrot.slane %v7059_v14, 2 }
 0xb05   :  { %v1603_v40 = vpop.permute.xlu0 %1602 }
 0xb06   :  { %v1595_v63 = vpop.permute.xlu1 %1594  ;;  %v7066_v28 = vmul.f32 %v6982_v30, %v1603_v40 }
 0xb07   :  { %v7056_v49 = vmul.f32 %v6986_v45, %v1595_v63 }
 0xb08   :  { %8044 = vst [vmem:[#allocation25_spill] sm:$0xff] %v7066_v28  ;;  %v1673_v40 = vrot.slane %v7066_v28, 7 }
 0xb09   :  { %v1605_v31 = vpop.permute.xlu0 %1604  ;;  %v1667_v52 = vrot.slane %v7056_v49, 3 }
 0xb0a   :  { %v1599_v34 = vpop.permute.xlu1 %1598  ;;  %v7063_v36 = vmul.f32 %v6990_v23, %v1605_v31 }
 0xb0b   :  { %v7069_v47 = vmul.f32 %v6994_v22, %v1599_v34  ;;  %v1669_v23 = vsel %vm554_vm1, %v1668_v15, %v1667_v52 }
 0xb0c   :  { %8043 = vst [vmem:[#allocation24_spill] sm:$0xff] %v7063_v36  ;;  %v1675_v31 = vrot.slane %v7063_v36, 6 }
 0xb0d   :  { %v1609_v45 = vpop.permute.xlu0 %1608  ;;  %v1670_v63 = vrot.slane %v7069_v47, 1 }
 0xb0e   :  { %v7074_v46 = vmul.f32 %v6998_v57, %v1609_v45  ;;  %v1607_v30 = vpop.permute.xlu1 %1606 }
 0xb0f   :  { %v1671_v22 = vsel %vm557_vm2, %v1670_v63, %v1669_v23  ;;  %v7084_v34 = vmul.f32 %v7002_v24, %v1607_v30  ;;  %v8047_v24 = vmov 0.0   ;;  %v8048_v23 = vmov 0.0|0.0  }
 0xb10   :  { %8045 = vst [vmem:[#allocation26_spill] sm:$0xff] %v7074_v46  ;;  %v1672_v2 = vsel %vm560_vm3, %v7077_v61, %v1671_v22  ;;  %v1679_v57 = vrot.slane %v7074_v46, 4 }
 0xb11   :  { %8046 = vst [vmem:[#allocation27_spill] sm:$0xff] %v7084_v34  ;;  %v1677_v1 = vrot.slane %v7084_v34, 5  ;;  %v1674_v56 = vsel %vm563_vm4, %v1673_v40, %v1672_v2 }
 0xb12   :  { %v1676_v52 = vsel %vm566_vm5, %v1675_v31, %v1674_v56 }
 0xb13   :  { %v1678_v15 = vsel %vm569_vm6, %v1677_v1, %v1676_v52 }
 0xb14   :  { %v1680_v45 = vsel %vm572_vm7, %v1679_v57, %v1678_v15 }
 0xb15   :  { %1681 = vrot.lane.b32.xlu1 %v1680_v45, %s6329_s1 }
 0xb87   :  { %v1682_v63 = vpop.permute.xlu1 %1681 }
 0xb88   :  { %5385 = vmatmul.mubr.msk.f32.vlgmr.msra.gmra.mrb[2].mxu0 %vm222_vm8, %v1682_v63 }
 0xb89   :  { %5618 = vmatpush3.bf16.msra.mxu0 %v6466_v7  ;;  %5406 = vmatprep.mubr.msk.f32.mxu0 %vm6324_vm0, %v8047_v24 }
 0xb8a   :  { %5619 = vmatprep.subr.bf16.mxu0 %v8048_v23 }
 0xb8d   :  { %5621 = vmatpush3.bf16.msra.mxu0 %v6478_v11 }
 0xc5b   :  { %v1751_v2 = vpop.f32.mrb[2].mxu0 }
 0xc5c   :  { %v1756_v31 = vrot.slane %v1751_v2, 4  ;;  %v5386_v30 = vpop.f32.mrb[3].mxu0  ;;  %v1758_v22 = vrot.slane %v1751_v2, 6  ;;  %v1760_v57 = vrot.slane %v1751_v2, 1  ;;  %v1757_v56 = vrot.slane %v1751_v2, 5 }
 0xc5d   :  { %v1775_v52 = vadd.f32 %v1751_v2, %v6530_v8  ;;  %v1761_v45 = vrot.slane %v1751_v2, 2  ;;  %v1759_v46 = vrot.slane %v1751_v2, 7  ;;  %v1762_v42 = vrot.slane %v1751_v2, 3 }
 0xc5e   :  { %v1771_v40 = vadd.f32 %v1756_v31, %v6518_v39  ;;  %v1773_v1 = vadd.f32 %v1758_v22, %v6526_v59  ;;  %v1776_v63 = vadd.f32 %v1760_v57, %v6539_v21  ;;  %v1772_v30 = vadd.f32 %v1757_v56, %v6524_v55 }
 0xc5f   :  { %v1777_v31 = vadd.f32 %v1761_v45, %v6536_v20  ;;  %v1774_v22 = vadd.f32 %v1759_v46, %v6532_v10  ;;  %v1778_v43 = vadd.f32 %v1762_v42, %v6543_v26 }
 0xc60   :  { %5936 = vtanh.f32 %v1771_v40  ;;  %v5117_v45 = vmul.f32 -1.442695, %v1773_v1  ;;  %v5120_v41 = vmul.f32 -1.442695, %v1776_v63 }
 0xc61   :  { %5938 = vtanh.f32 %v1773_v1  ;;  %v5122_v36 = vmul.f32 -1.442695, %v1778_v43 }
 0xc62   :  { %5940 = vtanh.f32 %v1775_v52 }
 0xc63   :  { %5942 = vtanh.f32 %v1776_v63 }
 0xc64   :  { %5944 = vtanh.f32 %v1772_v30 }
 0xc65   :  { %5946 = vtanh.f32 %v1777_v31 }
 0xc66   :  { %5948 = vtanh.f32 %v1774_v22 }
 0xc67   :  { %5950 = vtanh.f32 %v1778_v43 }
 0xc6a   :  { %v5937_v15 = vpop.eup %5936 }
 0xc6b   :  { %1875 = vrot.lane.b32.xlu0 %v5937_v15, %s6328_s0  ;;  %v5939_v0 = vpop.eup %5938 }
 0xc6c   :  { %v5941_v57 = vpop.eup %5940 }
 0xc6d   :  { %1883 = vrot.lane.b32.xlu1 %v5941_v57, %s6328_s0  ;;  %v5943_v15 = vpop.eup %5942  ;;  %v5119_v57 = vmul.f32 -1.442695, %v1775_v52 }
 0xc6e   :  { %v5945_v56 = vpop.eup %5944 }
 0xc6f   :  { %1879 = vrot.lane.b32.xlu0 %v5939_v0, %s6328_s0  ;;  %v5947_v2 = vpop.eup %5946  ;;  %v5115_v0 = vmul.f32 -1.442695, %v1771_v40 }
 0xc70   :  { %v5949_v46 = vpop.eup %5948 }
 0xc71   :  { %1877 = vrot.lane.b32.xlu1 %v5945_v56, %s6328_s0  ;;  %v5951_v42 = vpop.eup %5950  ;;  %5952 = vpow2.f32 %v5115_v0  ;;  %v5121_v56 = vmul.f32 -1.442695, %v1777_v31 }
 0xc72   :  { %5954 = vpow2.f32 %v5117_v45 }
 0xc73   :  { %1885 = vrot.lane.b32.xlu0 %v5943_v15, %s6328_s0  ;;  %v5116_v15 = vmul.f32 -1.442695, %v1772_v30  ;;  %5956 = vpow2.f32 %v5119_v57 }
 0xc74   :  { %5958 = vpow2.f32 %v5120_v41 }
 0xc75   :  { %1881 = vrot.lane.b32.xlu1 %v5949_v46, %s6328_s0  ;;  %5960 = vpow2.f32 %v5116_v15 }
 0xc77   :  { %1887 = vrot.lane.b32.xlu0 %v5947_v2, %s6328_s0  ;;  %v5118_v2 = vmul.f32 -1.442695, %v1774_v22 }
 0xc79   :  { %1889 = vrot.lane.b32.xlu1 %v5951_v42, %s6328_s0 }
 0xc7b   :  { %v5953_v34 = vpop.eup %5952 }
 0xc7c   :  { %v1803_v44 = vadd.f32 1.0, %v5953_v34  ;;  %v5955_v46 = vpop.eup %5954 }
 0xc7d   :  { %v5957_v42 = vpop.eup %5956  ;;  %v1805_v40 = vadd.f32 1.0, %v5955_v46 }
 0xc7e   :  { %5962 = vrcp.f32 %v1803_v44  ;;  %v5959_v0 = vpop.eup %5958  ;;  %v1807_v1 = vadd.f32 1.0, %v5957_v42 }
 0xc7f   :  { %5964 = vpow2.f32 %v5121_v56  ;;  %v5961_v52 = vpop.eup %5960  ;;  %v1808_v34 = vadd.f32 1.0, %v5959_v0 }
 0xc80   :  { %5966 = vpow2.f32 %v5118_v2  ;;  %v1804_v44 = vadd.f32 1.0, %v5961_v52 }
 0xc81   :  { %5968 = vpow2.f32 %v5122_v36 }
 0xc82   :  { %5970 = vrcp.f32 %v1805_v40 }
 0xc83   :  { %5972 = vrcp.f32 %v1807_v1 }
 0xc84   :  { %5974 = vrcp.f32 %v1808_v34 }
 0xc85   :  { %5976 = vrcp.f32 %v1804_v44 }
 0xc88   :  { %v7117_v45 = vpop.eup %5962 }
 0xc89   :  { %v5965_v41 = vpop.eup %5964 }
 0xc8a   :  { %v5967_v31 = vpop.eup %5966  ;;  %v1809_v43 = vadd.f32 1.0, %v5965_v41 }
 0xc8b   :  { %v1806_v22 = vadd.f32 1.0, %v5967_v31  ;;  %v5969_v36 = vpop.eup %5968 }
 0xc8c   :  { %5978 = vrcp.f32 %v1809_v43  ;;  %v7121_v57 = vpop.eup %5970  ;;  %v1810_v56 = vadd.f32 1.0, %v5969_v36 }
 0xc8d   :  { %5980 = vrcp.f32 %v1806_v22  ;;  %v7124_v46 = vpop.eup %5972 }
 0xc8e   :  { %v7128_v0 = vpop.eup %5974  ;;  %5982 = vrcp.f32 %v1810_v56 }
 0xcdd   :  { %v1876_v63 = vpop.permute.xlu0 %1875 }
 0xcde   :  { %v1899_v30 = vmul.f32 %v7117_v45, %v1876_v63  ;;  %v7132_v63 = vpop.eup %5976 }
 0xcdf   :  { %v1884_v42 = vpop.permute.xlu1 %1883 }
 0xce0   :  { %1915 = vrot.lane.b32.xlu0 %v1899_v30, %s6329_s1  ;;  %v1903_v40 = vmul.f32 %v7124_v46, %v1884_v42  ;;  %v7136_v30 = vpop.eup %5978  ;;  %v1843_v42 = vrot.slane %v7025_v37, 7 }
 0xce1   :  { %v1880_v15 = vpop.permute.xlu0 %1879  ;;  %v7140_v43 = vpop.eup %5980 }
 0xce2   :  { %v1901_v2 = vmul.f32 %v7121_v57, %v1880_v15  ;;  %1923 = vrot.lane.b32.xlu1 %v1903_v40, %s6329_s1  ;;  %v7145_v15 = vpop.eup %5982  ;;  %v1859_v40 = vmul.f32 %v7117_v45, %v1843_v42  ;;  %v1844_v42 = vrot.slane %v7012_v12, 7  ;;  %v1846_v12 = vrot.slane %v7015_v51, 7 }
 0xce3   :  { %v1878_v34 = vpop.permute.xlu1 %1877 }
 0xce4   :  { %1919 = vrot.lane.b32.xlu0 %v1901_v2, %s6329_s1  ;;  %v1900_v41 = vmul.f32 %v7132_v63, %v1878_v34  ;;  %v1845_v34 = vrot.slane %v7035_v25, 7 }
 0xce5   :  { %v1886_v1 = vpop.permute.xlu0 %1885 }
 0xce6   :  { %v1904_v52 = vmul.f32 %v7128_v0, %v1886_v1  ;;  %1917 = vrot.lane.b32.xlu1 %v1900_v41, %s6329_s1  ;;  %v1847_v41 = vrot.slane %v7022_v58, 7 }
 0xce7   :  { %v1882_v22 = vpop.permute.xlu1 %1881 }
 0xce8   :  { %1925 = vrot.lane.b32.xlu0 %v1904_v52, %s6329_s1  ;;  %v1902_v36 = vmul.f32 %v7140_v43, %v1882_v22  ;;  %v1848_v22 = vrot.slane %v7032_v19, 7  ;;  %v1860_v19 = vmul.f32 %v7132_v63, %v1844_v42 }
 0xce9   :  { %v1888_v44 = vpop.permute.xlu0 %1887 }
 0xcea   :  { %v1905_v31 = vmul.f32 %v7136_v30, %v1888_v44  ;;  %1921 = vrot.lane.b32.xlu1 %v1902_v36, %s6329_s1  ;;  %v1861_v44 = vmul.f32 %v7121_v57, %v1845_v34  ;;  %v1863_v36 = vmul.f32 %v7124_v46, %v1847_v41  ;;  %v1864_v25 = vmul.f32 %v7128_v0, %v1848_v22 }
 0xceb   :  { %v1890_v56 = vpop.permute.xlu1 %1889 }
 0xcec   :  { %1927 = vrot.lane.b32.xlu0 %v1905_v31, %s6329_s1  ;;  %v1906_v2 = vmul.f32 %v7145_v15, %v1890_v56 }
 0xcee   :  { %1929 = vrot.lane.b32.xlu1 %v1906_v2, %s6329_s1 }
 0xd52   :  { %v1916_v1 = vpop.permute.xlu0 %1915 }
 0xd53   :  { %v7151_v52 = vadd.f32 %v1916_v1, %v1859_v40  ;;  %v1849_v1 = vrot.slane %v7044_v32, 7  ;;  %v1862_v32 = vmul.f32 %v7140_v43, %v1846_v12 }
 0xd54   :  { %v1924_v37 = vpop.permute.xlu1 %1923 }
 0xd55   :  { %5984 = vtanh.f32 %v7151_v52  ;;  %v7162_v40 = vadd.f32 %v1924_v37, %v1863_v36 }
 0xd56   :  { %v1920_v31 = vpop.permute.xlu0 %1919 }
 0xd57   :  { %v7159_v56 = vadd.f32 %v1920_v31, %v1861_v44  ;;  %v1865_v31 = vmul.f32 %v7136_v30, %v1849_v1 }
 0xd58   :  { %v1918_v41 = vpop.permute.xlu1 %1917 }
 0xd59   :  { %5986 = vtanh.f32 %v7159_v56  ;;  %v7173_v44 = vadd.f32 %v1918_v41, %v1860_v19 }
 0xd5a   :  { %v1926_v58 = vpop.permute.xlu0 %1925  ;;  %5988 = vtanh.f32 %v7162_v40 }
 0xd5b   :  { %v7170_v34 = vadd.f32 %v1926_v58, %v1864_v25 }
 0xd5c   :  { %v1922_v37 = vpop.permute.xlu1 %1921 }
 0xd5d   :  { %5990 = vtanh.f32 %v7170_v34  ;;  %v7182_v42 = vadd.f32 %v1922_v37, %v1862_v32 }
 0xd5e   :  { %v1928_v22 = vpop.permute.xlu0 %1927  ;;  %5992 = vtanh.f32 %v7173_v44 }
 0xd5f   :  { %v5985_v2 = vpop.eup %5984  ;;  %v7179_v36 = vadd.f32 %v1928_v22, %v1865_v31 }
 0xd60   :  { %1963 = vrot.lane.b32.xlu0 %v5985_v2, %s6328_s0  ;;  %v1850_v2 = vrot.slane %v7041_v33, 7  ;;  %v1930_v58 = vpop.permute.xlu1 %1929 }
 0xd61   :  { %5994 = vtanh.f32 %v7179_v36 }
 0xd62   :  { %5996 = vtanh.f32 %v7182_v42  ;;  %v1866_v25 = vmul.f32 %v7145_v15, %v1850_v2 }
 0xd63   :  { %v5987_v51 = vpop.eup %5986 }
 0xd64   :  { %1967 = vrot.lane.b32.xlu0 %v5987_v51, %s6328_s0  ;;  %v5989_v1 = vpop.eup %5988  ;;  %v7188_v19 = vadd.f32 %v1930_v58, %v1866_v25 }
 0xd65   :  { %1971 = vrot.lane.b32.xlu1 %v5989_v1, %s6328_s0 }
 0xd66   :  { %5998 = vtanh.f32 %v7188_v19 }
 0xd67   :  { %v5991_v41 = vpop.eup %5990 }
 0xd68   :  { %1973 = vrot.lane.b32.xlu0 %v5991_v41, %s6328_s0  ;;  %v5993_v33 = vpop.eup %5992 }
 0xd69   :  { %1965 = vrot.lane.b32.xlu1 %v5993_v33, %s6328_s0 }
 0xd6b   :  { %v5995_v12 = vpop.eup %5994 }
 0xd6c   :  { %1975 = vrot.lane.b32.xlu0 %v5995_v12, %s6328_s0  ;;  %v5997_v31 = vpop.eup %5996 }
 0xd6d   :  { %1969 = vrot.lane.b32.xlu1 %v5997_v31, %s6328_s0 }
 0xd70   :  { %v5999_v22 = vpop.eup %5998 }
 0xd71   :  { %1977 = vrot.lane.b32.xlu1 %v5999_v22, %s6328_s0 }
 0xdd2   :  { %v1964_v32 = vpop.permute.xlu0 %1963 }
 0xdd3   :  { %v7201_v58 = vmul.f32 %v7117_v45, %v1964_v32 }
 0xdd5   :  { %v2036_v31 = vrot.slane %v7201_v58, 4 }
 0xdd6   :  { %v1968_v37 = vpop.permute.xlu0 %1967 }
 0xdd7   :  { %v1972_v2 = vpop.permute.xlu1 %1971  ;;  %v7198_v51 = vmul.f32 %v7121_v57, %v1968_v37 }
 0xdd8   :  { %v7223_v28 = vmul.f32 %v7124_v46, %v1972_v2 }
 0xdd9   :  { %v2039_v33 = vrot.slane %v7198_v51, 2 }
 0xdda   :  { %v1974_v25 = vpop.permute.xlu0 %1973  ;;  %8051 = vst [vmem:[#allocation30_spill] sm:$0xff] %v7223_v28 }
 0xddb   :  { %v1966_v1 = vpop.permute.xlu1 %1965  ;;  %v7210_v35 = vmul.f32 %v7128_v0, %v1974_v25 }
 0xddc   :  { %v7204_v41 = vmul.f32 %v7132_v63, %v1966_v1 }
 0xddd   :  { %8049 = vst [vmem:[#allocation28_spill] sm:$0xff] %v7210_v35  ;;  %v2044_v54 = vrot.slane %v7210_v35, 7 }
 0xdde   :  { %v1976_v12 = vpop.permute.xlu0 %1975  ;;  %v2037_v22 = vrot.slane %v7204_v41, 3 }
 0xddf   :  { %v1970_v57 = vpop.permute.xlu1 %1969  ;;  %v7213_v37 = vmul.f32 %v7136_v30, %v1976_v12 }
 0xde0   :  { %v2038_v45 = vsel %vm554_vm1, %v2037_v22, %v2036_v31  ;;  %v7217_v32 = vmul.f32 %v7140_v43, %v1970_v57 }
 0xde1   :  { %8050 = vst [vmem:[#allocation29_spill] sm:$0xff] %v7213_v37  ;;  %v2040_v63 = vsel %vm557_vm2, %v2039_v33, %v2038_v45  ;;  %v2046_v25 = vrot.slane %v7213_v37, 6 }
 0xde2   :  { %v2041_v1 = vrot.slane %v7217_v32, 1 }
 0xde3   :  { %v1978_v0 = vpop.permute.xlu1 %1977 }
 0xde4   :  { %v2042_v30 = vsel %vm560_vm3, %v2041_v1, %v2040_v63  ;;  %v7228_v12 = vmul.f32 %v7145_v15, %v1978_v0 }
 0xde5   :  { %v2043_v43 = vsel %vm563_vm4, %v7223_v28, %v2042_v30 }
 0xde6   :  { %8052 = vst [vmem:[#allocation31_spill] sm:$0xff] %v7228_v12  ;;  %v2048_v33 = vrot.slane %v7228_v12, 5  ;;  %v2045_v31 = vsel %vm566_vm5, %v2044_v54, %v2043_v43 }
 0xde7   :  { %v2047_v22 = vsel %vm569_vm6, %v2046_v25, %v2045_v31 }
 0xde8   :  { %v2049_v46 = vsel %vm572_vm7, %v2048_v33, %v2047_v22 }
 0xde9   :  { %2050 = vrot.lane.b32.xlu0 %v2049_v46, %s6329_s1 }
 0xe5b   :  { %v2051_v2 = vpop.permute.xlu0 %2050 }
 0xe5c   :  { %5396 = vmatmul.mubr.msk.f32.vlgmr.msra.gmra.mrb[6].mxu1 %vm222_vm8, %v2051_v2 }
 0xe5d   :  { %5624 = vmatpush3.bf16.msra.mxu1 %v6466_v7  ;;  %5417 = vmatprep.mubr.msk.f32.mxu1 %vm6324_vm0, %v8047_v24 }
 0xe5e   :  { %5625 = vmatprep.subr.bf16.mxu1 %v8048_v23 }
 0xe61   :  { %5627 = vmatpush3.bf16.msra.mxu1 %v6478_v11 }
 0xf2f   :  { %v2120_v15 = vpop.f32.mrb[6].mxu1 }
 0xf30   :  { %v2125_v54 = vrot.slane %v2120_v15, 3  ;;  %v5397_v57 = vpop.f32.mrb[7].mxu1  ;;  %v2126_v63 = vrot.slane %v2120_v15, 4  ;;  %v2127_v1 = vrot.slane %v2120_v15, 5  ;;  %v2128_v0 = vrot.slane %v2120_v15, 6 }
 0xf31   :  { %v2129_v30 = vrot.slane %v2120_v15, 7  ;;  %v2130_v43 = vrot.slane %v2120_v15, 1  ;;  %v2131_v31 = vrot.slane %v2120_v15, 2  ;;  %v2145_v46 = vadd.f32 %v2120_v15, %v6539_v21 }
 0xf32   :  { %v2140_v45 = vadd.f32 %v2125_v54, %v6518_v39  ;;  %v2141_v25 = vadd.f32 %v2126_v63, %v6524_v55  ;;  %v2142_v7 = vadd.f32 %v2127_v1, %v6526_v59  ;;  %v2143_v33 = vadd.f32 %v2128_v0, %v6532_v10 }
 0xf33   :  { %v2144_v11 = vadd.f32 %v2129_v30, %v6530_v8  ;;  %v2146_v22 = vadd.f32 %v2130_v43, %v6536_v20  ;;  %v2147_v2 = vadd.f32 %v2131_v31, %v6543_v26  ;;  %v5129_v12 = vmul.f32 -1.442695, %v2145_v46 }
 0xf34   :  { %6000 = vtanh.f32 %v2140_v45  ;;  %v5124_v43 = vmul.f32 -1.442695, %v2140_v45  ;;  %v5126_v31 = vmul.f32 -1.442695, %v2142_v7 }
 0xf35   :  { %6002 = vtanh.f32 %v2141_v25  ;;  %v5130_v24 = vmul.f32 -1.442695, %v2146_v22 }
 0xf36   :  { %6004 = vtanh.f32 %v2142_v7 }
 0xf37   :  { %6006 = vtanh.f32 %v2143_v33 }
 0xf38   :  { %6008 = vtanh.f32 %v2144_v11 }
 0xf39   :  { %6010 = vtanh.f32 %v2146_v22 }
 0xf3a   :  { %6012 = vtanh.f32 %v2145_v46 }
 0xf3b   :  { %6014 = vtanh.f32 %v2147_v2 }
 0xf3c   :  { %6016 = vpow2.f32 %v5124_v43 }
 0xf3e   :  { %v6001_v23 = vpop.eup %6000 }
 0xf3f   :  { %2244 = vrot.lane.b32.xlu1 %v6001_v23, %s6328_s0  ;;  %v6003_v54 = vpop.eup %6002  ;;  %v5125_v23 = vmul.f32 -1.442695, %v2141_v25 }
 0xf40   :  { %v6005_v57 = vpop.eup %6004  ;;  %2246 = vrot.lane.b32.xlu0 %v6003_v54, %s6328_s0  ;;  %v5127_v54 = vmul.f32 -1.442695, %v2143_v33 }
 0xf41   :  { %v6007_v63 = vpop.eup %6006  ;;  %6018 = vpow2.f32 %v5125_v23 }
 0xf42   :  { %v6009_v1 = vpop.eup %6008  ;;  %6020 = vpow2.f32 %v5126_v31 }
 0xf43   :  { %2248 = vrot.lane.b32.xlu1 %v6005_v57, %s6328_s0  ;;  %v6011_v0 = vpop.eup %6010  ;;  %6022 = vpow2.f32 %v5127_v54 }
 0xf44   :  { %2250 = vrot.lane.b32.xlu0 %v6007_v63, %s6328_s0  ;;  %v6013_v15 = vpop.eup %6012  ;;  %v5128_v63 = vmul.f32 -1.442695, %v2144_v11 }
 0xf45   :  { %v6015_v30 = vpop.eup %6014 }
 0xf46   :  { %v6017_v57 = vpop.eup %6016  ;;  %6024 = vpow2.f32 %v5128_v63 }
 0xf47   :  { %2252 = vrot.lane.b32.xlu1 %v6009_v1, %s6328_s0  ;;  %v2172_v1 = vadd.f32 1.0, %v6017_v57  ;;  %6026 = vpow2.f32 %v5130_v24 }
 0xf48   :  { %2256 = vrot.lane.b32.xlu0 %v6011_v0, %s6328_s0  ;;  %v5131_v0 = vmul.f32 -1.442695, %v2147_v2 }
 0xf49   :  { %6028 = vrcp.f32 %v2172_v1 }
 0xf4a   :  { %6030 = vpow2.f32 %v5129_v12 }
 0xf4b   :  { %2254 = vrot.lane.b32.xlu1 %v6013_v15, %s6328_s0  ;;  %v6019_v15 = vpop.eup %6018  ;;  %6032 = vpow2.f32 %v5131_v0 }
 0xf4c   :  { %2258 = vrot.lane.b32.xlu0 %v6015_v30, %s6328_s0  ;;  %v6021_v30 = vpop.eup %6020  ;;  %v2173_v45 = vadd.f32 1.0, %v6019_v15 }
 0xf4d   :  { %v6023_v25 = vpop.eup %6022  ;;  %v2174_v7 = vadd.f32 1.0, %v6021_v30 }
 0xf4e   :  { %6034 = vrcp.f32 %v2173_v45  ;;  %v2175_v23 = vadd.f32 1.0, %v6023_v25 }
 0xf4f   :  { %6036 = vrcp.f32 %v2174_v7 }
 0xf50   :  { %v6025_v43 = vpop.eup %6024  ;;  %6038 = vrcp.f32 %v2175_v23 }
 0xf51   :  { %v6027_v33 = vpop.eup %6026  ;;  %v2176_v31 = vadd.f32 1.0, %v6025_v43 }
 0xf52   :  { %v2178_v12 = vadd.f32 1.0, %v6027_v33 }
 0xf53   :  { %v7259_v11 = vpop.eup %6028  ;;  %6040 = vrcp.f32 %v2176_v31 }
 0xf54   :  { %v6031_v46 = vpop.eup %6030  ;;  %6042 = vrcp.f32 %v2178_v12 }
 0xf55   :  { %v6033_v2 = vpop.eup %6032  ;;  %v2177_v54 = vadd.f32 1.0, %v6031_v46 }
 0xf56   :  { %v2179_v57 = vadd.f32 1.0, %v6033_v2 }
 0xf57   :  { %6044 = vrcp.f32 %v2177_v54 }
 0xf58   :  { %v7263_v63 = vpop.eup %6034  ;;  %6046 = vrcp.f32 %v2179_v57 }
 0xf59   :  { %v7265_v0 = vpop.eup %6036 }
 0xf5a   :  { %v7270_v25 = vpop.eup %6038 }
 0xf5d   :  { %v7273_v43 = vpop.eup %6040 }
 0xf5e   :  { %v7278_v31 = vpop.eup %6042 }
 0xfb1   :  { %v2245_v22 = vpop.permute.xlu1 %2244 }
 0xfb2   :  { %v2268_v24 = vmul.f32 %v7259_v11, %v2245_v22  ;;  %v2247_v1 = vpop.permute.xlu0 %2246 }
 0xfb3   :  { %v2269_v15 = vmul.f32 %v7263_v63, %v2247_v1 }
 0xfb4   :  { %2284 = vrot.lane.b32.xlu1 %v2268_v24, %s6329_s1  ;;  %v7281_v24 = vpop.eup %6044 }
 0xfb5   :  { %v2249_v30 = vpop.permute.xlu1 %2248  ;;  %2286 = vrot.lane.b32.xlu0 %v2269_v15, %s6329_s1  ;;  %v7286_v57 = vpop.eup %6046 }
 0xfb6   :  { %v2270_v45 = vmul.f32 %v7265_v0, %v2249_v30  ;;  %v2251_v7 = vpop.permute.xlu0 %2250  ;;  %v2212_v30 = vrot.slane %v7151_v52, 7 }
 0xfb7   :  { %v2271_v33 = vmul.f32 %v7270_v25, %v2251_v7 }
 0xfb8   :  { %2288 = vrot.lane.b32.xlu1 %v2270_v45, %s6329_s1  ;;  %v2228_v45 = vmul.f32 %v7259_v11, %v2212_v30 }
 0xfb9   :  { %v2253_v23 = vpop.permute.xlu1 %2252  ;;  %2290 = vrot.lane.b32.xlu0 %v2271_v33, %s6329_s1 }
 0xfba   :  { %v2272_v22 = vmul.f32 %v7273_v43, %v2253_v23  ;;  %v2257_v46 = vpop.permute.xlu0 %2256  ;;  %v2213_v23 = vrot.slane %v7173_v44, 7 }
 0xfbb   :  { %v2274_v12 = vmul.f32 %v7278_v31, %v2257_v46 }
 0xfbc   :  { %2292 = vrot.lane.b32.xlu1 %v2272_v22, %s6329_s1  ;;  %v2214_v22 = vrot.slane %v7159_v56, 7  ;;  %v2229_v46 = vmul.f32 %v7263_v63, %v2213_v23  ;;  %v2218_v23 = vrot.slane %v7179_v36, 7  ;;  %v2219_v36 = vrot.slane %v7188_v19, 7 }
 0xfbd   :  { %v2255_v2 = vpop.permute.xlu1 %2254  ;;  %2296 = vrot.lane.b32.xlu0 %v2274_v12, %s6329_s1 }
 0xfbe   :  { %v2273_v54 = vmul.f32 %v7281_v24, %v2255_v2  ;;  %v2259_v1 = vpop.permute.xlu0 %2258  ;;  %v2230_v2 = vmul.f32 %v7265_v0, %v2214_v22 }
 0xfbf   :  { %v2275_v15 = vmul.f32 %v7286_v57, %v2259_v1 }
 0xfc0   :  { %2294 = vrot.lane.b32.xlu1 %v2273_v54, %s6329_s1  ;;  %v2215_v54 = vrot.slane %v7182_v42, 7 }
 0xfc1   :  { %2298 = vrot.lane.b32.xlu0 %v2275_v15, %s6329_s1  ;;  %v2216_v15 = vrot.slane %v7162_v40, 7  ;;  %v2217_v40 = vrot.slane %v7170_v34, 7  ;;  %v2235_v34 = vmul.f32 %v7286_v57, %v2219_v36 }
 0xfc2   :  { %v2231_v44 = vmul.f32 %v7270_v25, %v2215_v54 }
 0xfc3   :  { %v2233_v54 = vmul.f32 %v7281_v24, %v2217_v40 }
0x1026   :  { %v2285_v7 = vpop.permute.xlu1 %2284 }
0x1027   :  { %v7293_v33 = vadd.f32 %v2285_v7, %v2228_v45  ;;  %v2287_v12 = vpop.permute.xlu0 %2286  ;;  %v2232_v7 = vmul.f32 %v7273_v43, %v2216_v15 }
0x1028   :  { %v7301_v1 = vadd.f32 %v2287_v12, %v2229_v46  ;;  %v2234_v12 = vmul.f32 %v7278_v31, %v2218_v23 }
0x1029   :  { %6048 = vtanh.f32 %v7293_v33 }
0x102a   :  { %v2289_v52 = vpop.permute.xlu1 %2288  ;;  %6050 = vtanh.f32 %v7301_v1 }
0x102b   :  { %v7304_v30 = vadd.f32 %v2289_v52, %v2230_v2  ;;  %v2291_v56 = vpop.permute.xlu0 %2290 }
0x102c   :  { %v7311_v42 = vadd.f32 %v2291_v56, %v2231_v44 }
0x102d   :  { %6052 = vtanh.f32 %v7304_v30 }
0x102e   :  { %v2293_v22 = vpop.permute.xlu1 %2292  ;;  %6054 = vtanh.f32 %v7311_v42 }
0x102f   :  { %v7315_v46 = vadd.f32 %v2293_v22, %v2232_v7  ;;  %v2297_v2 = vpop.permute.xlu0 %2296 }
0x1030   :  { %v7322_v52 = vadd.f32 %v2297_v2, %v2234_v12 }
0x1031   :  { %6056 = vtanh.f32 %v7315_v46 }
0x1032   :  { %v2295_v15 = vpop.permute.xlu1 %2294  ;;  %6058 = vtanh.f32 %v7322_v52 }
0x1033   :  { %v6049_v45 = vpop.eup %6048  ;;  %v7324_v44 = vadd.f32 %v2295_v15, %v2233_v54 }
0x1034   :  { %2332 = vrot.lane.b32.xlu1 %v6049_v45, %s6328_s0  ;;  %v2299_v45 = vpop.permute.xlu0 %2298  ;;  %v6051_v56 = vpop.eup %6050 }
0x1035   :  { %6060 = vtanh.f32 %v7324_v44  ;;  %v7329_v7 = vadd.f32 %v2299_v45, %v2235_v34  ;;  %2334 = vrot.lane.b32.xlu0 %v6051_v56, %s6328_s0 }
0x1037   :  { %v6053_v23 = vpop.eup %6052  ;;  %6062 = vtanh.f32 %v7329_v7 }
0x1038   :  { %2336 = vrot.lane.b32.xlu1 %v6053_v23, %s6328_s0  ;;  %v6055_v19 = vpop.eup %6054 }
0x1039   :  { %2338 = vrot.lane.b32.xlu0 %v6055_v19, %s6328_s0 }
0x103b   :  { %v6057_v22 = vpop.eup %6056 }
0x103c   :  { %2340 = vrot.lane.b32.xlu1 %v6057_v22, %s6328_s0  ;;  %v6059_v40 = vpop.eup %6058 }
0x103d   :  { %2344 = vrot.lane.b32.xlu0 %v6059_v40, %s6328_s0 }
0x103f   :  { %v6061_v12 = vpop.eup %6060 }
0x1040   :  { %2342 = vrot.lane.b32.xlu1 %v6061_v12, %s6328_s0 }
0x1041   :  { %v6063_v2 = vpop.eup %6062 }
0x1042   :  { %2346 = vrot.lane.b32.xlu0 %v6063_v2, %s6328_s0 }
0x10a6   :  { %v2333_v54 = vpop.permute.xlu1 %2332 }
0x10a7   :  { %v7340_v36 = vmul.f32 %v7259_v11, %v2333_v54  ;;  %v2335_v15 = vpop.permute.xlu0 %2334 }
0x10a8   :  { %v7343_v34 = vmul.f32 %v7263_v63, %v2335_v15 }
0x10a9   :  { %v2405_v45 = vrot.slane %v7340_v36, 5 }
0x10aa   :  { %v2337_v56 = vpop.permute.xlu1 %2336  ;;  %v2406_v19 = vrot.slane %v7343_v34, 4 }
0x10ab   :  { %v7347_v23 = vmul.f32 %v7265_v0, %v2337_v56  ;;  %v2339_v22 = vpop.permute.xlu0 %2338 }
0x10ac   :  { %v2407_v12 = vsel %vm554_vm1, %v2406_v19, %v2405_v45  ;;  %v7353_v11 = vmul.f32 %v7270_v25, %v2339_v22 }
0x10ad   :  { %v2408_v40 = vrot.slane %v7347_v23, 3 }
0x10ae   :  { %v2341_v2 = vpop.permute.xlu1 %2340  ;;  %v2410_v15 = vrot.slane %v7353_v11, 2 }
0x10af   :  { %v2409_v63 = vsel %vm557_vm2, %v2408_v40, %v2407_v12  ;;  %v7357_v54 = vmul.f32 %v7273_v43, %v2341_v2  ;;  %v2345_v0 = vpop.permute.xlu0 %2344 }
0x10b0   :  { %v7362_v37 = vmul.f32 %v7278_v31, %v2345_v0  ;;  %v2411_v35 = vsel %vm560_vm3, %v2410_v15, %v2409_v63 }
0x10b1   :  { %8053 = vst [vmem:[#allocation32_spill] sm:$0xff] %v7357_v54  ;;  %v2412_v56 = vrot.slane %v7357_v54, 1 }
0x10b2   :  { %8054 = vst [vmem:[#allocation33_spill] sm:$0xff] %v7362_v37  ;;  %v2343_v45 = vpop.permute.xlu1 %2342  ;;  %v2415_v22 = vrot.slane %v7362_v37, 7 }
0x10b3   :  { %v2413_v25 = vsel %vm563_vm4, %v2412_v56, %v2411_v35  ;;  %v7367_v19 = vmul.f32 %v7281_v24, %v2343_v45 }
0x10b4   :  { %v2347_v43 = vpop.permute.xlu0 %2346 }
0x10b5   :  { %8055 = vst [vmem:[#allocation34_spill] sm:$0xff] %v7367_v19  ;;  %v2414_v40 = vsel %vm566_vm5, %v7367_v19, %v2413_v25  ;;  %v7373_v12 = vmul.f32 %v7286_v57, %v2347_v43 }
0x10b6   :  { %v2416_v31 = vsel %vm569_vm6, %v2415_v22, %v2414_v40 }
0x10b7   :  { %8056 = vst [vmem:[#allocation35_spill] sm:$0xff] %v7373_v12  ;;  %v2417_v2 = vrot.slane %v7373_v12, 6 }
0x10b9   :  { %v2418_v63 = vsel %vm572_vm7, %v2417_v2, %v2416_v31 }
0x10ba   :  { %2419 = vrot.lane.b32.xlu1 %v2418_v63, %s6329_s1 }
0x112c   :  { %v2420_v35 = vpop.permute.xlu1 %2419 }
0x112d   :  { %5407 = vmatmul.mubr.msk.f32.vlgmr.msra.gmra.mrb[4].mxu0 %vm222_vm8, %v2420_v35 }
0x1200   :  { %v2489_v24 = vpop.f32.mrb[4].mxu0 }
0x1201   :  { %v2494_v15 = vrot.slane %v2489_v24, 2  ;;  %v5408_v0 = vpop.f32.mrb[5].mxu0  ;;  %v2495_v45 = vrot.slane %v2489_v24, 3  ;;  %v2496_v57 = vrot.slane %v2489_v24, 4  ;;  %v2497_v25 = vrot.slane %v2489_v24, 5 }
0x1202   :  { %v2498_v43 = vrot.slane %v2489_v24, 6  ;;  %v2499_v31 = vrot.slane %v2489_v24, 7  ;;  %v2500_v35 = vrot.slane %v2489_v24, 1 }
0x1203   :  { %v2509_v56 = vadd.f32 %v2494_v15, %v6518_v39  ;;  %v2510_v22 = vadd.f32 %v2495_v45, %v6524_v55  ;;  %v2511_v40 = vadd.f32 %v2496_v57, %v6526_v59  ;;  %v2512_v2 = vadd.f32 %v2497_v25, %v6532_v10 }
0x1204   :  { %v2513_v12 = vadd.f32 %v2498_v43, %v6530_v8  ;;  %v2514_v15 = vadd.f32 %v2499_v31, %v6539_v21  ;;  %v2516_v0 = vadd.f32 %v2500_v35, %v6543_v26  ;;  %v2515_v45 = vadd.f32 %v2489_v24, %v6536_v20 }
0x1205   :  { %6064 = vtanh.f32 %v2509_v56  ;;  %v5133_v35 = vmul.f32 -1.442695, %v2509_v56  ;;  %v5135_v19 = vmul.f32 -1.442695, %v2511_v40 }
0x1206   :  { %6066 = vtanh.f32 %v2510_v22  ;;  %v5138_v50 = vmul.f32 -1.442695, %v2514_v15  ;;  %v5140_v27 = vmul.f32 -1.442695, %v2516_v0 }
0x1207   :  { %6068 = vtanh.f32 %v2511_v40 }
0x1208   :  { %6070 = vtanh.f32 %v2512_v2 }
0x1209   :  { %6072 = vtanh.f32 %v2513_v12 }
0x120a   :  { %6074 = vtanh.f32 %v2514_v15 }
0x120b   :  { %6076 = vtanh.f32 %v2516_v0 }
0x120c   :  { %6078 = vtanh.f32 %v2515_v45 }
0x120d   :  { %6080 = vpow2.f32 %v5133_v35 }
0x120f   :  { %v6065_v63 = vpop.eup %6064 }
0x1210   :  { %2613 = vrot.lane.b32.xlu0 %v6065_v63, %s6328_s0  ;;  %v6067_v57 = vpop.eup %6066 }
0x1211   :  { %v6069_v25 = vpop.eup %6068  ;;  %2615 = vrot.lane.b32.xlu1 %v6067_v57, %s6328_s0  ;;  %v5134_v57 = vmul.f32 -1.442695, %v2510_v22 }
0x1212   :  { %v6071_v43 = vpop.eup %6070 }
0x1213   :  { %v6073_v37 = vpop.eup %6072  ;;  %6082 = vpow2.f32 %v5134_v57 }
0x1214   :  { %2617 = vrot.lane.b32.xlu0 %v6069_v25, %s6328_s0  ;;  %v6075_v31 = vpop.eup %6074  ;;  %v5136_v25 = vmul.f32 -1.442695, %v2512_v2  ;;  %6084 = vpow2.f32 %v5135_v19 }
0x1215   :  { %2619 = vrot.lane.b32.xlu1 %v6071_v43, %s6328_s0  ;;  %v6077_v63 = vpop.eup %6076  ;;  %v5137_v43 = vmul.f32 -1.442695, %v2513_v12 }
0x1216   :  { %v6079_v24 = vpop.eup %6078  ;;  %6086 = vpow2.f32 %v5136_v25 }
0x1217   :  { %v6081_v54 = vpop.eup %6080  ;;  %6088 = vpow2.f32 %v5137_v43 }
0x1218   :  { %2621 = vrot.lane.b32.xlu0 %v6073_v37, %s6328_s0  ;;  %v2541_v37 = vadd.f32 1.0, %v6081_v54  ;;  %6090 = vpow2.f32 %v5138_v50 }
0x1219   :  { %2623 = vrot.lane.b32.xlu1 %v6075_v31, %s6328_s0  ;;  %v5139_v31 = vmul.f32 -1.442695, %v2515_v45 }
0x121a   :  { %6092 = vrcp.f32 %v2541_v37 }
0x121b   :  { %6094 = vpow2.f32 %v5140_v27 }
0x121c   :  { %2627 = vrot.lane.b32.xlu0 %v6077_v63, %s6328_s0  ;;  %6096 = vpow2.f32 %v5139_v31 }
0x121d   :  { %2625 = vrot.lane.b32.xlu1 %v6079_v24, %s6328_s0  ;;  %v6083_v63 = vpop.eup %6082 }
0x121e   :  { %v6085_v24 = vpop.eup %6084  ;;  %v2542_v56 = vadd.f32 1.0, %v6083_v63 }
0x121f   :  { %v2543_v40 = vadd.f32 1.0, %v6085_v24 }
0x1220   :  { %v6087_v22 = vpop.eup %6086  ;;  %6098 = vrcp.f32 %v2542_v56 }
0x1221   :  { %v6089_v35 = vpop.eup %6088  ;;  %v2544_v19 = vadd.f32 1.0, %v6087_v22  ;;  %6100 = vrcp.f32 %v2543_v40 }
0x1222   :  { %v6091_v2 = vpop.eup %6090  ;;  %v2545_v54 = vadd.f32 1.0, %v6089_v35 }
0x1223   :  { %6102 = vrcp.f32 %v2544_v19  ;;  %v2546_v27 = vadd.f32 1.0, %v6091_v2 }
0x1224   :  { %v7396_v12 = vpop.eup %6092  ;;  %6104 = vrcp.f32 %v2545_v54 }
0x1225   :  { %v6095_v0 = vpop.eup %6094  ;;  %6106 = vrcp.f32 %v2546_v27 }
0x1226   :  { %v6097_v45 = vpop.eup %6096  ;;  %v2548_v57 = vadd.f32 1.0, %v6095_v0 }
0x1227   :  { %v2547_v25 = vadd.f32 1.0, %v6097_v45 }
0x1228   :  { %6108 = vrcp.f32 %v2548_v57 }
0x1229   :  { %6110 = vrcp.f32 %v2547_v25 }
0x122a   :  { %v7400_v43 = vpop.eup %6098 }
0x122b   :  { %v7402_v31 = vpop.eup %6100 }
0x122d   :  { %v7407_v22 = vpop.eup %6102 }
0x122e   :  { %v7410_v35 = vpop.eup %6104 }
0x122f   :  { %v7415_v54 = vpop.eup %6106 }
0x1282   :  { %v2614_v15 = vpop.permute.xlu0 %2613 }
0x1283   :  { %v2637_v50 = vmul.f32 %v7396_v12, %v2614_v15  ;;  %v2616_v37 = vpop.permute.xlu1 %2615 }
0x1284   :  { %v2638_v63 = vmul.f32 %v7400_v43, %v2616_v37 }
0x1285   :  { %2653 = vrot.lane.b32.xlu0 %v2637_v50, %s6329_s1  ;;  %v7418_v50 = vpop.eup %6108 }
0x1286   :  { %v2618_v24 = vpop.permute.xlu0 %2617  ;;  %2655 = vrot.lane.b32.xlu1 %v2638_v63, %s6329_s1  ;;  %v7423_v25 = vpop.eup %6110 }
0x1287   :  { %v2639_v56 = vmul.f32 %v7402_v31, %v2618_v24  ;;  %v2620_v40 = vpop.permute.xlu1 %2619  ;;  %v2581_v24 = vrot.slane %v7293_v33, 7 }
0x1288   :  { %v2640_v2 = vmul.f32 %v7407_v22, %v2620_v40 }
0x1289   :  { %2657 = vrot.lane.b32.xlu0 %v2639_v56, %s6329_s1  ;;  %v2597_v56 = vmul.f32 %v7396_v12, %v2581_v24 }
0x128a   :  { %v2622_v19 = vpop.permute.xlu0 %2621  ;;  %2659 = vrot.lane.b32.xlu1 %v2640_v2, %s6329_s1 }
0x128b   :  { %v2641_v15 = vmul.f32 %v7410_v35, %v2622_v19  ;;  %v2624_v0 = vpop.permute.xlu1 %2623  ;;  %v2582_v19 = vrot.slane %v7301_v1, 7 }
0x128c   :  { %v2642_v27 = vmul.f32 %v7415_v54, %v2624_v0 }
0x128d   :  { %2661 = vrot.lane.b32.xlu0 %v2641_v15, %s6329_s1  ;;  %v2583_v15 = vrot.slane %v7304_v30, 7  ;;  %v2598_v0 = vmul.f32 %v7400_v43, %v2582_v19  ;;  %v2586_v19 = vrot.slane %v7324_v44, 7  ;;  %v2587_v44 = vrot.slane %v7322_v52, 7 }
0x128e   :  { %v2628_v45 = vpop.permute.xlu0 %2627  ;;  %2663 = vrot.lane.b32.xlu1 %v2642_v27, %s6329_s1 }
0x128f   :  { %v2644_v57 = vmul.f32 %v7418_v50, %v2628_v45  ;;  %v2626_v37 = vpop.permute.xlu1 %2625  ;;  %v2599_v45 = vmul.f32 %v7402_v31, %v2583_v15 }
0x1290   :  { %v2643_v63 = vmul.f32 %v7423_v25, %v2626_v37 }
0x1291   :  { %2667 = vrot.lane.b32.xlu0 %v2644_v57, %s6329_s1  ;;  %v2584_v57 = vrot.slane %v7311_v42, 7 }
0x1292   :  { %2665 = vrot.lane.b32.xlu1 %v2643_v63, %s6329_s1  ;;  %v2585_v63 = vrot.slane %v7315_v46, 7  ;;  %v2588_v46 = vrot.slane %v7329_v7, 7  ;;  %v2603_v7 = vmul.f32 %v7423_v25, %v2587_v44 }
0x1293   :  { %v2600_v1 = vmul.f32 %v7407_v22, %v2584_v57 }
0x1294   :  { %v2604_v57 = vmul.f32 %v7418_v50, %v2588_v46 }
0x12f7   :  { %v2654_v40 = vpop.permute.xlu0 %2653 }
0x12f8   :  { %v7430_v2 = vadd.f32 %v2654_v40, %v2597_v56  ;;  %v2656_v27 = vpop.permute.xlu1 %2655  ;;  %v2601_v40 = vmul.f32 %v7410_v35, %v2585_v63 }
0x12f9   :  { %v7438_v37 = vadd.f32 %v2656_v27, %v2598_v0  ;;  %v2602_v27 = vmul.f32 %v7415_v54, %v2586_v19 }
0x12fa   :  { %6112 = vtanh.f32 %v7430_v2 }
0x12fb   :  { %v2658_v33 = vpop.permute.xlu0 %2657  ;;  %6114 = vtanh.f32 %v7438_v37 }
0x12fc   :  { %v7441_v24 = vadd.f32 %v2658_v33, %v2599_v45  ;;  %v2660_v30 = vpop.permute.xlu1 %2659 }
0x12fd   :  { %v7448_v42 = vadd.f32 %v2660_v30, %v2600_v1 }
0x12fe   :  { %6116 = vtanh.f32 %v7441_v24 }
0x12ff   :  { %v2662_v15 = vpop.permute.xlu0 %2661  ;;  %6118 = vtanh.f32 %v7448_v42 }
0x1300   :  { %v7452_v0 = vadd.f32 %v2662_v15, %v2601_v40  ;;  %v2664_v45 = vpop.permute.xlu1 %2663 }
0x1301   :  { %v7459_v33 = vadd.f32 %v2664_v45, %v2602_v27 }
0x1302   :  { %6120 = vtanh.f32 %v7452_v0 }
0x1303   :  { %v2668_v63 = vpop.permute.xlu0 %2667  ;;  %6122 = vtanh.f32 %v7459_v33 }
0x1304   :  { %v6113_v56 = vpop.eup %6112  ;;  %v7461_v1 = vadd.f32 %v2668_v63, %v2604_v57 }
0x1305   :  { %2701 = vrot.lane.b32.xlu0 %v6113_v56, %s6328_s0  ;;  %v2666_v56 = vpop.permute.xlu1 %2665  ;;  %v6115_v30 = vpop.eup %6114 }
0x1306   :  { %6124 = vtanh.f32 %v7461_v1  ;;  %v7466_v40 = vadd.f32 %v2666_v56, %v2603_v7  ;;  %2703 = vrot.lane.b32.xlu1 %v6115_v30, %s6328_s0 }
0x1308   :  { %v6117_v19 = vpop.eup %6116  ;;  %6126 = vtanh.f32 %v7466_v40 }
0x1309   :  { %2705 = vrot.lane.b32.xlu0 %v6117_v19, %s6328_s0  ;;  %v6119_v52 = vpop.eup %6118 }
0x130a   :  { %2707 = vrot.lane.b32.xlu1 %v6119_v52, %s6328_s0 }
0x130c   :  { %v6121_v15 = vpop.eup %6120 }
0x130d   :  { %2709 = vrot.lane.b32.xlu0 %v6121_v15, %s6328_s0  ;;  %v6123_v46 = vpop.eup %6122 }
0x130e   :  { %2711 = vrot.lane.b32.xlu1 %v6123_v46, %s6328_s0 }
0x1310   :  { %v6125_v27 = vpop.eup %6124 }
0x1311   :  { %2715 = vrot.lane.b32.xlu0 %v6125_v27, %s6328_s0 }
0x1312   :  { %v6127_v45 = vpop.eup %6126 }
0x1313   :  { %2713 = vrot.lane.b32.xlu1 %v6127_v45, %s6328_s0 }
0x1377   :  { %v2702_v57 = vpop.permute.xlu0 %2701 }
0x1378   :  { %v7477_v44 = vmul.f32 %v7396_v12, %v2702_v57  ;;  %v2704_v63 = vpop.permute.xlu1 %2703 }
0x1379   :  { %v7480_v7 = vmul.f32 %v7400_v43, %v2704_v63 }
0x137a   :  { %v2774_v56 = vrot.slane %v7477_v44, 6 }
0x137b   :  { %v2706_v30 = vpop.permute.xlu0 %2705  ;;  %v2775_v52 = vrot.slane %v7480_v7, 5 }
0x137c   :  { %v7484_v19 = vmul.f32 %v7402_v31, %v2706_v30  ;;  %v2708_v15 = vpop.permute.xlu1 %2707 }
0x137d   :  { %v2776_v27 = vsel %vm554_vm1, %v2775_v52, %v2774_v56  ;;  %v7490_v12 = vmul.f32 %v7407_v22, %v2708_v15 }
0x137e   :  { %v2777_v46 = vrot.slane %v7484_v19, 4 }
0x137f   :  { %v2710_v45 = vpop.permute.xlu0 %2709  ;;  %v2779_v63 = vrot.slane %v7490_v12, 3 }
0x1380   :  { %v2778_v43 = vsel %vm557_vm2, %v2777_v46, %v2776_v27  ;;  %v7494_v57 = vmul.f32 %v7410_v35, %v2710_v45  ;;  %v2712_v31 = vpop.permute.xlu1 %2711 }
0x1381   :  { %v7499_v13 = vmul.f32 %v7415_v54, %v2712_v31  ;;  %v2780_v28 = vsel %vm560_vm3, %v2779_v63, %v2778_v43 }
0x1382   :  { %v2781_v30 = vrot.slane %v7494_v57, 2 }
0x1383   :  { %v2716_v56 = vpop.permute.xlu0 %2715  ;;  %v2783_v15 = vrot.slane %v7499_v13, 1 }
0x1384   :  { %v2782_v22 = vsel %vm563_vm4, %v2781_v30, %v2780_v28  ;;  %v7504_v52 = vmul.f32 %v7418_v50, %v2716_v56 }
0x1385   :  { %v2714_v35 = vpop.permute.xlu1 %2713  ;;  %v2784_v45 = vsel %vm566_vm5, %v2783_v15, %v2782_v22 }
0x1386   :  { %8057 = vst [vmem:[#allocation36_spill] sm:$0xff] %v7504_v52  ;;  %v2786_v46 = vrot.slane %v7504_v52, 7  ;;  %v7509_v27 = vmul.f32 %v7423_v25, %v2714_v35 }
0x1388   :  { %v2785_v54 = vsel %vm569_vm6, %v7509_v27, %v2784_v45 }
0x1389   :  { %v2787_v43 = vsel %vm572_vm7, %v2786_v46, %v2785_v54 }
0x138a   :  { %2788 = vrot.lane.b32.xlu0 %v2787_v43, %s6329_s1 }
0x13fc   :  { %v2789_v28 = vpop.permute.xlu0 %2788 }
0x13fd   :  { %5418 = vmatmul.mubr.msk.f32.vlgmr.msra.gmra.mrb[8].mxu1 %vm222_vm8, %v2789_v28 }
0x14d0   :  { %v2858_v50 = vpop.f32.mrb[8].mxu1 }
0x14d1   :  { %v2863_v63 = vrot.slane %v2858_v50, 1  ;;  %v5419_v31 = vpop.f32.mrb[9].mxu1  ;;  %v2864_v25 = vrot.slane %v2858_v50, 2  ;;  %v2865_v56 = vrot.slane %v2858_v50, 3  ;;  %v2866_v35 = vrot.slane %v2858_v50, 4 }
0x14d2   :  { %v2867_v15 = vrot.slane %v2858_v50, 5  ;;  %v2868_v46 = vrot.slane %v2858_v50, 6  ;;  %v2869_v28 = vrot.slane %v2858_v50, 7 }
0x14d3   :  { %v2878_v30 = vadd.f32 %v2863_v63, %v6518_v39  ;;  %v2879_v22 = vadd.f32 %v2864_v25, %v6524_v55  ;;  %v2880_v45 = vadd.f32 %v2865_v56, %v6526_v59  ;;  %v2881_v54 = vadd.f32 %v2866_v35, %v6532_v10 }
0x14d4   :  { %v2882_v52 = vadd.f32 %v2867_v15, %v6530_v8  ;;  %v2883_v39 = vadd.f32 %v2868_v46, %v6539_v21  ;;  %v2884_v63 = vadd.f32 %v2869_v28, %v6536_v20  ;;  %v2885_v55 = vadd.f32 %v2858_v50, %v6543_v26 }
0x14d5   :  { %6128 = vtanh.f32 %v2878_v30  ;;  %v5142_v50 = vmul.f32 -1.442695, %v2878_v30  ;;  %v5144_v25 = vmul.f32 -1.442695, %v2880_v45 }
0x14d6   :  { %6130 = vtanh.f32 %v2879_v22  ;;  %v5146_v15 = vmul.f32 -1.442695, %v2882_v52  ;;  %v5149_v46 = vmul.f32 -1.442695, %v2885_v55 }
0x14d7   :  { %6132 = vtanh.f32 %v2880_v45 }
0x14d8   :  { %6134 = vtanh.f32 %v2881_v54 }
0x14d9   :  { %6136 = vtanh.f32 %v2882_v52 }
0x14da   :  { %6138 = vtanh.f32 %v2883_v39 }
0x14db   :  { %6140 = vtanh.f32 %v2884_v63 }
0x14dc   :  { %6142 = vtanh.f32 %v2885_v55 }
0x14dd   :  { %6144 = vpow2.f32 %v5142_v50 }
0x14de   :  { %6146 = vpow2.f32 %v5144_v25  ;;  %v5147_v25 = vmul.f32 -1.442695, %v2883_v39 }
0x14df   :  { %v6129_v43 = vpop.eup %6128 }
0x14e0   :  { %2982 = vrot.lane.b32.xlu1 %v6129_v43, %s6328_s0  ;;  %v6131_v59 = vpop.eup %6130  ;;  %v5148_v43 = vmul.f32 -1.442695, %v2884_v63 }
0x14e1   :  { %v6133_v10 = vpop.eup %6132  ;;  %2984 = vrot.lane.b32.xlu0 %v6131_v59, %s6328_s0  ;;  %v5143_v59 = vmul.f32 -1.442695, %v2879_v22 }
0x14e2   :  { %v6135_v8 = vpop.eup %6134 }
0x14e3   :  { %v6137_v31 = vpop.eup %6136 }
0x14e4   :  { %2986 = vrot.lane.b32.xlu1 %v6133_v10, %s6328_s0  ;;  %v6139_v21 = vpop.eup %6138 }
0x14e5   :  { %2988 = vrot.lane.b32.xlu0 %v6135_v8, %s6328_s0  ;;  %v6141_v20 = vpop.eup %6140 }
0x14e6   :  { %v6143_v26 = vpop.eup %6142 }
0x14e7   :  { %v6145_v56 = vpop.eup %6144 }
0x14e8   :  { %2990 = vrot.lane.b32.xlu1 %v6137_v31, %s6328_s0  ;;  %v2910_v35 = vadd.f32 1.0, %v6145_v56  ;;  %v6147_v28 = vpop.eup %6146  ;;  %v5145_v31 = vmul.f32 -1.442695, %v2881_v54 }
0x14e9   :  { %2992 = vrot.lane.b32.xlu0 %v6139_v21, %s6328_s0  ;;  %v2912_v10 = vadd.f32 1.0, %v6147_v28 }
0x14ea   :  { %6148 = vrcp.f32 %v2910_v35 }
0x14eb   :  { %6150 = vpow2.f32 %v5146_v15 }
0x14ec   :  { %2994 = vrot.lane.b32.xlu1 %v6141_v20, %s6328_s0  ;;  %6152 = vpow2.f32 %v5149_v46 }
0x14ed   :  { %2996 = vrot.lane.b32.xlu0 %v6143_v26, %s6328_s0  ;;  %6154 = vpow2.f32 %v5148_v43 }
0x14ee   :  { %6156 = vpow2.f32 %v5143_v59 }
0x14ef   :  { %6158 = vrcp.f32 %v2912_v10 }
0x14f0   :  { %520 = vrot.lane.b32.xlu1 %v6633_v18, %s6329_s1  ;;  %6160 = vpow2.f32 %v5145_v31 }
0x14f4   :  { %v7535_v8 = vpop.eup %6148 }
0x14f5   :  { %v6151_v30 = vpop.eup %6150 }
0x14f6   :  { %v6153_v52 = vpop.eup %6152  ;;  %v2914_v55 = vadd.f32 1.0, %v6151_v30 }
0x14f7   :  { %v6155_v21 = vpop.eup %6154  ;;  %v2917_v63 = vadd.f32 1.0, %v6153_v52 }
0x14f8   :  { %v6157_v22 = vpop.eup %6156  ;;  %6162 = vrcp.f32 %v2914_v55  ;;  %v2916_v20 = vadd.f32 1.0, %v6155_v21 }
0x14f9   :  { %v7541_v50 = vpop.eup %6158  ;;  %6164 = vrcp.f32 %v2917_v63  ;;  %v2911_v54 = vadd.f32 1.0, %v6157_v22 }
0x14fa   :  { %6166 = vrcp.f32 %v2916_v20 }
0x14fb   :  { %6168 = vpow2.f32 %v5147_v25 }
0x14fc   :  { %6170 = vrcp.f32 %v2911_v54 }
0x1552   :  { %v2983_v18 = vpop.permute.xlu1 %2982 }
0x1553   :  { %v3006_v45 = vmul.f32 %v7535_v8, %v2983_v18  ;;  %v2985_v26 = vpop.permute.xlu0 %2984 }
0x1555   :  { %3022 = vrot.lane.b32.xlu1 %v3006_v45, %s6329_s1 }
0x1556   :  { %v2987_v56 = vpop.permute.xlu1 %2986 }
0x1557   :  { %v3008_v35 = vmul.f32 %v7541_v50, %v2987_v56  ;;  %v2989_v15 = vpop.permute.xlu0 %2988 }
0x1559   :  { %1265 = vrot.lane.b32.xlu1 %v6913_v60, %s6329_s1  ;;  %v6161_v60 = vpop.eup %6160 }
0x155a   :  { %v2991_v46 = vpop.permute.xlu1 %2990  ;;  %v7547_v28 = vpop.eup %6162  ;;  %v2913_v59 = vadd.f32 1.0, %v6161_v60 }
0x155b   :  { %v2993_v43 = vpop.permute.xlu0 %2992  ;;  %v3010_v10 = vmul.f32 %v7547_v28, %v2991_v46  ;;  %v7550_v18 = vpop.eup %6164 }
0x155c   :  { %v7553_v45 = vpop.eup %6166  ;;  %6172 = vrcp.f32 %v2913_v59 }
0x155d   :  { %3026 = vrot.lane.b32.xlu1 %v3008_v35, %s6329_s1  ;;  %v6169_v55 = vpop.eup %6168 }
0x155e   :  { %v2995_v39 = vpop.permute.xlu1 %2994  ;;  %v7559_v21 = vpop.eup %6170  ;;  %v2915_v22 = vadd.f32 1.0, %v6169_v55 }
0x155f   :  { %v2997_v30 = vpop.permute.xlu0 %2996  ;;  %v3007_v63 = vmul.f32 %v7559_v21, %v2985_v26 }
0x1560   :  { %v3013_v31 = vmul.f32 %v7550_v18, %v2997_v30  ;;  %6174 = vrcp.f32 %v2915_v22  ;;  %v2955_v30 = vrot.slane %v7459_v33, 7 }
0x1561   :  { %2003 = vrot.lane.b32.xlu1 %v7201_v58, %s6329_s1  ;;  %v3012_v58 = vmul.f32 %v7553_v45, %v2995_v39 }
0x1562   :  { %v521_v52 = vpop.permute.xlu1 %520  ;;  %3036 = vrot.lane.b32.xlu0 %v3013_v31, %s6329_s1 }
0x1563   :  { %545 = vst.msk [vmem:[#allocation2] sm:$0x1] %vm544_vm9, %v521_v52 }
0x1565   :  { %3030 = vrot.lane.b32.xlu1 %v3010_v10, %s6329_s1 }
0x1566   :  { %3024 = vrot.lane.b32.xlu0 %v3007_v63, %s6329_s1  ;;  %v7568_v20 = vpop.eup %6172 }
0x1567   :  { %v3009_v25 = vmul.f32 %v7568_v20, %v2989_v15 }
0x1569   :  { %3034 = vrot.lane.b32.xlu1 %v3012_v58, %s6329_s1 }
0x156a   :  { %896 = vrot.lane.b32.xlu0 %v6773_v38, %s6329_s1 }
0x156d   :  { %2741 = vrot.lane.b32.xlu1 %v7477_v44, %s6329_s1  ;;  %v7578_v44 = vpop.eup %6174 }
0x156e   :  { %3028 = vrot.lane.b32.xlu0 %v3009_v25, %s6329_s1  ;;  %v3011_v38 = vmul.f32 %v7578_v44, %v2993_v43  ;;  %v2971_v52 = vmul.f32 %v7578_v44, %v2955_v30 }
0x1571   :  { %522 = vrot.lane.b32.xlu1 %v6627_v16, %s6329_s1  ;;  %v2950_v16 = vrot.slane %v7430_v2, 7  ;;  %v2951_v2 = vrot.slane %v7438_v37, 7  ;;  %v2953_v37 = vrot.slane %v7448_v42, 7 }
0x1572   :  { %1634 = vrot.lane.b32.xlu0 %v7056_v49, %s6329_s1 }
0x1573   :  { %v2969_v15 = vmul.f32 %v7568_v20, %v2953_v37  ;;  %v8077_v37 = vld [vmem:[#allocation31_spill] sm:$0xff] }
0x1575   :  { %1267 = vrot.lane.b32.xlu1 %v6919_v53, %s6329_s1 }
0x1576   :  { %3032 = vrot.lane.b32.xlu0 %v3011_v38, %s6329_s1 }
0x1579   :  { %2005 = vrot.lane.b32.xlu1 %v7204_v41, %s6329_s1 }
0x157a   :  { %2372 = vrot.lane.b32.xlu0 %v7340_v36, %s6329_s1 }
0x157d   :  { %2743 = vrot.lane.b32.xlu1 %v7480_v7, %s6329_s1 }
0x157e   :  { %898 = vrot.lane.b32.xlu0 %v6779_v6, %s6329_s1 }
0x1581   :  { %524 = vrot.lane.b32.xlu1 %v6630_v17, %s6329_s1  ;;  %v2966_v17 = vmul.f32 %v7535_v8, %v2950_v16 }
0x1582   :  { %1636 = vrot.lane.b32.xlu0 %v7059_v14, %s6329_s1 }
0x1585   :  { %1269 = vrot.lane.b32.xlu1 %v6928_v48, %s6329_s1 }
0x1586   :  { %2374 = vrot.lane.b32.xlu0 %v7343_v34, %s6329_s1 }
0x1589   :  { %2007 = vrot.lane.b32.xlu1 %v7198_v51, %s6329_s1  ;;  %v2957_v51 = vrot.slane %v7461_v1, 7  ;;  %v2967_v1 = vmul.f32 %v7559_v21, %v2951_v2 }
0x158a   :  { %900 = vrot.lane.b32.xlu0 %v6770_v62, %s6329_s1 }
0x158b   :  { %v2973_v34 = vmul.f32 %v7550_v18, %v2957_v51  ;;  %v8064_v51 = vld [vmem:[#allocation32_spill] sm:$0xff] }
0x158d   :  { %2745 = vrot.lane.b32.xlu1 %v7484_v19, %s6329_s1 }
0x158e   :  { %1638 = vrot.lane.b32.xlu0 %v7069_v47, %s6329_s1  ;;  %v2954_v47 = vrot.slane %v7452_v0, 7 }
0x1591   :  { %526 = vrot.lane.b32.xlu1 %v6643_v5, %s6329_s1 }
0x1592   :  { %2376 = vrot.lane.b32.xlu0 %v7347_v23, %s6329_s1 }
0x1595   :  { %1271 = vrot.lane.b32.xlu1 %v6916_v29, %s6329_s1  ;;  %v2952_v29 = vrot.slane %v7441_v24, 7 }
0x1596   :  { %902 = vrot.lane.b32.xlu0 %v6776_v4, %s6329_s1 }
0x1597   :  { %v2968_v4 = vmul.f32 %v7541_v50, %v2952_v29 }
0x1599   :  { %2009 = vrot.lane.b32.xlu1 %v7217_v32, %s6329_s1  ;;  %v2956_v32 = vrot.slane %v7466_v40, 7 }
0x159a   :  { %1640 = vrot.lane.b32.xlu0 %v7077_v61, %s6329_s1  ;;  %v2970_v61 = vmul.f32 %v7547_v28, %v2954_v47 }
0x159e   :  { %2378 = vrot.lane.b32.xlu0 %v7353_v11, %s6329_s1  ;;  %v2972_v11 = vmul.f32 %v7553_v45, %v2956_v32 }
0x15c7   :  { %v3023_v5 = vpop.permute.xlu1 %3022 }
0x15c8   :  { %v3046_v62 = vadd.f32 %v3023_v5, %v2966_v17 }
0x15ca   :  { %6176 = vtanh.f32 %v3046_v62  ;;  %v8059_v62 = vld [vmem:[#allocation15_spill] sm:$0xff] }
0x15cb   :  { %v1266_v6 = vpop.permute.xlu1 %1265 }
0x15cc   :  { %1290 = vst.msk [vmem:[#allocation2] sm:$0x4] %vm1289_vm10, %v1266_v6 }
0x15cf   :  { %v3027_v53 = vpop.permute.xlu1 %3026 }
0x15d0   :  { %v3048_v48 = vadd.f32 %v3027_v53, %v2968_v4  ;;  %v8060_v4 = vld [vmem:[#allocation17_spill] sm:$0xff] }
0x15d2   :  { %6178 = vtanh.f32 %v3048_v48 }
0x15d3   :  { %v2004_v14 = vpop.permute.xlu1 %2003 }
0x15d4   :  { %v6177_v49 = vpop.eup %6176  ;;  %2028 = vst.msk [vmem:[#allocation2] sm:$0x10] %vm2027_vm11, %v2004_v14  ;;  %v3037_v23 = vpop.permute.xlu0 %3036  ;;  %v8063_v14 = vld [vmem:[#allocation28_spill] sm:$0xff] }
0x15d5   :  { %3070 = vrot.lane.b32.xlu1 %v6177_v49, %s6328_s0  ;;  %v3053_v24 = vadd.f32 %v3037_v23, %v2973_v34  ;;  %v8062_v49 = vld [vmem:[#allocation25_spill] sm:$0xff]  ;;  %v8066_v34 = vld [vmem:[#allocation14_spill] sm:$0xff] }
0x15d7   :  { %v3031_v41 = vpop.permute.xlu1 %3030 }
0x15d8   :  { %v3050_v36 = vadd.f32 %v3031_v41, %v2970_v61  ;;  %v3025_v40 = vpop.permute.xlu0 %3024 }
0x15d9   :  { %2747 = vrot.lane.b32.xlu1 %v7490_v12, %s6329_s1  ;;  %v3047_v12 = vadd.f32 %v3025_v40, %v2967_v1  ;;  %v8072_v1 = vld [vmem:[#allocation27_spill] sm:$0xff]  ;;  %v8073_v40 = vld [vmem:[#allocation16_spill] sm:$0xff] }
0x15da   :  { %6180 = vtanh.f32 %v3050_v36  ;;  %v8065_v36 = vld [vmem:[#allocation18_spill] sm:$0xff] }
0x15db   :  { %v3035_v0 = vpop.permute.xlu1 %3034  ;;  %6182 = vtanh.f32 %v3053_v24  ;;  %v8069_v24 = vld [vmem:[#allocation34_spill] sm:$0xff] }
0x15dc   :  { %v6179_v7 = vpop.eup %6178  ;;  %v3052_v19 = vadd.f32 %v3035_v0, %v2972_v11  ;;  %v897_v56 = vpop.permute.xlu0 %896  ;;  %v8067_v11 = vld [vmem:[#allocation24_spill] sm:$0xff]  ;;  %v8070_v0 = vld [vmem:[#allocation29_spill] sm:$0xff] }
0x15dd   :  { %3074 = vrot.lane.b32.xlu1 %v6179_v7, %s6328_s0  ;;  %921 = vst.msk [vmem:[#allocation2] sm:$0x2] %vm920_vm13, %v897_v56  ;;  %v8076_v56 = vld [vmem:[#allocation20_spill] sm:$0xff] }
0x15de   :  { %6184 = vtanh.f32 %v3052_v19  ;;  %v8071_v19 = vld [vmem:[#allocation19_spill] sm:$0xff] }
0x15df   :  { %v2742_v26 = vpop.permute.xlu1 %2741  ;;  %6186 = vtanh.f32 %v3047_v12  ;;  %v8074_v12 = vld [vmem:[#allocation33_spill] sm:$0xff] }
0x15e0   :  { %2766 = vst.msk [vmem:[#allocation2] sm:$0x40] %vm2765_vm12, %v2742_v26  ;;  %v3029_v46 = vpop.permute.xlu0 %3028  ;;  %v8075_v26 = vld [vmem:[#allocation23_spill] sm:$0xff] }
0x15e1   :  { %v3049_v43 = vadd.f32 %v3029_v46, %v2969_v15 }
0x15e3   :  { %v523_v54 = vpop.permute.xlu1 %522  ;;  %6188 = vtanh.f32 %v3049_v43 }
0x15e4   :  { %v6181_v35 = vpop.eup %6180  ;;  %546 = vst.msk [vmem:[#allocation2 + $0x8] sm:$0x1] %vm544_vm9, %v523_v54  ;;  %v1635_v42 = vpop.permute.xlu0 %1634  ;;  %v8079_v54 = vld [vmem:[#allocation36_spill] sm:$0xff] }
0x15e5   :  { %3078 = vrot.lane.b32.xlu1 %v6181_v35, %s6328_s0  ;;  %v6183_v60 = vpop.eup %6182  ;;  %1659 = vst.msk [vmem:[#allocation2] sm:$0x8] %vm1658_vm14, %v1635_v42  ;;  %v8080_v35 = vld [vmem:[#allocation35_spill] sm:$0xff]  ;;  %v3291_v42 = vld [vmem:[%s7995_s5] sm:$0xff] }
0x15e6   :  { %3084 = vrot.lane.b32.xlu0 %v6183_v60, %s6328_s0 }
0x15e7   :  { %v1268_v39 = vpop.permute.xlu1 %1267 }
0x15e8   :  { %v6185_v59 = vpop.eup %6184  ;;  %1291 = vst.msk [vmem:[#allocation2 + $0x8] sm:$0x4] %vm1289_vm10, %v1268_v39  ;;  %v3033_v58 = vpop.permute.xlu0 %3032  ;;  %v3151_v39 = vld [vmem:[%s7994_s4] sm:$0xff] }
0x15e9   :  { %3082 = vrot.lane.b32.xlu1 %v6185_v59, %s6328_s0  ;;  %v6187_v10 = vpop.eup %6186  ;;  %v3051_v55 = vadd.f32 %v3033_v58, %v2971_v52  ;;  %v3152_v59 = vld [vmem:[%s7994_s4 + $0x8] sm:$0xff]  ;;  %v3153_v52 = vld [vmem:[%s7994_s4 + $0x10] sm:$0xff]  ;;  %v3154_v58 = vld [vmem:[%s7994_s4 + $0x18] sm:$0xff] }
0x15ea   :  { %3072 = vrot.lane.b32.xlu0 %v6187_v10, %s6328_s0  ;;  %v5628_v10 = vpack.c.bf16 %v3152_v59, %v3151_v39 }
0x15eb   :  { %v2006_v31 = vpop.permute.xlu1 %2005  ;;  %6190 = vtanh.f32 %v3051_v55  ;;  %v3293_v55 = vld [vmem:[%s7995_s5 + $0x10] sm:$0xff] }
0x15ec   :  { %2029 = vst.msk [vmem:[#allocation2 + $0x8] sm:$0x10] %vm2027_vm11, %v2006_v31  ;;  %v2373_v33 = vpop.permute.xlu0 %2372  ;;  %5629 = vmatprep.subr.bf16.mxu0 %v5628_v10 }
0x15ed   :  { %528 = vrot.lane.b32.xlu1 %v6640_v3, %s6329_s1  ;;  %v6189_v22 = vpop.eup %6188  ;;  %2397 = vst.msk [vmem:[#allocation2] sm:$0x20] %vm2396_vm15, %v2373_v33  ;;  %v8058_v3 = vld [vmem:[#allocation30_spill] sm:$0xff]  ;;  %5631 = vmatpush3.bf16.msra.mxu0 %v5628_v10  ;;  %v3294_v33 = vld [vmem:[%s7995_s5 + $0x18] sm:$0xff] }
0x15ee   :  { %3076 = vrot.lane.b32.xlu0 %v6189_v22, %s6328_s0 }
0x15ef   :  { %v2744_v63 = vpop.permute.xlu1 %2743 }
0x15f0   :  { %2767 = vst.msk [vmem:[#allocation2 + $0x8] sm:$0x40] %vm2765_vm12, %v2744_v63  ;;  %v899_v38 = vpop.permute.xlu0 %898  ;;  %v5632_v63 = vpack.c.bf16 %v3154_v58, %v3153_v52 }
0x15f1   :  { %1273 = vrot.lane.b32.xlu1 %v6922_v9, %s6329_s1  ;;  %922 = vst.msk [vmem:[#allocation2 + $0x8] sm:$0x2] %vm920_vm13, %v899_v38 }
0x15f2   :  { %5633 = vmatprep.subr.bf16.mxu0 %v5632_v63 }
0x15f3   :  { %v525_v25 = vpop.permute.xlu1 %524  ;;  %5635 = vmatpush3.bf16.msra.mxu0 %v5632_v63 }
0x15f4   :  { %547 = vst.msk [vmem:[#allocation2 + $0x10] sm:$0x1] %vm544_vm9, %v525_v25  ;;  %v1637_v9 = vpop.permute.xlu0 %1636  ;;  %v5640_v25 = vpack.c.bf16 %v3294_v33, %v3293_v55 }
0x15f5   :  { %2011 = vrot.lane.b32.xlu1 %v8058_v3, %s6329_s1  ;;  %v6191_v17 = vpop.eup %6190  ;;  %1660 = vst.msk [vmem:[#allocation2 + $0x8] sm:$0x8] %vm1658_vm14, %v1637_v9 }
0x15f6   :  { %3080 = vrot.lane.b32.xlu0 %v6191_v17, %s6328_s0 }
0x15f7   :  { %v1270_v16 = vpop.permute.xlu1 %1269 }
0x15f8   :  { %1292 = vst.msk [vmem:[#allocation2 + $0x10] sm:$0x4] %vm1289_vm10, %v1270_v16  ;;  %v2375_v6 = vpop.permute.xlu0 %2374  ;;  %v8081_v16 = vmov 0.0  }
0x15f9   :  { %2749 = vrot.lane.b32.xlu1 %v7494_v57, %s6329_s1  ;;  %2398 = vst.msk [vmem:[#allocation2 + $0x8] sm:$0x20] %vm2396_vm15, %v2375_v6  ;;  %v8061_v57 = vld [vmem:[#allocation21_spill] sm:$0xff] }
0x15fa   :  { %904 = vrot.lane.b32.xlu0 %v8060_v4, %s6329_s1 }
0x15fb   :  { %v2008_v5 = vpop.permute.xlu1 %2007 }
0x15fc   :  { %2030 = vst.msk [vmem:[#allocation2 + $0x10] sm:$0x10] %vm2027_vm11, %v2008_v5  ;;  %v901_v53 = vpop.permute.xlu0 %900 }
0x15fd   :  { %530 = vrot.lane.b32.xlu1 %v8059_v62, %s6329_s1  ;;  %923 = vst.msk [vmem:[#allocation2 + $0x10] sm:$0x2] %vm920_vm13, %v901_v53 }
0x15fe   :  { %1642 = vrot.lane.b32.xlu0 %v8062_v49, %s6329_s1  ;;  %v3407_v49 = vld [vmem:[#allocation7] sm:$0xff] }
0x15ff   :  { %v2746_v29 = vpop.permute.xlu1 %2745 }
0x1600   :  { %2768 = vst.msk [vmem:[#allocation2 + $0x10] sm:$0x40] %vm2765_vm12, %v2746_v29  ;;  %v1639_v47 = vpop.permute.xlu0 %1638 }
0x1601   :  { %1275 = vrot.lane.b32.xlu1 %v8061_v57, %s6329_s1  ;;  %1661 = vst.msk [vmem:[#allocation2 + $0x10] sm:$0x8] %vm1658_vm14, %v1639_v47 }
0x1602   :  { %2380 = vrot.lane.b32.xlu0 %v8064_v51, %s6329_s1 }
0x1603   :  { %v527_v48 = vpop.permute.xlu1 %526 }
0x1604   :  { %548 = vst.msk [vmem:[#allocation2 + $0x18] sm:$0x1] %vm544_vm9, %v527_v48  ;;  %v2377_v41 = vpop.permute.xlu0 %2376 }
0x1605   :  { %2013 = vrot.lane.b32.xlu1 %v8063_v14, %s6329_s1  ;;  %2399 = vst.msk [vmem:[#allocation2 + $0x10] sm:$0x20] %vm2396_vm15, %v2377_v41 }
0x1606   :  { %906 = vrot.lane.b32.xlu0 %v8065_v36, %s6329_s1 }
0x1607   :  { %v1272_v61 = vpop.permute.xlu1 %1271 }
0x1608   :  { %1293 = vst.msk [vmem:[#allocation2 + $0x18] sm:$0x4] %vm1289_vm10, %v1272_v61  ;;  %v903_v23 = vpop.permute.xlu0 %902 }
0x1609   :  { %2751 = vrot.lane.b32.xlu1 %v7499_v13, %s6329_s1  ;;  %924 = vst.msk [vmem:[#allocation2 + $0x18] sm:$0x2] %vm920_vm13, %v903_v23  ;;  %v8068_v13 = vld [vmem:[#allocation22_spill] sm:$0xff] }
0x160a   :  { %1644 = vrot.lane.b32.xlu0 %v8067_v11, %s6329_s1 }
0x160b   :  { %v2010_v32 = vpop.permute.xlu1 %2009 }
0x160c   :  { %2031 = vst.msk [vmem:[#allocation2 + $0x18] sm:$0x10] %vm2027_vm11, %v2010_v32  ;;  %v1641_v2 = vpop.permute.xlu0 %1640 }
0x160d   :  { %532 = vrot.lane.b32.xlu1 %v8066_v34, %s6329_s1  ;;  %1662 = vst.msk [vmem:[#allocation2 + $0x18] sm:$0x8] %vm1658_vm14, %v1641_v2 }
0x160e   :  { %2382 = vrot.lane.b32.xlu0 %v8069_v24, %s6329_s1 }
0x1610   :  { %v2379_v7 = vpop.permute.xlu0 %2378 }
0x1611   :  { %1277 = vrot.lane.b32.xlu1 %v8068_v13, %s6329_s1  ;;  %2400 = vst.msk [vmem:[#allocation2 + $0x18] sm:$0x20] %vm2396_vm15, %v2379_v7 }
0x1612   :  { %908 = vrot.lane.b32.xlu0 %v8071_v19, %s6329_s1 }
0x1615   :  { %2015 = vrot.lane.b32.xlu1 %v8070_v0, %s6329_s1 }
0x1616   :  { %1646 = vrot.lane.b32.xlu0 %v8072_v1, %s6329_s1 }
0x1619   :  { %2753 = vrot.lane.b32.xlu1 %v7509_v27, %s6329_s1  ;;  %v8078_v27 = vld [vmem:[#allocation26_spill] sm:$0xff] }
0x161a   :  { %2384 = vrot.lane.b32.xlu0 %v8074_v12, %s6329_s1 }
0x161d   :  { %534 = vrot.lane.b32.xlu1 %v8073_v40, %s6329_s1 }
0x161e   :  { %910 = vrot.lane.b32.xlu0 %v8076_v56, %s6329_s1 }
0x1621   :  { %1279 = vrot.lane.b32.xlu1 %v8075_v26, %s6329_s1 }
0x1622   :  { %1648 = vrot.lane.b32.xlu0 %v8078_v27, %s6329_s1 }
0x1625   :  { %2017 = vrot.lane.b32.xlu1 %v8077_v37, %s6329_s1 }
0x1626   :  { %2386 = vrot.lane.b32.xlu0 %v8080_v35, %s6329_s1 }
0x1629   :  { %2755 = vrot.lane.b32.xlu1 %v8079_v54, %s6329_s1 }
0x1647   :  { %v3071_v15 = vpop.permute.xlu1 %3070 }
0x1648   :  { %v3094_v46 = vmul.f32 %v7535_v8, %v3071_v15  ;;  %v3292_v8 = vld [vmem:[%s7995_s5 + $0x8] sm:$0xff] }
0x1649   :  { %v5636_v30 = vpack.c.bf16 %v3292_v8, %v3291_v42 }
0x164a   :  { %3110 = vrot.lane.b32.xlu0 %v3094_v46, %s6329_s1  ;;  %v3409_v46 = vld [vmem:[#allocation7 + $0x10] sm:$0xff] }
0x164b   :  { %v2748_v60 = vpop.permute.xlu1 %2747  ;;  %5637 = vmatprep.subr.bf16.mxu1 %v5636_v30 }
0x164c   :  { %2769 = vst.msk [vmem:[#allocation2 + $0x18] sm:$0x40] %vm2765_vm12, %v2748_v60  ;;  %5639 = vmatpush3.bf16.msra.mxu1 %v5636_v30  ;;  %v3410_v60 = vld [vmem:[#allocation7 + $0x18] sm:$0xff] }
0x164d   :  { %5641 = vmatprep.subr.bf16.mxu1 %v5640_v25 }
0x164f   :  { %v3075_v43 = vpop.permute.xlu1 %3074 }
0x1650   :  { %5643 = vmatpush3.bf16.msra.mxu1 %v5640_v25  ;;  %v3096_v5 = vmul.f32 %v7541_v50, %v3075_v43  ;;  %v5648_v43 = vpack.c.bf16 %v3410_v60, %v3409_v46 }
0x1651   :  { %5480 = vmatprep.subr.mxu1 %v8081_v16 }
0x1657   :  { %v3079_v31 = vpop.permute.xlu1 %3078 }
0x1658   :  { %v3085_v22 = vpop.permute.xlu0 %3084 }
0x1659   :  { %v3101_v51 = vmul.f32 %v7550_v18, %v3085_v22  ;;  %v5159_v22 = vld [vmem:[%s7998_s8] ss:$0 sm:$0xff] }
0x165b   :  { %v3083_v3 = vpop.permute.xlu1 %3082 }
0x165c   :  { %v3073_v38 = vpop.permute.xlu0 %3072 }
0x165d   :  { %v3095_v9 = vmul.f32 %v7559_v21, %v3073_v38  ;;  %v3098_v21 = vmul.f32 %v7547_v28, %v3079_v31  ;;  %v3100_v28 = vmul.f32 %v7553_v45, %v3083_v3 }
0x165f   :  { %v529_v17 = vpop.permute.xlu1 %528  ;;  %3112 = vrot.lane.b32.xlu0 %v3095_v9, %s6329_s1 }
0x1660   :  { %549 = vst.msk [vmem:[#allocation2 + $0x20] sm:$0x1] %vm544_vm9, %v529_v17  ;;  %v3077_v6 = vpop.permute.xlu0 %3076  ;;  %v5150_v17 = vld [vmem:[%s7997_s7] ss:$0 sm:$0xff] }
0x1661   :  { %v3097_v29 = vmul.f32 %v7568_v20, %v3077_v6  ;;  %v3408_v20 = vld [vmem:[#allocation7 + $0x8] sm:$0xff] }
0x1662   :  { %v7771_v14 = vpack.c.bf16 %v3408_v20, %v3407_v49 }
0x1663   :  { %v1274_v62 = vpop.permute.xlu1 %1273  ;;  %3114 = vrot.lane.b32.xlu0 %v3096_v5, %s6329_s1 }
0x1664   :  { %1294 = vst.msk [vmem:[#allocation2 + $0x20] sm:$0x4] %vm1289_vm10, %v1274_v62  ;;  %5645 = vmatprep.subr.bf16.mxu0 %v7771_v14 }
0x1667   :  { %v2012_v4 = vpop.permute.xlu1 %2011  ;;  %3116 = vrot.lane.b32.xlu0 %v3097_v29, %s6329_s1 }
0x1668   :  { %2032 = vst.msk [vmem:[#allocation2 + $0x20] sm:$0x10] %vm2027_vm11, %v2012_v4  ;;  %v3081_v50 = vpop.permute.xlu0 %3080 }
0x1669   :  { %v3099_v53 = vmul.f32 %v7578_v44, %v3081_v50 }
0x166b   :  { %v2750_v57 = vpop.permute.xlu1 %2749  ;;  %3118 = vrot.lane.b32.xlu0 %v3098_v21, %s6329_s1 }
0x166c   :  { %2770 = vst.msk [vmem:[#allocation2 + $0x20] sm:$0x40] %vm2765_vm12, %v2750_v57  ;;  %v905_v47 = vpop.permute.xlu0 %904 }
0x166d   :  { %925 = vst.msk [vmem:[#allocation2 + $0x20] sm:$0x2] %vm920_vm13, %v905_v47 }
0x166f   :  { %v531_v48 = vpop.permute.xlu1 %530  ;;  %3120 = vrot.lane.b32.xlu0 %v3099_v53, %s6329_s1 }
0x1670   :  { %550 = vst.msk [vmem:[#allocation2 + $0x28] sm:$0x1] %vm544_vm9, %v531_v48  ;;  %v1643_v44 = vpop.permute.xlu0 %1642 }
0x1671   :  { %1663 = vst.msk [vmem:[#allocation2 + $0x20] sm:$0x8] %vm1658_vm14, %v1643_v44 }
0x1673   :  { %v1276_v61 = vpop.permute.xlu1 %1275  ;;  %3122 = vrot.lane.b32.xlu0 %v3100_v28, %s6329_s1 }
0x1674   :  { %1295 = vst.msk [vmem:[#allocation2 + $0x28] sm:$0x4] %vm1289_vm10, %v1276_v61  ;;  %v2381_v45 = vpop.permute.xlu0 %2380 }
0x1675   :  { %2401 = vst.msk [vmem:[#allocation2 + $0x20] sm:$0x20] %vm2396_vm15, %v2381_v45 }
0x1677   :  { %v2014_v41 = vpop.permute.xlu1 %2013  ;;  %3124 = vrot.lane.b32.xlu0 %v3101_v51, %s6329_s1 }
0x1678   :  { %2033 = vst.msk [vmem:[#allocation2 + $0x28] sm:$0x10] %vm2027_vm11, %v2014_v41  ;;  %v907_v36 = vpop.permute.xlu0 %906 }
0x1679   :  { %926 = vst.msk [vmem:[#allocation2 + $0x28] sm:$0x2] %vm920_vm13, %v907_v36 }
0x167b   :  { %v2752_v32 = vpop.permute.xlu1 %2751 }
0x167c   :  { %2771 = vst.msk [vmem:[#allocation2 + $0x28] sm:$0x40] %vm2765_vm12, %v2752_v32  ;;  %v1645_v18 = vpop.permute.xlu0 %1644 }
0x167d   :  { %1664 = vst.msk [vmem:[#allocation2 + $0x28] sm:$0x8] %vm1658_vm14, %v1645_v18 }
0x167f   :  { %v533_v34 = vpop.permute.xlu1 %532 }
0x1680   :  { %551 = vst.msk [vmem:[#allocation2 + $0x30] sm:$0x1] %vm544_vm9, %v533_v34  ;;  %v2383_v11 = vpop.permute.xlu0 %2382 }
0x1681   :  { %2402 = vst.msk [vmem:[#allocation2 + $0x28] sm:$0x20] %vm2396_vm15, %v2383_v11 }
0x1683   :  { %v1278_v23 = vpop.permute.xlu1 %1277 }
0x1684   :  { %1296 = vst.msk [vmem:[#allocation2 + $0x30] sm:$0x4] %vm1289_vm10, %v1278_v23  ;;  %v909_v2 = vpop.permute.xlu0 %908 }
0x1685   :  { %927 = vst.msk [vmem:[#allocation2 + $0x30] sm:$0x2] %vm920_vm13, %v909_v2 }
0x1687   :  { %v2016_v13 = vpop.permute.xlu1 %2015 }
0x1688   :  { %2034 = vst.msk [vmem:[#allocation2 + $0x30] sm:$0x10] %vm2027_vm11, %v2016_v13  ;;  %v1647_v0 = vpop.permute.xlu0 %1646  ;;  %v5168_v13 = vld [vmem:[%s7999_s9] ss:$0 sm:$0xff] }
0x1689   :  { %1665 = vst.msk [vmem:[#allocation2 + $0x30] sm:$0x8] %vm1658_vm14, %v1647_v0 }
0x168b   :  { %v2754_v24 = vpop.permute.xlu1 %2753 }
0x168c   :  { %2772 = vst.msk [vmem:[#allocation2 + $0x30] sm:$0x40] %vm2765_vm12, %v2754_v24  ;;  %v2385_v19 = vpop.permute.xlu0 %2384 }
0x168d   :  { %2403 = vst.msk [vmem:[#allocation2 + $0x30] sm:$0x20] %vm2396_vm15, %v2385_v19 }
0x168f   :  { %v535_v7 = vpop.permute.xlu1 %534 }
0x1690   :  { %552 = vst.msk [vmem:[#allocation2 + $0x38] sm:$0x1] %vm544_vm9, %v535_v7  ;;  %v911_v40 = vpop.permute.xlu0 %910  ;;  %vm3134_vm9 = vcmask 261127  }
0x1691   :  { %928 = vst.msk [vmem:[#allocation2 + $0x38] sm:$0x2] %vm920_vm13, %v911_v40 }
0x1693   :  { %v1280_v1 = vpop.permute.xlu1 %1279 }
0x1694   :  { %1297 = vst.msk [vmem:[#allocation2 + $0x38] sm:$0x4] %vm1289_vm10, %v1280_v1  ;;  %v1649_v26 = vpop.permute.xlu0 %1648  ;;  %vm4139_vm10 = vcmask 64512  }
0x1695   :  { %1666 = vst.msk [vmem:[#allocation2 + $0x38] sm:$0x8] %vm1658_vm14, %v1649_v26 }
0x1697   :  { %v2018_v12 = vpop.permute.xlu1 %2017 }
0x1698   :  { %2035 = vst.msk [vmem:[#allocation2 + $0x38] sm:$0x10] %vm2027_vm11, %v2018_v12  ;;  %v2387_v37 = vpop.permute.xlu0 %2386 }
0x1699   :  { %2404 = vst.msk [vmem:[#allocation2 + $0x38] sm:$0x20] %vm2396_vm15, %v2387_v37 }
0x169b   :  { %v2756_v56 = vpop.permute.xlu1 %2755 }
0x169c   :  { %2773 = vst.msk [vmem:[#allocation2 + $0x38] sm:$0x40] %vm2765_vm12, %v2756_v56 }
0x16bc   :  { %v3111_v27 = vpop.permute.xlu0 %3110 }
0x16bd   :  { %3135 = vst.msk [vmem:[#allocation2] sm:$0x80] %vm3134_vm9, %v3111_v27 }
0x16c4   :  { %v3143_v54 = vld [vmem:[#allocation2] sm:$0xff] }
0x16c5   :  { %5428 = vmatprep.mubr.msk.f32.mxu0 %vm222_vm8, %v3143_v54  ;;  %5448 = vmatprep.mubr.msk.f32.mxu1 %vm222_vm8, %v3143_v54 }
0x16d1   :  { %v3113_v35 = vpop.permute.xlu0 %3112 }
0x16d2   :  { %3136 = vst.msk [vmem:[#allocation2 + $0x8] sm:$0x80] %vm3134_vm9, %v3113_v35 }
0x16d5   :  { %v3115_v15 = vpop.permute.xlu0 %3114 }
0x16d6   :  { %3137 = vst.msk [vmem:[#allocation2 + $0x10] sm:$0x80] %vm3134_vm9, %v3115_v15 }
0x16d9   :  { %v3117_v39 = vpop.permute.xlu0 %3116  ;;  %v3144_v59 = vld [vmem:[#allocation2 + $0x8] sm:$0xff] }
0x16da   :  { %3138 = vst.msk [vmem:[#allocation2 + $0x18] sm:$0x80] %vm3134_vm9, %v3117_v39  ;;  %5429 = vmatmul.mubr.msk.f32.vlgmr.msra.gmra.mrb[6].mxu0 %vm222_vm8, %v3144_v59  ;;  %5449 = vmatmul.mubr.msk.f32.vlgmr.msra.gmra.mrb[10].mxu1 %vm222_vm8, %v3144_v59 }
0x16db   :  { %5647 = vmatpush3.bf16.msra.mxu0 %v7771_v14 }
0x16dc   :  { %5649 = vmatprep.subr.bf16.mxu0 %v5648_v43 }
0x16dd   :  { %v3119_v42 = vpop.permute.xlu0 %3118  ;;  %v3145_v10 = vld [vmem:[#allocation2 + $0x10] sm:$0xff] }
0x16de   :  { %3139 = vst.msk [vmem:[#allocation2 + $0x20] sm:$0x80] %vm3134_vm9, %v3119_v42  ;;  %5431 = vmatprep.mubr.msk.f32.mxu0 %vm222_vm8, %v3145_v10  ;;  %5451 = vmatprep.mubr.msk.f32.mxu1 %vm222_vm8, %v3145_v10 }
0x16df   :  { %5651 = vmatpush3.bf16.msra.mxu0 %v5648_v43 }
0x16e0   :  { %5500 = vmatprep.subr.mxu0 %v8081_v16 }
0x16e1   :  { %v3121_v8 = vpop.permute.xlu0 %3120  ;;  %v3146_v30 = vld [vmem:[#allocation2 + $0x18] sm:$0xff] }
0x16e2   :  { %3140 = vst.msk [vmem:[#allocation2 + $0x28] sm:$0x80] %vm3134_vm9, %v3121_v8  ;;  %5432 = vmatmul.mubr.msk.f32.gmra.mrb[8].mxu0 %vm222_vm8, %v3146_v30  ;;  %5452 = vmatmul.mubr.msk.f32.gmra.mrb[12].mxu1 %vm222_vm8, %v3146_v30 }
0x16e5   :  { %v3123_v31 = vpop.permute.xlu0 %3122  ;;  %v3147_v52 = vld [vmem:[#allocation2 + $0x20] sm:$0xff] }
0x16e6   :  { %3141 = vst.msk [vmem:[#allocation2 + $0x30] sm:$0x80] %vm3134_vm9, %v3123_v31  ;;  %5434 = vmatprep.mubr.msk.f32.mxu0 %vm222_vm8, %v3147_v52  ;;  %5454 = vmatprep.mubr.msk.f32.mxu1 %vm222_vm8, %v3147_v52 }
0x16e9   :  { %v3125_v58 = vpop.permute.xlu0 %3124  ;;  %v3148_v55 = vld [vmem:[#allocation2 + $0x28] sm:$0xff] }
0x16ea   :  { %3142 = vst.msk [vmem:[#allocation2 + $0x38] sm:$0x80] %vm3134_vm9, %v3125_v58  ;;  %5435 = vmatmul.mubr.msk.f32.gmra.mrb[10].mxu0 %vm222_vm8, %v3148_v55  ;;  %5455 = vmatmul.mubr.msk.f32.gmra.mrb[14].mxu1 %vm222_vm8, %v3148_v55 }
0x16ed   :  { %v3149_v63 = vld [vmem:[#allocation2 + $0x30] sm:$0xff] }
0x16ee   :  { %5437 = vmatprep.mubr.msk.f32.mxu0 %vm222_vm8, %v3149_v63  ;;  %5457 = vmatprep.mubr.msk.f32.mxu1 %vm222_vm8, %v3149_v63 }
0x16f1   :  { %v3150_v33 = vld [vmem:[#allocation2 + $0x38] sm:$0xff] }
0x16f2   :  { %5438 = vmatmul.mubr.msk.f32.gmra.mrb[12].mxu0 %vm222_vm8, %v3150_v33  ;;  %5458 = vmatmul.mubr.msk.f32.gmra.mrb[16].mxu1 %vm222_vm8, %v3150_v33 }
0x16f3   :  { %5468 = vmatprep.mubr.msk.f32.mxu0 %vm222_vm8, %v3143_v54  ;;  %5482 = vmatprep.mubr.msk.f32.mxu1 %vm6324_vm0, %v8081_v16 }
0x16f6   :  { %5469 = vmatmul.mubr.msk.f32.vlgmr.msra.gmra.mrb[14].mxu0 %vm222_vm8, %v3144_v59 }
0x16f7   :  { %5471 = vmatprep.mubr.msk.f32.mxu0 %vm222_vm8, %v3145_v10 }
0x16fa   :  { %5472 = vmatmul.mubr.msk.f32.gmra.mrb[16].mxu0 %vm222_vm8, %v3146_v30 }
0x16fb   :  { %5474 = vmatprep.mubr.msk.f32.mxu0 %vm222_vm8, %v3147_v52 }
0x16fe   :  { %5475 = vmatmul.mubr.msk.f32.gmra.mrb[18].mxu0 %vm222_vm8, %v3148_v55 }
0x16ff   :  { %5477 = vmatprep.mubr.msk.f32.mxu0 %vm222_vm8, %v3149_v63 }
0x1702   :  { %5478 = vmatmul.mubr.msk.f32.gmra.mrb[20].mxu0 %vm222_vm8, %v3150_v33 }
0x1703   :  { %5502 = vmatprep.mubr.msk.f32.mxu0 %vm6324_vm0, %v8081_v16 }
0x17ad   :  { %v5430_v25 = vpop.f32.mrb[6].mxu0  ;;  %v5450_v3 = vpop.f32.mrb[10].mxu1 }
0x17ae   :  { %v3252_v38 = vpop.f32.mrb[7].mxu0  ;;  %v3368_v9 = vpop.f32.mrb[11].mxu1  ;;  %v3374_v6 = vadd.f32 %v5450_v3, %v5159_v22  ;;  %v3258_v21 = vadd.f32 %v5430_v25, %v5150_v17 }
0x17af   :  { %v3369_v5 = vadd.f32 %v5159_v22, %v3368_v9  ;;  %v3253_v62 = vadd.f32 %v5150_v17, %v3252_v38 }
0x17b1   :  { %5481 = vmatpush3.xpose.msk.msra.mxu1 %vm222_vm8, %v3369_v5 }
0x17b2   :  { %5485 = vmatprep.subr.mxu1 %v8081_v16 }
0x17b4   :  { %5483 = vmatmul.mubr.msk.f32.vlgmr.msra.gmra.mrb[18].mxu1 %vm222_vm8, %v3253_v62 }
0x17b5   :  { %v5433_v29 = vpop.f32.mrb[8].mxu0  ;;  %v5453_v4 = vpop.f32.mrb[12].mxu1  ;;  %5486 = vmatpush3.xpose.msk.msra.mxu1 %vm222_vm8, %v3374_v6  ;;  %5487 = vmatprep.mubr.msk.f32.mxu1 %vm6324_vm0, %v8081_v16 }
0x17b6   :  { %v3262_v57 = vpop.f32.mrb[9].mxu0  ;;  %v3378_v50 = vpop.f32.mrb[13].mxu1  ;;  %5490 = vmatprep.subr.mxu1 %v8081_v16  ;;  %v3384_v49 = vadd.f32 %v5453_v4, %v5159_v22  ;;  %v3268_v47 = vadd.f32 %v5433_v29, %v5150_v17 }
0x17b7   :  { %v3379_v53 = vadd.f32 %v5159_v22, %v3378_v50  ;;  %v3263_v48 = vadd.f32 %v5150_v17, %v3262_v57 }
0x17b8   :  { %5488 = vmatmul.mubr.msk.f32.vlgmr.msra.gmra.mrb[20].mxu1 %vm222_vm8, %v3258_v21 }
0x17b9   :  { %5491 = vmatpush3.xpose.msk.msra.mxu1 %vm222_vm8, %v3379_v53  ;;  %5492 = vmatprep.mubr.msk.f32.mxu1 %vm6324_vm0, %v8081_v16 }
0x17ba   :  { %5495 = vmatprep.subr.mxu1 %v8081_v16 }
0x17bc   :  { %5493 = vmatmul.mubr.msk.f32.vlgmr.msra.gmra.mrb[22].mxu1 %vm222_vm8, %v3263_v48 }
0x17bd   :  { %v5436_v20 = vpop.f32.mrb[10].mxu0  ;;  %v5456_v14 = vpop.f32.mrb[14].mxu1  ;;  %5496 = vmatpush3.xpose.msk.msra.mxu1 %vm222_vm8, %v3384_v49  ;;  %5497 = vmatprep.mubr.msk.f32.mxu1 %vm6324_vm0, %v8081_v16 }
0x17be   :  { %v3394_v28 = vadd.f32 %v5456_v14, %v5159_v22  ;;  %v3272_v61 = vpop.f32.mrb[11].mxu0  ;;  %v3388_v44 = vpop.f32.mrb[15].mxu1  ;;  %5505 = vmatprep.subr.mxu1 %v8081_v16  ;;  %v3278_v41 = vadd.f32 %v5436_v20, %v5150_v17 }
0x17bf   :  { %v3389_v51 = vadd.f32 %v5159_v22, %v3388_v44  ;;  %v3273_v45 = vadd.f32 %v5150_v17, %v3272_v61 }
0x17c0   :  { %5498 = vmatmul.mubr.msk.f32.vlgmr.msra.gmra.mrb[24].mxu1 %vm222_vm8, %v3268_v47 }
0x17c1   :  { %5501 = vmatpush3.xpose.msk.msra.mxu0 %vm222_vm8, %v3389_v51  ;;  %5506 = vmatpush3.xpose.msk.msra.mxu1 %vm222_vm8, %v3394_v28 }
0x17c2   :  { %5507 = vmatprep.mubr.msk.f32.mxu1 %vm6324_vm0, %v8081_v16  ;;  %5515 = vmatprep.subr.mxu1 %v8081_v16 }
0x17c3   :  { %5510 = vmatprep.subr.mxu0 %v8081_v16 }
0x17c4   :  { %5503 = vmatmul.mubr.msk.f32.vlgmr.msra.gmra.mrb[22].mxu0 %vm222_vm8, %v3273_v45  ;;  %5508 = vmatmul.mubr.msk.f32.vlgmr.msra.gmra.mrb[26].mxu1 %vm222_vm8, %v3278_v41 }
0x17c5   :  { %v5439_v32 = vpop.f32.mrb[12].mxu0  ;;  %v5459_v36 = vpop.f32.mrb[16].mxu1  ;;  %5517 = vmatprep.mubr.msk.f32.mxu1 %vm6324_vm0, %v8081_v16  ;;  %5512 = vmatprep.mubr.msk.f32.mxu0 %vm6324_vm0, %v8081_v16 }
0x17c6   :  { %v3404_v34 = vadd.f32 %v5459_v36, %v5159_v22  ;;  %v3282_v18 = vpop.f32.mrb[13].mxu0  ;;  %v3398_v23 = vpop.f32.mrb[17].mxu1  ;;  %v3288_v2 = vadd.f32 %v5439_v32, %v5150_v17 }
0x17c7   :  { %v3399_v11 = vadd.f32 %v5159_v22, %v3398_v23  ;;  %v3283_v0 = vadd.f32 %v5150_v17, %v3282_v18 }
0x17c8   :  { %5516 = vmatpush3.xpose.msk.msra.mxu1 %vm222_vm8, %v3404_v34 }
0x17c9   :  { %v5470_v24 = vpop.f32.mrb[14].mxu0  ;;  %5511 = vmatpush3.xpose.msk.msra.mxu0 %vm222_vm8, %v3399_v11  ;;  %5525 = vmatprep.subr.mxu1 %v8081_v16 }
0x17ca   :  { %v3490_v7 = vadd.f32 %v5470_v24, %v5168_v13  ;;  %v3484_v19 = vpop.f32.mrb[15].mxu0  ;;  %5520 = vmatprep.subr.mxu0 %v8081_v16 }
0x17cb   :  { %v3485_v1 = vadd.f32 %v5168_v13, %v3484_v19  ;;  %5518 = vmatmul.mubr.msk.f32.vlgmr.msra.gmra.mrb[28].mxu1 %vm222_vm8, %v3288_v2 }
0x17cc   :  { %5513 = vmatmul.mubr.msk.f32.vlgmr.msra.gmra.mrb[24].mxu0 %vm222_vm8, %v3283_v0  ;;  %5526 = vmatpush3.msra.mxu1 %v3490_v7 }
0x17cd   :  { %v5473_v40 = vpop.f32.mrb[16].mxu0  ;;  %5521 = vmatpush3.msra.mxu0 %v3485_v1  ;;  %5522 = vmatprep.mubr.msk.f32.mxu0 %vm6324_vm0, %v8081_v16 }
0x17ce   :  { %v7886_v12 = vadd.f32 %v5473_v40, %v5168_v13  ;;  %v3494_v26 = vpop.f32.mrb[17].mxu0  ;;  %5530 = vmatprep.subr.mxu0 %v8081_v16  ;;  %5527 = vmatprep.mubr.msk.f32.mxu1 %vm6324_vm0, %v8081_v16 }
0x17cf   :  { %v7891_v56 = vadd.f32 %v5168_v13, %v3494_v26  ;;  %5535 = vmatprep.subr.mxu1 %v8081_v16 }
0x17d1   :  { %v5476_v37 = vpop.f32.mrb[18].mxu0 }
0x17d2   :  { %v7894_v27 = vadd.f32 %v5476_v37, %v5168_v13  ;;  %v3504_v54 = vpop.f32.mrb[19].mxu0 }
0x17d3   :  { %v7896_v35 = vadd.f32 %v5168_v13, %v3504_v54 }
0x17d5   :  { %v5479_v15 = vpop.f32.mrb[20].mxu0 }
0x17d6   :  { %v7898_v46 = vadd.f32 %v5479_v15, %v5168_v13  ;;  %v3514_v60 = vpop.f32.mrb[21].mxu0 }
0x17d7   :  { %v7900_v43 = vadd.f32 %v5168_v13, %v3514_v60 }
0x1887   :  { %v3595_v39 = vpop.f32.mrb[18].mxu1 }
0x1888   :  { %v4131_v59 = vmul.f32 0.17677669, %v3595_v39  ;;  %v5484_v42 = vpop.f32.mrb[19].mxu1 }
0x188a   :  { %v4140_v10 = vsel %vm4139_vm10, %v4131_v59, -inf }
0x188b   :  { %4141 = vmax.xlane.f32.xlu1 %v4140_v10  ;;  %v3671_v8 = vpop.f32.mrb[20].mxu1 }
0x188c   :  { %v4132_v30 = vmul.f32 0.17677669, %v3671_v8  ;;  %v5489_v31 = vpop.f32.mrb[21].mxu1 }
0x188e   :  { %v4143_v52 = vsel %vm4139_vm10, %v4132_v30, -inf }
0x188f   :  { %4144 = vmax.xlane.f32.xlu0 %v4143_v52  ;;  %v3747_v58 = vpop.f32.mrb[22].mxu1 }
0x1890   :  { %v4133_v55 = vmul.f32 0.17677669, %v3747_v58  ;;  %v5494_v63 = vpop.f32.mrb[23].mxu1 }
0x1892   :  { %v4146_v33 = vsel %vm4139_vm10, %v4133_v55, -inf }
0x1893   :  { %4147 = vmax.xlane.f32.xlu0 %v4146_v33  ;;  %v3823_v22 = vpop.f32.mrb[24].mxu1 }
0x1894   :  { %v4134_v25 = vmul.f32 0.17677669, %v3823_v22  ;;  %v5499_v3 = vpop.f32.mrb[25].mxu1 }
0x1896   :  { %v4149_v38 = vsel %vm4139_vm10, %v4134_v25, -inf }
0x1897   :  { %v3899_v9 = vpop.f32.mrb[22].mxu0  ;;  %4150 = vmax.xlane.f32.xlu1 %v4149_v38  ;;  %v3975_v17 = vpop.f32.mrb[26].mxu1 }
0x1898   :  { %v4135_v5 = vmul.f32 0.17677669, %v3899_v9  ;;  %v4136_v62 = vmul.f32 0.17677669, %v3975_v17  ;;  %v5504_v6 = vpop.f32.mrb[23].mxu0  ;;  %v5509_v29 = vpop.f32.mrb[27].mxu1 }
0x189a   :  { %v4152_v4 = vsel %vm4139_vm10, %v4135_v5, -inf  ;;  %v4155_v21 = vsel %vm4139_vm10, %v4136_v62, -inf }
0x189b   :  { %4153 = vmax.xlane.f32.xlu0 %v4152_v4  ;;  %4156 = vmax.xlane.f32.xlu1 %v4155_v21 }
0x189e   :  { %v4127_v57 = vpop.f32.mrb[28].mxu1 }
0x189f   :  { %v4138_v50 = vmul.f32 0.17677669, %v4127_v57  ;;  %v4051_v53 = vpop.f32.mrb[24].mxu0  ;;  %v5519_v48 = vpop.f32.mrb[29].mxu1 }
0x18a0   :  { %v4137_v49 = vmul.f32 0.17677669, %v4051_v53  ;;  %v5514_v20 = vpop.f32.mrb[25].mxu0 }
0x18a1   :  { %v4161_v14 = vsel %vm4139_vm10, %v4138_v50, -inf }
0x18a2   :  { %4162 = vmax.xlane.f32.xlu1 %v4161_v14  ;;  %v4158_v47 = vsel %vm4139_vm10, %v4137_v49, -inf  ;;  %v4813_v14 = vld [vmem:[#allocation9 + $0x8] sm:$0xff] }
0x18a3   :  { %4159 = vmax.xlane.f32.xlu0 %v4158_v47 }
0x1918   :  { %v4142_v28 = vpop.xlane.xlu1 %4141 }
0x1919   :  { %v4164_v61 = vsub.f32 %v4131_v59, %v4142_v28 }
0x191b   :  { %v4172_v44 = vmul.f32 1.442695, %v4164_v61 }
0x191c   :  { %v4145_v51 = vpop.xlane.xlu0 %4144 }
0x191d   :  { %6192 = vpow2.f32 %v4172_v44  ;;  %v4165_v41 = vsub.f32 %v4132_v30, %v4145_v51 }
0x191f   :  { %v4174_v45 = vmul.f32 1.442695, %v4165_v41 }
0x1920   :  { %v4148_v32 = vpop.xlane.xlu0 %4147 }
0x1921   :  { %6194 = vpow2.f32 %v4174_v45  ;;  %v4166_v36 = vsub.f32 %v4133_v55, %v4148_v32  ;;  %v4814_v32 = vld [vmem:[#allocation9 + $0x10] sm:$0xff] }
0x1923   :  { %v4176_v34 = vmul.f32 1.442695, %v4166_v36 }
0x1924   :  { %v4151_v18 = vpop.xlane.xlu1 %4150 }
0x1925   :  { %6196 = vpow2.f32 %v4176_v34  ;;  %v4167_v23 = vsub.f32 %v4134_v25, %v4151_v18 }
0x1927   :  { %v6193_v11 = vpop.eup %6192  ;;  %v4178_v13 = vmul.f32 1.442695, %v4167_v23 }
0x1928   :  { %v4154_v2 = vpop.xlane.xlu0 %4153  ;;  %v4157_v24 = vpop.xlane.xlu1 %4156  ;;  %v4188_v0 = vsel %vm4139_vm10, %v6193_v11, 0.0 }
0x1929   :  { %6198 = vpow2.f32 %v4178_v13  ;;  %v4168_v7 = vsub.f32 %v4135_v5, %v4154_v2  ;;  %v4169_v19 = vsub.f32 %v4136_v62, %v4157_v24  ;;  %4189 = vadd.xlane.f32.xlu0 %v4188_v0 }
0x192b   :  { %v6195_v1 = vpop.eup %6194  ;;  %v4180_v40 = vmul.f32 1.442695, %v4168_v7  ;;  %v4182_v26 = vmul.f32 1.442695, %v4169_v19 }
0x192c   :  { %v4191_v37 = vsel %vm4139_vm10, %v6195_v1, 0.0 }
0x192d   :  { %6200 = vpow2.f32 %v4180_v40  ;;  %4192 = vadd.xlane.f32.xlu1 %v4191_v37 }
0x192e   :  { %6202 = vpow2.f32 %v4182_v26 }
0x192f   :  { %v6197_v54 = vpop.eup %6196  ;;  %v4163_v15 = vpop.xlane.xlu1 %4162 }
0x1930   :  { %v4171_v60 = vsub.f32 %v4138_v50, %v4163_v15  ;;  %v4160_v39 = vpop.xlane.xlu0 %4159  ;;  %v4194_v59 = vsel %vm4139_vm10, %v6197_v54, 0.0 }
0x1931   :  { %v4170_v42 = vsub.f32 %v4137_v49, %v4160_v39  ;;  %4195 = vadd.xlane.f32.xlu0 %v4194_v59 }
0x1932   :  { %v4186_v10 = vmul.f32 1.442695, %v4171_v60  ;;  %v5210_v60 = vld [vmem:[%s8002_s12] ss:$0 sm:$0xff] }
0x1933   :  { %v6199_v8 = vpop.eup %6198  ;;  %v4184_v30 = vmul.f32 1.442695, %v4170_v42 }
0x1934   :  { %6204 = vpow2.f32 %v4186_v10  ;;  %v4197_v31 = vsel %vm4139_vm10, %v6199_v8, 0.0 }
0x1935   :  { %6206 = vpow2.f32 %v4184_v30  ;;  %4198 = vadd.xlane.f32.xlu1 %v4197_v31 }
0x1937   :  { %v6201_v52 = vpop.eup %6200 }
0x1938   :  { %v6203_v58 = vpop.eup %6202  ;;  %v4200_v55 = vsel %vm4139_vm10, %v6201_v52, 0.0 }
0x1939   :  { %4201 = vadd.xlane.f32.xlu0 %v4200_v55  ;;  %v4203_v63 = vsel %vm4139_vm10, %v6203_v58, 0.0 }
0x193a   :  { %4204 = vadd.xlane.f32.xlu1 %v4203_v63 }
0x193e   :  { %v6205_v33 = vpop.eup %6204 }
0x193f   :  { %v6207_v22 = vpop.eup %6206  ;;  %v4209_v25 = vsel %vm4139_vm10, %v6205_v33, 0.0 }
0x1940   :  { %4210 = vadd.xlane.f32.xlu1 %v4209_v25  ;;  %v4206_v3 = vsel %vm4139_vm10, %v6207_v22, 0.0 }
0x1941   :  { %4207 = vadd.xlane.f32.xlu0 %v4206_v3 }
0x19b6   :  { %v4190_v38 = vpop.xlane.xlu0 %4189 }
0x19b7   :  { %6208 = vrcp.f32 %v4190_v38 }
0x19ba   :  { %v4193_v9 = vpop.xlane.xlu1 %4192 }
0x19bb   :  { %6210 = vrcp.f32 %v4193_v9 }
0x19be   :  { %v4196_v17 = vpop.xlane.xlu0 %4195 }
0x19bf   :  { %6212 = vrcp.f32 %v4196_v17 }
0x19c1   :  { %v6209_v5 = vpop.eup %6208 }
0x19c2   :  { %v4220_v62 = vmul.f32 %v6209_v5, %v6193_v11  ;;  %v4199_v6 = vpop.xlane.xlu1 %4198 }
0x19c3   :  { %6214 = vrcp.f32 %v4199_v6 }
0x19c4   :  { %5523 = vmatmul.mubr.msk.f32.vlgmr.msra.gmra.mrb[26].mxu0 %vm4139_vm10, %v4220_v62 }
0x19c5   :  { %v6211_v29 = vpop.eup %6210  ;;  %5531 = vmatpush3.msra.mxu0 %v7891_v56  ;;  %5532 = vmatprep.mubr.msk.f32.mxu0 %vm6324_vm0, %v8081_v16 }
0x19c6   :  { %v4221_v4 = vmul.f32 %v6211_v29, %v6195_v1  ;;  %v4202_v21 = vpop.xlane.xlu0 %4201  ;;  %5540 = vmatprep.subr.mxu0 %v8081_v16 }
0x19c7   :  { %6216 = vrcp.f32 %v4202_v21  ;;  %v4205_v57 = vpop.xlane.xlu1 %4204 }
0x19c8   :  { %6218 = vrcp.f32 %v4205_v57  ;;  %5528 = vmatmul.mubr.msk.f32.vlgmr.msra.gmra.mrb[30].mxu1 %vm4139_vm10, %v4221_v4 }
0x19c9   :  { %v6213_v50 = vpop.eup %6212  ;;  %5536 = vmatpush3.msra.mxu1 %v7886_v12  ;;  %5537 = vmatprep.mubr.msk.f32.mxu1 %vm6324_vm0, %v8081_v16  ;;  %v4812_v12 = vld [vmem:[#allocation9] sm:$0xff] }
0x19ca   :  { %v4222_v53 = vmul.f32 %v6213_v50, %v6197_v54  ;;  %5545 = vmatprep.subr.mxu1 %v8081_v16  ;;  %v5652_v44 = vpack.c.bf16 %v4813_v14, %v4812_v12  ;;  %v5201_v54 = vld [vmem:[%s8001_s11] ss:$0 sm:$0xff]  ;;  %s6330_s11 = smov [#allocation10]  }
0x19cb   :  { %v5211_v12 = vld [vmem:[#allocation3] ss:$0 sm:$0xff]  ;;  %s5066_s12 = sshll.u32 %s6330_s11, 4  ;;  %s5067_s12 = int_to_ptr.vmem [resolvable:$true] %s5066_s12 }
0x19cc   :  { %5533 = vmatmul.mubr.msk.f32.vlgmr.msra.gmra.mrb[28].mxu0 %vm4139_vm10, %v4222_v53  ;;  %s6290_s0 = scalar_lea.vmem %s5067_s12, 128  ;;  %p6295_p11 = scmp.lt.s32.totalorder %s5067_s12, %s5067_s12 }
0x19cd   :  { %v6215_v56 = vpop.eup %6214  ;;  %5541 = vmatpush3.msra.mxu0 %v7896_v35  ;;  %v4211_v48 = vpop.xlane.xlu1 %4210  ;;  %5542 = vmatprep.mubr.msk.f32.mxu0 %vm6324_vm0, %v8081_v16  ;;  %p6291_p10 = scmp.ne.s32.totalorder %s5067_s12, %s6290_s0  ;;  %p6296_p12 = scmp.lt.s32.totalorder %s6290_s0, %s6290_s0 }
0x19ce   :  { %v4223_v49 = vmul.f32 %v6215_v56, %v6199_v8  ;;  %6220 = vrcp.f32 %v4211_v48  ;;  %v4208_v20 = vpop.xlane.xlu0 %4207  ;;  %5550 = vmatprep.subr.mxu0 %v8081_v16 }
0x19cf   :  { %6222 = vrcp.f32 %v4208_v20  ;;  %p6297_p13 = por %p6296_p12, %p6295_p11 }
0x19d0   :  { %5538 = vmatmul.mubr.msk.f32.vlgmr.msra.gmra.mrb[32].mxu1 %vm4139_vm10, %v4223_v49 }
0x19d1   :  { %v6217_v47 = vpop.eup %6216  ;;  %5546 = vmatpush3.msra.mxu1 %v7894_v27  ;;  %5547 = vmatprep.mubr.msk.f32.mxu1 %vm6324_vm0, %v8081_v16  ;;  %p6298_p0 = pnand %p6297_p13, %p6291_p10 }
0x19d2   :  { %v6219_v35 = vpop.eup %6218  ;;  %v4224_v28 = vmul.f32 %v6217_v47, %v6201_v52  ;;  %5555 = vmatprep.subr.mxu1 %v8081_v16 }
0x19d3   :  { %v4225_v61 = vmul.f32 %v6219_v35, %v6203_v58 }
0x19d4   :  { %5543 = vmatmul.mubr.msk.f32.vlgmr.msra.gmra.mrb[30].mxu0 %vm4139_vm10, %v4224_v28  ;;  %v5017_v28 = vlaneseq }
0x19d5   :  { %5548 = vmatmul.mubr.msk.f32.vlgmr.msra.gmra.mrb[34].mxu1 %vm4139_vm10, %v4225_v61  ;;  %5551 = vmatpush3.msra.mxu0 %v7900_v43  ;;  %v4815_v43 = vld [vmem:[#allocation9 + $0x18] sm:$0xff] }
0x19d6   :  { %5556 = vmatpush3.msra.mxu1 %v7898_v46  ;;  %5557 = vmatprep.mubr.msk.f32.mxu1 %vm6324_vm0, %v8081_v16  ;;  %v5656_v36 = vpack.c.bf16 %v4815_v43, %v4814_v32 }
0x19d7   :  { %5552 = vmatprep.mubr.msk.f32.mxu0 %vm6324_vm0, %v8081_v16  ;;  %5653 = vmatprep.subr.bf16.mxu0 %v5652_v44 }
0x19d8   :  { %v6221_v27 = vpop.eup %6220 }
0x19d9   :  { %v6223_v51 = vpop.eup %6222  ;;  %v4227_v41 = vmul.f32 %v6221_v27, %v6205_v33  ;;  %v5018_v27 = vand.u32 127, %v5017_v28 }
0x19da   :  { %v4226_v45 = vmul.f32 %v6223_v51, %v6207_v22  ;;  %v5020_v51 = vshrl.u32 %v5017_v28, 7 }
0x19db   :  { %5558 = vmatmul.mubr.msk.f32.vlgmr.msra.gmra.mrb[36].mxu1 %vm4139_vm10, %v4227_v41 }
0x19dc   :  { %5553 = vmatmul.mubr.msk.f32.vlgmr.msra.gmra.mrb[32].mxu0 %vm4139_vm10, %v4226_v45  ;;  %v5021_v45 = vsub.s32 %v5018_v27, %v5020_v51 }
0x19dd   :  { %5655 = vmatpush3.bf16.msra.mxu0 %v5652_v44 }
0x19de   :  { %5657 = vmatprep.subr.bf16.mxu0 %v5656_v36 }
0x19e1   :  { %5659 = vmatpush3.bf16.msra.mxu0 %v5656_v36 }
0x1a97   :  { %v4297_v46 = vpop.f32.mrb[26].mxu0 }
0x1a98   :  { %v5524_v34 = vpop.f32.mrb[27].mxu0  ;;  %5568 = vmatprep.mubr.msk.f32.mxu0 %vm222_vm8, %v4297_v46 }
0x1a9b   :  { %v4370_v16 = vpop.f32.mrb[30].mxu1 }
0x1a9c   :  { %v5529_v18 = vpop.f32.mrb[31].mxu1  ;;  %5569 = vmatmul.mubr.msk.f32.vlgmr.msra.gmra.mrb[34].mxu0 %vm222_vm8, %v4370_v16 }
0x1a9f   :  { %v4443_v23 = vpop.f32.mrb[28].mxu0 }
0x1aa0   :  { %v5534_v11 = vpop.f32.mrb[29].mxu0  ;;  %5571 = vmatprep.mubr.msk.f32.mxu0 %vm222_vm8, %v4443_v23 }
0x1aa3   :  { %v4516_v13 = vpop.f32.mrb[32].mxu1 }
0x1aa4   :  { %v5539_v2 = vpop.f32.mrb[33].mxu1  ;;  %5572 = vmatmul.mubr.msk.f32.gmra.mrb[36].mxu0 %vm222_vm8, %v4516_v13 }
0x1aa7   :  { %v4589_v24 = vpop.f32.mrb[30].mxu0 }
0x1aa8   :  { %v4662_v0 = vpop.f32.mrb[34].mxu1  ;;  %v5544_v7 = vpop.f32.mrb[31].mxu0  ;;  %5574 = vmatprep.mubr.msk.f32.mxu0 %vm222_vm8, %v4589_v24 }
0x1aa9   :  { %v5549_v19 = vpop.f32.mrb[35].mxu1  ;;  %5575 = vmatmul.mubr.msk.f32.gmra.mrb[38].mxu0 %vm222_vm8, %v4662_v0 }
0x1aae   :  { %v4808_v1 = vpop.f32.mrb[36].mxu1 }
0x1aaf   :  { %v4735_v40 = vpop.f32.mrb[32].mxu0  ;;  %v5559_v26 = vpop.f32.mrb[37].mxu1 }
0x1ab0   :  { %v5554_v37 = vpop.f32.mrb[33].mxu0  ;;  %5577 = vmatprep.mubr.msk.f32.mxu0 %vm222_vm8, %v4735_v40 }
0x1ab1   :  { %5578 = vmatmul.mubr.msk.f32.gmra.mrb[40].mxu0 %vm222_vm8, %v4808_v1 }
0x1b6f   :  { %v5570_v15 = vpop.f32.mrb[34].mxu0 }
0x1b70   :  { %v4919_v39 = vadd.f32 %v5570_v15, %v5201_v54  ;;  %v4913_v59 = vpop.f32.mrb[35].mxu0 }
0x1b71   :  { %v4914_v42 = vadd.f32 %v5201_v54, %v4913_v59 }
0x1b72   :  { %v4960_v10 = vmul.f32 %v5210_v60, %v4919_v39 }
0x1b73   :  { %v4959_v8 = vmul.f32 %v5210_v60, %v4914_v42 }
0x1b74   :  { %v4970_v30 = vsel %vm222_vm8, %v4960_v10, 0.0 }
0x1b75   :  { %4971 = vadd.xlane.f32.xlu1 %v4970_v30  ;;  %v4967_v31 = vsel %vm222_vm8, %v4959_v8, 0.0 }
0x1b76   :  { %4968 = vadd.xlane.f32.xlu0 %v4967_v31 }
0x1b77   :  { %v5573_v52 = vpop.f32.mrb[36].mxu0 }
0x1b78   :  { %v4929_v58 = vadd.f32 %v5573_v52, %v5201_v54  ;;  %v4923_v55 = vpop.f32.mrb[37].mxu0 }
0x1b79   :  { %v4924_v63 = vadd.f32 %v5201_v54, %v4923_v55 }
0x1b7a   :  { %v4962_v33 = vmul.f32 %v5210_v60, %v4929_v58 }
0x1b7b   :  { %v4961_v22 = vmul.f32 %v5210_v60, %v4924_v63 }
0x1b7c   :  { %v5576_v25 = vpop.f32.mrb[38].mxu0  ;;  %v4976_v3 = vsel %vm222_vm8, %v4962_v33, 0.0 }
0x1b7d   :  { %v4939_v38 = vadd.f32 %v5576_v25, %v5201_v54  ;;  %4977 = vadd.xlane.f32.xlu1 %v4976_v3  ;;  %v4933_v9 = vpop.f32.mrb[39].mxu0  ;;  %v4973_v17 = vsel %vm222_vm8, %v4961_v22, 0.0 }
0x1b7e   :  { %v4934_v5 = vadd.f32 %v5201_v54, %v4933_v9  ;;  %4974 = vadd.xlane.f32.xlu0 %v4973_v17 }
0x1b7f   :  { %v4964_v62 = vmul.f32 %v5210_v60, %v4939_v38 }
0x1b80   :  { %v4963_v6 = vmul.f32 %v5210_v60, %v4934_v5 }
0x1b81   :  { %v4982_v29 = vsel %vm222_vm8, %v4964_v62, 0.0 }
0x1b82   :  { %4983 = vadd.xlane.f32.xlu1 %v4982_v29  ;;  %v4979_v4 = vsel %vm222_vm8, %v4963_v6, 0.0 }
0x1b83   :  { %4980 = vadd.xlane.f32.xlu0 %v4979_v4 }
0x1b84   :  { %v5579_v21 = vpop.f32.mrb[40].mxu0 }
0x1b85   :  { %v4949_v57 = vadd.f32 %v5579_v21, %v5201_v54  ;;  %v4943_v50 = vpop.f32.mrb[41].mxu0 }
0x1b86   :  { %v4944_v53 = vadd.f32 %v5201_v54, %v4943_v50 }
0x1b87   :  { %v4966_v56 = vmul.f32 %v5210_v60, %v4949_v57 }
0x1b88   :  { %v4965_v48 = vmul.f32 %v5210_v60, %v4944_v53 }
0x1b89   :  { %v4988_v49 = vsel %vm222_vm8, %v4966_v56, 0.0 }
0x1b8a   :  { %4989 = vadd.xlane.f32.xlu1 %v4988_v49  ;;  %v4985_v20 = vsel %vm222_vm8, %v4965_v48, 0.0 }
0x1b8b   :  { %4986 = vadd.xlane.f32.xlu0 %v4985_v20 }
0x1ba1   :  { %4998 = vperm.xlu0 %5678, %v5211_v12  }
0x1c02   :  { %v4972_v35 = vpop.xlane.xlu1 %4971 }
0x1c03   :  { %v4969_v14 = vpop.xlane.xlu0 %4968 }
0x1c0a   :  { %v4978_v44 = vpop.xlane.xlu1 %4977 }
0x1c0b   :  { %v4975_v47 = vpop.xlane.xlu0 %4974 }
0x1c0f   :  { %v4984_v32 = vpop.xlane.xlu1 %4983 }
0x1c10   :  { %v4981_v61 = vpop.xlane.xlu0 %4980 }
0x1c17   :  { %v4990_v24 = vpop.xlane.xlu1 %4989 }
0x1c18   :  { %v4987_v41 = vpop.xlane.xlu0 %4986 }
0x1c20   :  { %v4999_v43 = vpop.permute.xlu0 %4998 }
0x1c21   :  { %v5001_v36 = vadd.f32 %v4999_v43, %v4969_v14  ;;  %v5002_v46 = vadd.f32 %v4999_v43, %v4972_v35  ;;  %v5003_v34 = vadd.f32 %v4999_v43, %v4975_v47  ;;  %v5004_v16 = vadd.f32 %v4999_v43, %v4978_v44 }
0x1c22   :  { %v5005_v18 = vadd.f32 %v4999_v43, %v4981_v61  ;;  %v5006_v2 = vadd.f32 %v4999_v43, %v4984_v32  ;;  %v5007_v0 = vadd.f32 %v4999_v43, %v4987_v41  ;;  %v5008_v7 = vadd.f32 %v4999_v43, %v4990_v24 }
0x1c23   :  { %v5022_v23 = vrot.slane %v5001_v36, %v5021_v45  ;;  %v5026_v11 = vrot.slane %v5002_v46, %v5021_v45  ;;  %v5030_v13 = vrot.slane %v5003_v34, %v5021_v45  ;;  %v5034_v19 = vrot.slane %v5004_v16, %v5021_v45 }
0x1c24   :  { %v5038_v40 = vrot.slane %v5005_v18, %v5021_v45  ;;  %v5042_v37 = vrot.slane %v5006_v2, %v5021_v45  ;;  %v5046_v15 = vrot.slane %v5007_v0, %v5021_v45  ;;  %v5050_v39 = vrot.slane %v5008_v7, %v5021_v45 }
0x1c25   :  { %v5051_v1 = vsel %vm554_vm1, %v5026_v11, %v5022_v23 }
0x1c26   :  { %v5052_v26 = vsel %vm557_vm2, %v5030_v13, %v5051_v1 }
0x1c27   :  { %v5053_v54 = vsel %vm560_vm3, %v5034_v19, %v5052_v26 }
0x1c28   :  { %v5054_v60 = vsel %vm563_vm4, %v5038_v40, %v5053_v54 }
0x1c29   :  { %v5055_v59 = vsel %vm566_vm5, %v5042_v37, %v5054_v60 }
0x1c2a   :  { %v5056_v42 = vsel %vm569_vm6, %v5046_v15, %v5055_v59 }
0x1c2b   :  { %v5057_v10 = vsel %vm572_vm7, %v5050_v39, %v5056_v42 }
0x1c2c   :  { %5059 = vst.msk [vmem:[#allocation10] sm:$0xff] %vm4139_vm10, %v5057_v10 }
0x1c2d   :  { %6301 = shalt.err (!%p6298_p0)
}
0x1c2e   :  { %s6302_s13 = scalar_lea.hbm %s8004_s14, 128 }
0x1c2f   :  { %p6303_p1 = scmp.ne.s32.totalorder %s8004_s14, %s6302_s13  ;;  %p6306_p2 = scmp.lt.u32.totalorder %s6302_s13, %s8004_s14 }
0x1c31   :  { %p6308_p3 = pnand %p6306_p2, %p6303_p1 }
0x1c33   :  { %6311 = shalt.err (!%p6308_p3)
}
0x1c34   :  { %5069 = dma.vmem_to_hbm [thread:$0]  %s5067_s12, 128, %s8004_s14, [#allocation6]  }
0x1c35   :  { %6316 = dma.done.wait [#allocation6], 128  }
0x1c36   :  { %6317 = vsyncadd [#allocation6], 4294967168 }
0x1c37   :  { %5073 = vsyncpa [#allocation5], 1 }
0x1c38   :  { %5074 = vsyncpa [#allocation8], 1 }
0x1c39   :  { %5075 = vsyncpa [#allocation6], 1 }

</bundles_post_ra>
